<compile_context>
chip_gen: v5e
topology: v5e:2x2
jax: 0.10.0
libtpu: 0.0.40
codegen_flags: <defaults>
</compile_context>

<pallas_src>
import jax
import jax.numpy as jnp
import numpy as np
from jax import lax
from jax.experimental import pallas as pl
from jax.experimental.pallas import tpu as pltpu


def _round_up(x, m):
    return ((x + m - 1) // m) * m


# ----------------------------- Fused model kernel ----------------------------
def _build_fused_call(T, Bp, Dp, Hp, Op, L):
    """Returns a pallas_call computing: L stacked LSTM layers over T steps + FC on
    the last hidden state.  All shapes are the padded kernel-layout shapes."""
    G = 4 * Hp
    n_rows = T * Bp
    Lr = max(L - 1, 1)   # stacked W_ih for layers 1..L-1 (dummy if L == 1)

    def kernel(x_ref, wih0_ref, wihr_ref, whh_ref, b_ref, wfc_ref, bfc_ref,
               out_ref, seq_scr, gates_scr):
        h_last = jnp.zeros((Bp, Hp), jnp.float32)

        for l in range(L):
            # ---- hoisted input projection for this layer (batched over T*Bp) ----
            if l == 0:
                gates_scr[...] = (
                    jnp.dot(x_ref[...], wih0_ref[...],
                            preferred_element_type=jnp.float32) + b_ref[0])
            else:
                gates_scr[...] = (
                    jnp.dot(seq_scr[...], wihr_ref[l - 1],
                            preferred_element_type=jnp.float32) + b_ref[l])

            whh_l = whh_ref[l]                                   # (Hp, 4*Hp)

            # ---- serial recurrence: only h @ W_hh^T + nonlinearities ----
            def step(t, carry, whh_l=whh_l):
                h, c = carry
                row = pl.multiple_of(t * Bp, Bp)
                gates = (gates_scr[pl.ds(row, Bp), :]
                         + jnp.dot(h, whh_l, preferred_element_type=jnp.float32))
                i = jax.nn.sigmoid(gates[:, 0 * Hp:1 * Hp])
                f = jax.nn.sigmoid(gates[:, 1 * Hp:2 * Hp])
                g = jnp.tanh(gates[:, 2 * Hp:3 * Hp])
                o = jax.nn.sigmoid(gates[:, 3 * Hp:4 * Hp])
                c_new = f * c + i * g
                h_new = o * jnp.tanh(c_new)
                seq_scr[pl.ds(row, Bp), :] = h_new               # lane-dense VMEM store
                return (h_new, c_new)

            zeros = jnp.zeros((Bp, Hp), jnp.float32)
            h_last, _ = lax.fori_loop(0, T, step, (zeros, zeros), unroll=True)

        # ---- FC on last timestep of last layer; single lane-dense HBM store ----
        out_ref[...] = (jnp.dot(h_last, wfc_ref[...],
                                preferred_element_type=jnp.float32) + bfc_ref[...])

    return pl.pallas_call(
        kernel,
        out_shape=jax.ShapeDtypeStruct((Bp, Op), jnp.float32),
        grid=(1,),
        in_specs=[
            pl.BlockSpec((n_rows, Dp), lambda i: (0, 0)),        # x (time-major, flat)
            pl.BlockSpec((Dp, G), lambda i: (0, 0)),             # W_ih^T layer 0
            pl.BlockSpec((Lr, Hp, G), lambda i: (0, 0, 0)),      # W_ih^T layers 1..L-1
            pl.BlockSpec((L, Hp, G), lambda i: (0, 0, 0)),       # W_hh^T all layers
            pl.BlockSpec((L, 1, G), lambda i: (0, 0, 0)),        # b_ih + b_hh
            pl.BlockSpec((Hp, Op), lambda i: (0, 0)),            # fc W^T
            pl.BlockSpec((1, Op), lambda i: (0, 0)),             # fc b
        ],
        out_specs=pl.BlockSpec((Bp, Op), lambda i: (0, 0)),
        scratch_shapes=[
            pltpu.VMEM((n_rows, Hp), jnp.float32),               # hidden sequence
            pltpu.VMEM((n_rows, G), jnp.float32),                # hoisted gate inputs
        ],
        compiler_params=pltpu.CompilerParams(
            dimension_semantics=("arbitrary",)),
    )


# ------------------------------- Parameters ----------------------------------
def init_params(key, input_dim, hidden_dim, layer_dim, output_dim):
    """PyTorch-layout parameters (used by both the packer and the reference)."""
    params = {"lstm": [], "fc": None}
    k_bound = 1.0 / np.sqrt(hidden_dim)
    for l in range(layer_dim):
        d_in = input_dim if l == 0 else hidden_dim
        key, k1, k2, k3, k4 = jax.random.split(key, 5)
        w_ih = jax.random.uniform(k1, (4 * hidden_dim, d_in), jnp.float32, -k_bound, k_bound)
        w_hh = jax.random.uniform(k2, (4 * hidden_dim, hidden_dim), jnp.float32, -k_bound, k_bound)
        b_ih = jax.random.uniform(k3, (4 * hidden_dim,), jnp.float32, -k_bound, k_bound)
        b_hh = jax.random.uniform(k4, (4 * hidden_dim,), jnp.float32, -k_bound, k_bound)
        params["lstm"].append((w_ih, w_hh, b_ih, b_hh))
    key, k1, k2 = jax.random.split(key, 3)
    fc_w = jax.random.uniform(k1, (output_dim, hidden_dim), jnp.float32, -k_bound, k_bound)
    fc_b = jax.random.uniform(k2, (output_dim,), jnp.float32, -k_bound, k_bound)
    params["fc"] = (fc_w, fc_b)
    return params


def pack_params(params, batch):
    """One-time transpose / gate-slot zero-pad / stack into the kernel layout."""
    lstm = params["lstm"]
    fc_w, fc_b = params["fc"]
    L = len(lstm)
    H = lstm[0][1].shape[1]
    D = lstm[0][0].shape[1]
    O = fc_w.shape[0]
    Hp = _round_up(H, 128)
    Dp = _round_up(D, 128)
    Op = _round_up(O, 128)
    Bp = _round_up(batch, 8)

    def pack_w(w, k_pad):
        # w: (4H, K) PyTorch layout -> (k_pad, 4*Hp), gate g occupies cols [g*Hp, g*Hp+H)
        K = w.shape[1]
        w4 = w.reshape(4, H, K)                       # (gate, hidden, in)
        wt = jnp.transpose(w4, (2, 0, 1))             # (in, gate, hidden)
        out = jnp.zeros((k_pad, 4, Hp), jnp.float32).at[:K, :, :H].set(wt)
        return out.reshape(k_pad, 4 * Hp)

    def pack_b(b_ih, b_hh):
        b = (b_ih + b_hh).reshape(4, H)
        out = jnp.zeros((4, Hp), jnp.float32).at[:, :H].set(b)
        return out.reshape(1, 4 * Hp)

    wih0 = pack_w(lstm[0][0], Dp)
    if L > 1:
        wihr = jnp.stack([pack_w(lstm[l][0], Hp) for l in range(1, L)])
    else:
        wihr = jnp.zeros((1, Hp, 4 * Hp), jnp.float32)   # dummy, never read
    whh = jnp.stack([pack_w(lstm[l][1], Hp) for l in range(L)])
    bias = jnp.stack([pack_b(lstm[l][2], lstm[l][3]) for l in range(L)])
    wfc = jnp.zeros((Hp, Op), jnp.float32).at[:H, :O].set(jnp.transpose(fc_w))
    bfc = jnp.zeros((1, Op), jnp.float32).at[0, :O].set(fc_b)
    return {
        "wih0": wih0, "wihr": wihr, "whh": whh, "bias": bias,
        "wfc": wfc, "bfc": bfc,
        "dims": (batch, Bp, D, Dp, H, Hp, O, Op, L),
    }


# ------------------------------- Forward pass ---------------------------------
def lstm_model_forward(x_btd, packed):
    """x_btd: (B, T, D) float32 -> (B, output_dim)."""
    B, Bp, D, Dp, H, Hp, O, Op, L = packed["dims"]
    T = x_btd.shape[1]
    # batch_first -> time-major, zero-pad batch/feature dims, flatten to (T*Bp, Dp)
    x_t = jnp.transpose(x_btd, (1, 0, 2))
    x_p = jnp.zeros((T, Bp, Dp), jnp.float32).at[:, :B, :D].set(x_t)
    x_p = x_p.reshape(T * Bp, Dp)

    fused = _build_fused_call(T, Bp, Dp, Hp, Op, L)
    out_p = fused(x_p, packed["wih0"], packed["wihr"], packed["whh"],
                  packed["bias"], packed["wfc"], packed["bfc"])
    return out_p[:B, :O]


# ------------------------------ Pure-JAX reference ----------------------------
def _reference(x_btd, params):
    x = jnp.transpose(x_btd, (1, 0, 2))
    for (w_ih, w_hh, b_ih, b_hh) in params["lstm"]:
        H = w_hh.shape[1]

        def step(carry, x_t):
            h, c = carry
            gates = x_t @ w_ih.T + b_ih + h @ w_hh.T + b_hh
            i = jax.nn.sigmoid(gates[:, 0 * H:1 * H])
            f = jax.nn.sigmoid(gates[:, 1 * H:2 * H])
            g = jnp.tanh(gates[:, 2 * H:3 * H])
            o = jax.nn.sigmoid(gates[:, 3 * H:4 * H])
            c = f * c + i * g
            h = o * jnp.tanh(c)
            return (h, c), h

        B = x.shape[1]
        init = (jnp.zeros((B, H), jnp.float32), jnp.zeros((B, H), jnp.float32))
        _, x = lax.scan(step, init, x)
    fc_w, fc_b = params["fc"]
    return x[-1] @ fc_w.T + fc_b


if __name__ == "__main__":
    # Small shapes consistent with the module's forward: batch=2, seq=8,
    # input_dim=16, hidden_dim=32, layer_dim=2, output_dim=4.
    B, T, D, H, L, O = 2, 8, 16, 32, 2, 4
    key = jax.random.PRNGKey(0)
    key, kx = jax.random.split(key)
    x = jax.random.normal(kx, (B, T, D), jnp.float32)
    params = init_params(key, D, H, L, O)
    packed = pack_params(params, B)

    out = lstm_model_forward(x, packed)
    out = jax.block_until_ready(out)

    ref = _reference(x, params)
    np.testing.assert_allclose(np.asarray(out), np.asarray(ref), rtol=2e-5, atol=2e-5)

    print("KERNEL_OK")
</pallas_src>

<mosaic_0001>
module attributes {stable_mosaic.version = 11 : i64} {
  func.func @kernel(%arg0: i32, %arg1: memref<64x128xf32, #tpu.memory_space<vmem>>, %arg2: memref<128x512xf32, #tpu.memory_space<vmem>>, %arg3: memref<1x128x512xf32, #tpu.memory_space<vmem>>, %arg4: memref<2x128x512xf32, #tpu.memory_space<vmem>>, %arg5: memref<2x1x512xf32, #tpu.memory_space<vmem>>, %arg6: memref<128x128xf32, #tpu.memory_space<vmem>>, %arg7: memref<1x128xf32, #tpu.memory_space<vmem>>, %arg8: memref<8x128xf32, #tpu.memory_space<vmem>>, %arg9: memref<64x128xf32, #tpu.memory_space<vmem>>, %arg10: memref<64x512xf32, #tpu.memory_space<vmem>>) attributes {dimension_semantics = [#tpu.dimension_semantics<arbitrary>], iteration_bounds = array<i64: 1>, scalar_prefetch = 0 : i64, scratch_operands = 2 : i64, tpu.core_type = #tpu.core_type<tc>, window_params = [{pipeline_mode = #tpu.pipeline_mode<synchronous>, transform_indices = @transform_0, window_bounds = array<i64: 64, 128>}, {pipeline_mode = #tpu.pipeline_mode<synchronous>, transform_indices = @transform_1, window_bounds = array<i64: 128, 512>}, {pipeline_mode = #tpu.pipeline_mode<synchronous>, transform_indices = @transform_2, window_bounds = array<i64: 1, 128, 512>}, {pipeline_mode = #tpu.pipeline_mode<synchronous>, transform_indices = @transform_3, window_bounds = array<i64: 2, 128, 512>}, {pipeline_mode = #tpu.pipeline_mode<synchronous>, transform_indices = @transform_4, window_bounds = array<i64: 2, 1, 512>}, {pipeline_mode = #tpu.pipeline_mode<synchronous>, transform_indices = @transform_5, window_bounds = array<i64: 128, 128>}, {pipeline_mode = #tpu.pipeline_mode<synchronous>, transform_indices = @transform_6, window_bounds = array<i64: 1, 128>}, {pipeline_mode = #tpu.pipeline_mode<synchronous>, transform_indices = @transform_7, window_bounds = array<i64: 8, 128>}]} {
    %c0 = arith.constant 0 : index
    %c0_0 = arith.constant 0 : index
    %0 = vector.load %arg1[%c0, %c0_0] : memref<64x128xf32, #tpu.memory_space<vmem>>, vector<64x128xf32>
    %c0_1 = arith.constant 0 : index
    %c0_2 = arith.constant 0 : index
    %1 = vector.load %arg2[%c0_1, %c0_2] : memref<128x512xf32, #tpu.memory_space<vmem>>, vector<128x512xf32>
    %cst = arith.constant dense<0.000000e+00> : vector<64x512xf32>
    %2 = tpu.matmul %0, %1, %cst {dimension_numbers = #tpu.dot_dimension_numbers<[1], [0], [0], [1], [0, 0, 1, 1], [], []>} : vector<64x128xf32>, vector<128x512xf32>, vector<64x512xf32> -> vector<64x512xf32>
    %c0_3 = arith.constant 0 : index
    %c0_4 = arith.constant 0 : index
    %c0_5 = arith.constant 0 : index
    %3 = vector.load %arg5[%c0_3, %c0_4, %c0_5] : memref<2x1x512xf32, #tpu.memory_space<vmem>>, vector<1x1x512xf32>
    %4 = vector.shape_cast %3 : vector<1x1x512xf32> to vector<1x512xf32>
    %5 = vector.broadcast %4 : vector<1x512xf32> to vector<64x512xf32>
    %6 = arith.addf %2, %5 : vector<64x512xf32>
    %c0_6 = arith.constant 0 : index
    %c0_7 = arith.constant 0 : index
    %7 = vector.load %arg10[%c0_6, %c0_7] : memref<64x512xf32, #tpu.memory_space<vmem>>, vector<64x512xf32>
    tpu.vector_store %arg10[%c0_6, %c0_7], %6 {strides = array<i32>} : memref<64x512xf32, #tpu.memory_space<vmem>>, vector<64x512xf32>,
    %c0_8 = arith.constant 0 : index
    %c0_9 = arith.constant 0 : index
    %c0_10 = arith.constant 0 : index
    %8 = vector.load %arg4[%c0_8, %c0_9, %c0_10] : memref<2x128x512xf32, #tpu.memory_space<vmem>>, vector<1x128x512xf32>
    %9 = vector.shape_cast %8 : vector<1x128x512xf32> to vector<128x512xf32>
    %cst_11 = arith.constant 0.000000e+00 : f32
    %10 = vector.broadcast %cst_11 : f32 to vector<8x128xf32>
    %c0_i32 = arith.constant 0 : i32
    %c8_i32 = arith.constant 8 : i32
    %11 = arith.muli %c0_i32, %c8_i32 : i32
    %12 = tpu.assume_multiple %11, 8 : i32
    %13 = arith.index_cast %12 : i32 to index
    %c0_12 = arith.constant 0 : index
    %14 = vector.load %arg10[%13, %c0_12] : memref<64x512xf32, #tpu.memory_space<vmem>>, vector<8x512xf32>
    %cst_13 = arith.constant dense<0.000000e+00> : vector<8x512xf32>
    %15 = tpu.matmul %10, %9, %cst_13 {dimension_numbers = #tpu.dot_dimension_numbers<[1], [0], [0], [1], [0, 0, 1, 1], [], []>} : vector<8x128xf32>, vector<128x512xf32>, vector<8x512xf32> -> vector<8x512xf32>
    %16 = arith.addf %14, %15 : vector<8x512xf32>
    %17 = vector.extract_strided_slice %16 {offsets = [0, 0], sizes = [8, 128], strides = [1, 1]} : vector<8x512xf32> to vector<8x128xf32>
    %18 = arith.negf %17 : vector<8x128xf32>
    %19 = math.exp %18 : vector<8x128xf32>
    %cst_14 = arith.constant 1.000000e+00 : f32
    %20 = vector.broadcast %cst_14 : f32 to vector<8x128xf32>
    %21 = arith.addf %20, %19 : vector<8x128xf32>
    %22 = arith.divf %20, %21 : vector<8x128xf32>
    %23 = vector.extract_strided_slice %16 {offsets = [0, 128], sizes = [8, 128], strides = [1, 1]} : vector<8x512xf32> to vector<8x128xf32>
    %24 = arith.negf %23 : vector<8x128xf32>
    %25 = math.exp %24 : vector<8x128xf32>
    %cst_15 = arith.constant 1.000000e+00 : f32
    %26 = vector.broadcast %cst_15 : f32 to vector<8x128xf32>
    %27 = arith.addf %26, %25 : vector<8x128xf32>
    %28 = arith.divf %26, %27 : vector<8x128xf32>
    %29 = vector.extract_strided_slice %16 {offsets = [0, 256], sizes = [8, 128], strides = [1, 1]} : vector<8x512xf32> to vector<8x128xf32>
    %30 = math.tanh %29 : vector<8x128xf32>
    %31 = vector.extract_strided_slice %16 {offsets = [0, 384], sizes = [8, 128], strides = [1, 1]} : vector<8x512xf32> to vector<8x128xf32>
    %32 = arith.negf %31 : vector<8x128xf32>
    %33 = math.exp %32 : vector<8x128xf32>
    %cst_16 = arith.constant 1.000000e+00 : f32
    %34 = vector.broadcast %cst_16 : f32 to vector<8x128xf32>
    %35 = arith.addf %34, %33 : vector<8x128xf32>
    %36 = arith.divf %34, %35 : vector<8x128xf32>
    %37 = arith.mulf %28, %10 : vector<8x128xf32>
    %38 = arith.mulf %22, %30 : vector<8x128xf32>
    %39 = arith.addf %37, %38 : vector<8x128xf32>
    %40 = math.tanh %39 : vector<8x128xf32>
    %41 = arith.mulf %36, %40 : vector<8x128xf32>
    %42 = arith.index_cast %12 : i32 to index
    %c0_17 = arith.constant 0 : index
    %43 = vector.load %arg9[%42, %c0_17] : memref<64x128xf32, #tpu.memory_space<vmem>>, vector<8x128xf32>
    tpu.vector_store %arg9[%42, %c0_17], %41 {strides = array<i32>} : memref<64x128xf32, #tpu.memory_space<vmem>>, vector<8x128xf32>,
    %c1_i32 = arith.constant 1 : i32
    %c8_i32_18 = arith.constant 8 : i32
    %44 = arith.muli %c1_i32, %c8_i32_18 : i32
    %45 = tpu.assume_multiple %44, 8 : i32
    %46 = arith.index_cast %45 : i32 to index
    %c0_19 = arith.constant 0 : index
    %47 = vector.load %arg10[%46, %c0_19] : memref<64x512xf32, #tpu.memory_space<vmem>>, vector<8x512xf32>
    %cst_20 = arith.constant dense<0.000000e+00> : vector<8x512xf32>
    %48 = tpu.matmul %41, %9, %cst_20 {dimension_numbers = #tpu.dot_dimension_numbers<[1], [0], [0], [1], [0, 0, 1, 1], [], []>} : vector<8x128xf32>, vector<128x512xf32>, vector<8x512xf32> -> vector<8x512xf32>
    %49 = arith.addf %47, %48 : vector<8x512xf32>
    %50 = vector.extract_strided_slice %49 {offsets = [0, 0], sizes = [8, 128], strides = [1, 1]} : vector<8x512xf32> to vector<8x128xf32>
    %51 = arith.negf %50 : vector<8x128xf32>
    %52 = math.exp %51 : vector<8x128xf32>
    %cst_21 = arith.constant 1.000000e+00 : f32
    %53 = vector.broadcast %cst_21 : f32 to vector<8x128xf32>
    %54 = arith.addf %53, %52 : vector<8x128xf32>
    %55 = arith.divf %53, %54 : vector<8x128xf32>
    %56 = vector.extract_strided_slice %49 {offsets = [0, 128], sizes = [8, 128], strides = [1, 1]} : vector<8x512xf32> to vector<8x128xf32>
    %57 = arith.negf %56 : vector<8x128xf32>
    %58 = math.exp %57 : vector<8x128xf32>
    %cst_22 = arith.constant 1.000000e+00 : f32
    %59 = vector.broadcast %cst_22 : f32 to vector<8x128xf32>
    %60 = arith.addf %59, %58 : vector<8x128xf32>
    %61 = arith.divf %59, %60 : vector<8x128xf32>
    %62 = vector.extract_strided_slice %49 {offsets = [0, 256], sizes = [8, 128], strides = [1, 1]} : vector<8x512xf32> to vector<8x128xf32>
    %63 = math.tanh %62 : vector<8x128xf32>
    %64 = vector.extract_strided_slice %49 {offsets = [0, 384], sizes = [8, 128], strides = [1, 1]} : vector<8x512xf32> to vector<8x128xf32>
    %65 = arith.negf %64 : vector<8x128xf32>
    %66 = math.exp %65 : vector<8x128xf32>
    %cst_23 = arith.constant 1.000000e+00 : f32
    %67 = vector.broadcast %cst_23 : f32 to vector<8x128xf32>
    %68 = arith.addf %67, %66 : vector<8x128xf32>
    %69 = arith.divf %67, %68 : vector<8x128xf32>
    %70 = arith.mulf %61, %39 : vector<8x128xf32>
    %71 = arith.mulf %55, %63 : vector<8x128xf32>
    %72 = arith.addf %70, %71 : vector<8x128xf32>
    %73 = math.tanh %72 : vector<8x128xf32>
    %74 = arith.mulf %69, %73 : vector<8x128xf32>
    %75 = arith.index_cast %45 : i32 to index
    %c0_24 = arith.constant 0 : index
    %76 = vector.load %arg9[%75, %c0_24] : memref<64x128xf32, #tpu.memory_space<vmem>>, vector<8x128xf32>
    tpu.vector_store %arg9[%75, %c0_24], %74 {strides = array<i32>} : memref<64x128xf32, #tpu.memory_space<vmem>>, vector<8x128xf32>,
    %c2_i32 = arith.constant 2 : i32
    %c8_i32_25 = arith.constant 8 : i32
    %77 = arith.muli %c2_i32, %c8_i32_25 : i32
    %78 = tpu.assume_multiple %77, 8 : i32
    %79 = arith.index_cast %78 : i32 to index
    %c0_26 = arith.constant 0 : index
    %80 = vector.load %arg10[%79, %c0_26] : memref<64x512xf32, #tpu.memory_space<vmem>>, vector<8x512xf32>
    %cst_27 = arith.constant dense<0.000000e+00> : vector<8x512xf32>
    %81 = tpu.matmul %74, %9, %cst_27 {dimension_numbers = #tpu.dot_dimension_numbers<[1], [0], [0], [1], [0, 0, 1, 1], [], []>} : vector<8x128xf32>, vector<128x512xf32>, vector<8x512xf32> -> vector<8x512xf32>
    %82 = arith.addf %80, %81 : vector<8x512xf32>
    %83 = vector.extract_strided_slice %82 {offsets = [0, 0], sizes = [8, 128], strides = [1, 1]} : vector<8x512xf32> to vector<8x128xf32>
    %84 = arith.negf %83 : vector<8x128xf32>
    %85 = math.exp %84 : vector<8x128xf32>
    %cst_28 = arith.constant 1.000000e+00 : f32
    %86 = vector.broadcast %cst_28 : f32 to vector<8x128xf32>
    %87 = arith.addf %86, %85 : vector<8x128xf32>
    %88 = arith.divf %86, %87 : vector<8x128xf32>
    %89 = vector.extract_strided_slice %82 {offsets = [0, 128], sizes = [8, 128], strides = [1, 1]} : vector<8x512xf32> to vector<8x128xf32>
    %90 = arith.negf %89 : vector<8x128xf32>
    %91 = math.exp %90 : vector<8x128xf32>
    %cst_29 = arith.constant 1.000000e+00 : f32
    %92 = vector.broadcast %cst_29 : f32 to vector<8x128xf32>
    %93 = arith.addf %92, %91 : vector<8x128xf32>
    %94 = arith.divf %92, %93 : vector<8x128xf32>
    %95 = vector.extract_strided_slice %82 {offsets = [0, 256], sizes = [8, 128], strides = [1, 1]} : vector<8x512xf32> to vector<8x128xf32>
    %96 = math.tanh %95 : vector<8x128xf32>
    %97 = vector.extract_strided_slice %82 {offsets = [0, 384], sizes = [8, 128], strides = [1, 1]} : vector<8x512xf32> to vector<8x128xf32>
    %98 = arith.negf %97 : vector<8x128xf32>
    %99 = math.exp %98 : vector<8x128xf32>
    %cst_30 = arith.constant 1.000000e+00 : f32
    %100 = vector.broadcast %cst_30 : f32 to vector<8x128xf32>
    %101 = arith.addf %100, %99 : vector<8x128xf32>
    %102 = arith.divf %100, %101 : vector<8x128xf32>
    %103 = arith.mulf %94, %72 : vector<8x128xf32>
    %104 = arith.mulf %88, %96 : vector<8x128xf32>
    %105 = arith.addf %103, %104 : vector<8x128xf32>
    %106 = math.tanh %105 : vector<8x128xf32>
    %107 = arith.mulf %102, %106 : vector<8x128xf32>
    %108 = arith.index_cast %78 : i32 to index
    %c0_31 = arith.constant 0 : index
    %109 = vector.load %arg9[%108, %c0_31] : memref<64x128xf32, #tpu.memory_space<vmem>>, vector<8x128xf32>
    tpu.vector_store %arg9[%108, %c0_31], %107 {strides = array<i32>} : memref<64x128xf32, #tpu.memory_space<vmem>>, vector<8x128xf32>,
    %c3_i32 = arith.constant 3 : i32
    %c8_i32_32 = arith.constant 8 : i32
    %110 = arith.muli %c3_i32, %c8_i32_32 : i32
    %111 = tpu.assume_multiple %110, 8 : i32
    %112 = arith.index_cast %111 : i32 to index
    %c0_33 = arith.constant 0 : index
    %113 = vector.load %arg10[%112, %c0_33] : memref<64x512xf32, #tpu.memory_space<vmem>>, vector<8x512xf32>
    %cst_34 = arith.constant dense<0.000000e+00> : vector<8x512xf32>
    %114 = tpu.matmul %107, %9, %cst_34 {dimension_numbers = #tpu.dot_dimension_numbers<[1], [0], [0], [1], [0, 0, 1, 1], [], []>} : vector<8x128xf32>, vector<128x512xf32>, vector<8x512xf32> -> vector<8x512xf32>
    %115 = arith.addf %113, %114 : vector<8x512xf32>
    %116 = vector.extract_strided_slice %115 {offsets = [0, 0], sizes = [8, 128], strides = [1, 1]} : vector<8x512xf32> to vector<8x128xf32>
    %117 = arith.negf %116 : vector<8x128xf32>
    %118 = math.exp %117 : vector<8x128xf32>
    %cst_35 = arith.constant 1.000000e+00 : f32
    %119 = vector.broadcast %cst_35 : f32 to vector<8x128xf32>
    %120 = arith.addf %119, %118 : vector<8x128xf32>
    %121 = arith.divf %119, %120 : vector<8x128xf32>
    %122 = vector.extract_strided_slice %115 {offsets = [0, 128], sizes = [8, 128], strides = [1, 1]} : vector<8x512xf32> to vector<8x128xf32>
    %123 = arith.negf %122 : vector<8x128xf32>
    %124 = math.exp %123 : vector<8x128xf32>
    %cst_36 = arith.constant 1.000000e+00 : f32
    %125 = vector.broadcast %cst_36 : f32 to vector<8x128xf32>
    %126 = arith.addf %125, %124 : vector<8x128xf32>
    %127 = arith.divf %125, %126 : vector<8x128xf32>
    %128 = vector.extract_strided_slice %115 {offsets = [0, 256], sizes = [8, 128], strides = [1, 1]} : vector<8x512xf32> to vector<8x128xf32>
    %129 = math.tanh %128 : vector<8x128xf32>
    %130 = vector.extract_strided_slice %115 {offsets = [0, 384], sizes = [8, 128], strides = [1, 1]} : vector<8x512xf32> to vector<8x128xf32>
    %131 = arith.negf %130 : vector<8x128xf32>
    %132 = math.exp %131 : vector<8x128xf32>
    %cst_37 = arith.constant 1.000000e+00 : f32
    %133 = vector.broadcast %cst_37 : f32 to vector<8x128xf32>
    %134 = arith.addf %133, %132 : vector<8x128xf32>
    %135 = arith.divf %133, %134 : vector<8x128xf32>
    %136 = arith.mulf %127, %105 : vector<8x128xf32>
    %137 = arith.mulf %121, %129 : vector<8x128xf32>
    %138 = arith.addf %136, %137 : vector<8x128xf32>
    %139 = math.tanh %138 : vector<8x128xf32>
    %140 = arith.mulf %135, %139 : vector<8x128xf32>
    %141 = arith.index_cast %111 : i32 to index
    %c0_38 = arith.constant 0 : index
    %142 = vector.load %arg9[%141, %c0_38] : memref<64x128xf32, #tpu.memory_space<vmem>>, vector<8x128xf32>
    tpu.vector_store %arg9[%141, %c0_38], %140 {strides = array<i32>} : memref<64x128xf32, #tpu.memory_space<vmem>>, vector<8x128xf32>,
    %c4_i32 = arith.constant 4 : i32
    %c8_i32_39 = arith.constant 8 : i32
    %143 = arith.muli %c4_i32, %c8_i32_39 : i32
    %144 = tpu.assume_multiple %143, 8 : i32
    %145 = arith.index_cast %144 : i32 to index
    %c0_40 = arith.constant 0 : index
    %146 = vector.load %arg10[%145, %c0_40] : memref<64x512xf32, #tpu.memory_space<vmem>>, vector<8x512xf32>
    %cst_41 = arith.constant dense<0.000000e+00> : vector<8x512xf32>
    %147 = tpu.matmul %140, %9, %cst_41 {dimension_numbers = #tpu.dot_dimension_numbers<[1], [0], [0], [1], [0, 0, 1, 1], [], []>} : vector<8x128xf32>, vector<128x512xf32>, vector<8x512xf32> -> vector<8x512xf32>
    %148 = arith.addf %146, %147 : vector<8x512xf32>
    %149 = vector.extract_strided_slice %148 {offsets = [0, 0], sizes = [8, 128], strides = [1, 1]} : vector<8x512xf32> to vector<8x128xf32>
    %150 = arith.negf %149 : vector<8x128xf32>
    %151 = math.exp %150 : vector<8x128xf32>
    %cst_42 = arith.constant 1.000000e+00 : f32
    %152 = vector.broadcast %cst_42 : f32 to vector<8x128xf32>
    %153 = arith.addf %152, %151 : vector<8x128xf32>
    %154 = arith.divf %152, %153 : vector<8x128xf32>
    %155 = vector.extract_strided_slice %148 {offsets = [0, 128], sizes = [8, 128], strides = [1, 1]} : vector<8x512xf32> to vector<8x128xf32>
    %156 = arith.negf %155 : vector<8x128xf32>
    %157 = math.exp %156 : vector<8x128xf32>
    %cst_43 = arith.constant 1.000000e+00 : f32
    %158 = vector.broadcast %cst_43 : f32 to vector<8x128xf32>
    %159 = arith.addf %158, %157 : vector<8x128xf32>
    %160 = arith.divf %158, %159 : vector<8x128xf32>
    %161 = vector.extract_strided_slice %148 {offsets = [0, 256], sizes = [8, 128], strides = [1, 1]} : vector<8x512xf32> to vector<8x128xf32>
    %162 = math.tanh %161 : vector<8x128xf32>
    %163 = vector.extract_strided_slice %148 {offsets = [0, 384], sizes = [8, 128], strides = [1, 1]} : vector<8x512xf32> to vector<8x128xf32>
    %164 = arith.negf %163 : vector<8x128xf32>
    %165 = math.exp %164 : vector<8x128xf32>
    %cst_44 = arith.constant 1.000000e+00 : f32
    %166 = vector.broadcast %cst_44 : f32 to vector<8x128xf32>
    %167 = arith.addf %166, %165 : vector<8x128xf32>
    %168 = arith.divf %166, %167 : vector<8x128xf32>
    %169 = arith.mulf %160, %138 : vector<8x128xf32>
    %170 = arith.mulf %154, %162 : vector<8x128xf32>
    %171 = arith.addf %169, %170 : vector<8x128xf32>
    %172 = math.tanh %171 : vector<8x128xf32>
    %173 = arith.mulf %168, %172 : vector<8x128xf32>
    %174 = arith.index_cast %144 : i32 to index
    %c0_45 = arith.constant 0 : index
    %175 = vector.load %arg9[%174, %c0_45] : memref<64x128xf32, #tpu.memory_space<vmem>>, vector<8x128xf32>
    tpu.vector_store %arg9[%174, %c0_45], %173 {strides = array<i32>} : memref<64x128xf32, #tpu.memory_space<vmem>>, vector<8x128xf32>,
    %c5_i32 = arith.constant 5 : i32
    %c8_i32_46 = arith.constant 8 : i32
    %176 = arith.muli %c5_i32, %c8_i32_46 : i32
    %177 = tpu.assume_multiple %176, 8 : i32
    %178 = arith.index_cast %177 : i32 to index
    %c0_47 = arith.constant 0 : index
    %179 = vector.load %arg10[%178, %c0_47] : memref<64x512xf32, #tpu.memory_space<vmem>>, vector<8x512xf32>
    %cst_48 = arith.constant dense<0.000000e+00> : vector<8x512xf32>
    %180 = tpu.matmul %173, %9, %cst_48 {dimension_numbers = #tpu.dot_dimension_numbers<[1], [0], [0], [1], [0, 0, 1, 1], [], []>} : vector<8x128xf32>, vector<128x512xf32>, vector<8x512xf32> -> vector<8x512xf32>
    %181 = arith.addf %179, %180 : vector<8x512xf32>
    %182 = vector.extract_strided_slice %181 {offsets = [0, 0], sizes = [8, 128], strides = [1, 1]} : vector<8x512xf32> to vector<8x128xf32>
    %183 = arith.negf %182 : vector<8x128xf32>
    %184 = math.exp %183 : vector<8x128xf32>
    %cst_49 = arith.constant 1.000000e+00 : f32
    %185 = vector.broadcast %cst_49 : f32 to vector<8x128xf32>
    %186 = arith.addf %185, %184 : vector<8x128xf32>
    %187 = arith.divf %185, %186 : vector<8x128xf32>
    %188 = vector.extract_strided_slice %181 {offsets = [0, 128], sizes = [8, 128], strides = [1, 1]} : vector<8x512xf32> to vector<8x128xf32>
    %189 = arith.negf %188 : vector<8x128xf32>
    %190 = math.exp %189 : vector<8x128xf32>
    %cst_50 = arith.constant 1.000000e+00 : f32
    %191 = vector.broadcast %cst_50 : f32 to vector<8x128xf32>
    %192 = arith.addf %191, %190 : vector<8x128xf32>
    %193 = arith.divf %191, %192 : vector<8x128xf32>
    %194 = vector.extract_strided_slice %181 {offsets = [0, 256], sizes = [8, 128], strides = [1, 1]} : vector<8x512xf32> to vector<8x128xf32>
    %195 = math.tanh %194 : vector<8x128xf32>
    %196 = vector.extract_strided_slice %181 {offsets = [0, 384], sizes = [8, 128], strides = [1, 1]} : vector<8x512xf32> to vector<8x128xf32>
    %197 = arith.negf %196 : vector<8x128xf32>
    %198 = math.exp %197 : vector<8x128xf32>
    %cst_51 = arith.constant 1.000000e+00 : f32
    %199 = vector.broadcast %cst_51 : f32 to vector<8x128xf32>
    %200 = arith.addf %199, %198 : vector<8x128xf32>
    %201 = arith.divf %199, %200 : vector<8x128xf32>
    %202 = arith.mulf %193, %171 : vector<8x128xf32>
    %203 = arith.mulf %187, %195 : vector<8x128xf32>
    %204 = arith.addf %202, %203 : vector<8x128xf32>
    %205 = math.tanh %204 : vector<8x128xf32>
    %206 = arith.mulf %201, %205 : vector<8x128xf32>
    %207 = arith.index_cast %177 : i32 to index
    %c0_52 = arith.constant 0 : index
    %208 = vector.load %arg9[%207, %c0_52] : memref<64x128xf32, #tpu.memory_space<vmem>>, vector<8x128xf32>
    tpu.vector_store %arg9[%207, %c0_52], %206 {strides = array<i32>} : memref<64x128xf32, #tpu.memory_space<vmem>>, vector<8x128xf32>,
    %c6_i32 = arith.constant 6 : i32
    %c8_i32_53 = arith.constant 8 : i32
    %209 = arith.muli %c6_i32, %c8_i32_53 : i32
    %210 = tpu.assume_multiple %209, 8 : i32
    %211 = arith.index_cast %210 : i32 to index
    %c0_54 = arith.constant 0 : index
    %212 = vector.load %arg10[%211, %c0_54] : memref<64x512xf32, #tpu.memory_space<vmem>>, vector<8x512xf32>
    %cst_55 = arith.constant dense<0.000000e+00> : vector<8x512xf32>
    %213 = tpu.matmul %206, %9, %cst_55 {dimension_numbers = #tpu.dot_dimension_numbers<[1], [0], [0], [1], [0, 0, 1, 1], [], []>} : vector<8x128xf32>, vector<128x512xf32>, vector<8x512xf32> -> vector<8x512xf32>
    %214 = arith.addf %212, %213 : vector<8x512xf32>
    %215 = vector.extract_strided_slice %214 {offsets = [0, 0], sizes = [8, 128], strides = [1, 1]} : vector<8x512xf32> to vector<8x128xf32>
    %216 = arith.negf %215 : vector<8x128xf32>
    %217 = math.exp %216 : vector<8x128xf32>
    %cst_56 = arith.constant 1.000000e+00 : f32
    %218 = vector.broadcast %cst_56 : f32 to vector<8x128xf32>
    %219 = arith.addf %218, %217 : vector<8x128xf32>
    %220 = arith.divf %218, %219 : vector<8x128xf32>
    %221 = vector.extract_strided_slice %214 {offsets = [0, 128], sizes = [8, 128], strides = [1, 1]} : vector<8x512xf32> to vector<8x128xf32>
    %222 = arith.negf %221 : vector<8x128xf32>
    %223 = math.exp %222 : vector<8x128xf32>
    %cst_57 = arith.constant 1.000000e+00 : f32
    %224 = vector.broadcast %cst_57 : f32 to vector<8x128xf32>
    %225 = arith.addf %224, %223 : vector<8x128xf32>
    %226 = arith.divf %224, %225 : vector<8x128xf32>
    %227 = vector.extract_strided_slice %214 {offsets = [0, 256], sizes = [8, 128], strides = [1, 1]} : vector<8x512xf32> to vector<8x128xf32>
    %228 = math.tanh %227 : vector<8x128xf32>
    %229 = vector.extract_strided_slice %214 {offsets = [0, 384], sizes = [8, 128], strides = [1, 1]} : vector<8x512xf32> to vector<8x128xf32>
    %230 = arith.negf %229 : vector<8x128xf32>
    %231 = math.exp %230 : vector<8x128xf32>
    %cst_58 = arith.constant 1.000000e+00 : f32
    %232 = vector.broadcast %cst_58 : f32 to vector<8x128xf32>
    %233 = arith.addf %232, %231 : vector<8x128xf32>
    %234 = arith.divf %232, %233 : vector<8x128xf32>
    %235 = arith.mulf %226, %204 : vector<8x128xf32>
    %236 = arith.mulf %220, %228 : vector<8x128xf32>
    %237 = arith.addf %235, %236 : vector<8x128xf32>
    %238 = math.tanh %237 : vector<8x128xf32>
    %239 = arith.mulf %234, %238 : vector<8x128xf32>
    %240 = arith.index_cast %210 : i32 to index
    %c0_59 = arith.constant 0 : index
    %241 = vector.load %arg9[%240, %c0_59] : memref<64x128xf32, #tpu.memory_space<vmem>>, vector<8x128xf32>
    tpu.vector_store %arg9[%240, %c0_59], %239 {strides = array<i32>} : memref<64x128xf32, #tpu.memory_space<vmem>>, vector<8x128xf32>,
    %c7_i32 = arith.constant 7 : i32
    %c8_i32_60 = arith.constant 8 : i32
    %242 = arith.muli %c7_i32, %c8_i32_60 : i32
    %243 = tpu.assume_multiple %242, 8 : i32
    %244 = arith.index_cast %243 : i32 to index
    %c0_61 = arith.constant 0 : index
    %245 = vector.load %arg10[%244, %c0_61] : memref<64x512xf32, #tpu.memory_space<vmem>>, vector<8x512xf32>
    %cst_62 = arith.constant dense<0.000000e+00> : vector<8x512xf32>
    %246 = tpu.matmul %239, %9, %cst_62 {dimension_numbers = #tpu.dot_dimension_numbers<[1], [0], [0], [1], [0, 0, 1, 1], [], []>} : vector<8x128xf32>, vector<128x512xf32>, vector<8x512xf32> -> vector<8x512xf32>
    %247 = arith.addf %245, %246 : vector<8x512xf32>
    %248 = vector.extract_strided_slice %247 {offsets = [0, 0], sizes = [8, 128], strides = [1, 1]} : vector<8x512xf32> to vector<8x128xf32>
    %249 = arith.negf %248 : vector<8x128xf32>
    %250 = math.exp %249 : vector<8x128xf32>
    %cst_63 = arith.constant 1.000000e+00 : f32
    %251 = vector.broadcast %cst_63 : f32 to vector<8x128xf32>
    %252 = arith.addf %251, %250 : vector<8x128xf32>
    %253 = arith.divf %251, %252 : vector<8x128xf32>
    %254 = vector.extract_strided_slice %247 {offsets = [0, 128], sizes = [8, 128], strides = [1, 1]} : vector<8x512xf32> to vector<8x128xf32>
    %255 = arith.negf %254 : vector<8x128xf32>
    %256 = math.exp %255 : vector<8x128xf32>
    %cst_64 = arith.constant 1.000000e+00 : f32
    %257 = vector.broadcast %cst_64 : f32 to vector<8x128xf32>
    %258 = arith.addf %257, %256 : vector<8x128xf32>
    %259 = arith.divf %257, %258 : vector<8x128xf32>
    %260 = vector.extract_strided_slice %247 {offsets = [0, 256], sizes = [8, 128], strides = [1, 1]} : vector<8x512xf32> to vector<8x128xf32>
    %261 = math.tanh %260 : vector<8x128xf32>
    %262 = vector.extract_strided_slice %247 {offsets = [0, 384], sizes = [8, 128], strides = [1, 1]} : vector<8x512xf32> to vector<8x128xf32>
    %263 = arith.negf %262 : vector<8x128xf32>
    %264 = math.exp %263 : vector<8x128xf32>
    %cst_65 = arith.constant 1.000000e+00 : f32
    %265 = vector.broadcast %cst_65 : f32 to vector<8x128xf32>
    %266 = arith.addf %265, %264 : vector<8x128xf32>
    %267 = arith.divf %265, %266 : vector<8x128xf32>
    %268 = arith.mulf %259, %237 : vector<8x128xf32>
    %269 = arith.mulf %253, %261 : vector<8x128xf32>
    %270 = arith.addf %268, %269 : vector<8x128xf32>
    %271 = math.tanh %270 : vector<8x128xf32>
    %272 = arith.mulf %267, %271 : vector<8x128xf32>
    %273 = arith.index_cast %243 : i32 to index
    %c0_66 = arith.constant 0 : index
    %274 = vector.load %arg9[%273, %c0_66] : memref<64x128xf32, #tpu.memory_space<vmem>>, vector<8x128xf32>
    tpu.vector_store %arg9[%273, %c0_66], %272 {strides = array<i32>} : memref<64x128xf32, #tpu.memory_space<vmem>>, vector<8x128xf32>,
    %c8_i32_67 = arith.constant 8 : i32
    %c0_68 = arith.constant 0 : index
    %c0_69 = arith.constant 0 : index
    %275 = vector.load %arg9[%c0_68, %c0_69] : memref<64x128xf32, #tpu.memory_space<vmem>>, vector<64x128xf32>
    %c0_70 = arith.constant 0 : index
    %c0_71 = arith.constant 0 : index
    %c0_72 = arith.constant 0 : index
    %276 = vector.load %arg3[%c0_70, %c0_71, %c0_72] : memref<1x128x512xf32, #tpu.memory_space<vmem>>, vector<1x128x512xf32>
    %277 = vector.shape_cast %276 : vector<1x128x512xf32> to vector<128x512xf32>
    %cst_73 = arith.constant dense<0.000000e+00> : vector<64x512xf32>
    %278 = tpu.matmul %275, %277, %cst_73 {dimension_numbers = #tpu.dot_dimension_numbers<[1], [0], [0], [1], [0, 0, 1, 1], [], []>} : vector<64x128xf32>, vector<128x512xf32>, vector<64x512xf32> -> vector<64x512xf32>
    %c1 = arith.constant 1 : index
    %c0_74 = arith.constant 0 : index
    %c0_75 = arith.constant 0 : index
    %279 = vector.load %arg5[%c1, %c0_74, %c0_75] : memref<2x1x512xf32, #tpu.memory_space<vmem>>, vector<1x1x512xf32>
    %280 = vector.shape_cast %279 : vector<1x1x512xf32> to vector<1x512xf32>
    %281 = vector.broadcast %280 : vector<1x512xf32> to vector<64x512xf32>
    %282 = arith.addf %278, %281 : vector<64x512xf32>
    %c0_76 = arith.constant 0 : index
    %c0_77 = arith.constant 0 : index
    %283 = vector.load %arg10[%c0_76, %c0_77] : memref<64x512xf32, #tpu.memory_space<vmem>>, vector<64x512xf32>
    tpu.vector_store %arg10[%c0_76, %c0_77], %282 {strides = array<i32>} : memref<64x512xf32, #tpu.memory_space<vmem>>, vector<64x512xf32>,
    %c1_78 = arith.constant 1 : index
    %c0_79 = arith.constant 0 : index
    %c0_80 = arith.constant 0 : index
    %284 = vector.load %arg4[%c1_78, %c0_79, %c0_80] : memref<2x128x512xf32, #tpu.memory_space<vmem>>, vector<1x128x512xf32>
    %285 = vector.shape_cast %284 : vector<1x128x512xf32> to vector<128x512xf32>
    %cst_81 = arith.constant 0.000000e+00 : f32
    %286 = vector.broadcast %cst_81 : f32 to vector<8x128xf32>
    %c0_i32_82 = arith.constant 0 : i32
    %c8_i32_83 = arith.constant 8 : i32
    %287 = arith.muli %c0_i32_82, %c8_i32_83 : i32
    %288 = tpu.assume_multiple %287, 8 : i32
    %289 = arith.index_cast %288 : i32 to index
    %c0_84 = arith.constant 0 : index
    %290 = vector.load %arg10[%289, %c0_84] : memref<64x512xf32, #tpu.memory_space<vmem>>, vector<8x512xf32>
    %cst_85 = arith.constant dense<0.000000e+00> : vector<8x512xf32>
    %291 = tpu.matmul %286, %285, %cst_85 {dimension_numbers = #tpu.dot_dimension_numbers<[1], [0], [0], [1], [0, 0, 1, 1], [], []>} : vector<8x128xf32>, vector<128x512xf32>, vector<8x512xf32> -> vector<8x512xf32>
    %292 = arith.addf %290, %291 : vector<8x512xf32>
    %293 = vector.extract_strided_slice %292 {offsets = [0, 0], sizes = [8, 128], strides = [1, 1]} : vector<8x512xf32> to vector<8x128xf32>
    %294 = arith.negf %293 : vector<8x128xf32>
    %295 = math.exp %294 : vector<8x128xf32>
    %cst_86 = arith.constant 1.000000e+00 : f32
    %296 = vector.broadcast %cst_86 : f32 to vector<8x128xf32>
    %297 = arith.addf %296, %295 : vector<8x128xf32>
    %298 = arith.divf %296, %297 : vector<8x128xf32>
    %299 = vector.extract_strided_slice %292 {offsets = [0, 128], sizes = [8, 128], strides = [1, 1]} : vector<8x512xf32> to vector<8x128xf32>
    %300 = arith.negf %299 : vector<8x128xf32>
    %301 = math.exp %300 : vector<8x128xf32>
    %cst_87 = arith.constant 1.000000e+00 : f32
    %302 = vector.broadcast %cst_87 : f32 to vector<8x128xf32>
    %303 = arith.addf %302, %301 : vector<8x128xf32>
    %304 = arith.divf %302, %303 : vector<8x128xf32>
    %305 = vector.extract_strided_slice %292 {offsets = [0, 256], sizes = [8, 128], strides = [1, 1]} : vector<8x512xf32> to vector<8x128xf32>
    %306 = math.tanh %305 : vector<8x128xf32>
    %307 = vector.extract_strided_slice %292 {offsets = [0, 384], sizes = [8, 128], strides = [1, 1]} : vector<8x512xf32> to vector<8x128xf32>
    %308 = arith.negf %307 : vector<8x128xf32>
    %309 = math.exp %308 : vector<8x128xf32>
    %cst_88 = arith.constant 1.000000e+00 : f32
    %310 = vector.broadcast %cst_88 : f32 to vector<8x128xf32>
    %311 = arith.addf %310, %309 : vector<8x128xf32>
    %312 = arith.divf %310, %311 : vector<8x128xf32>
    %313 = arith.mulf %304, %286 : vector<8x128xf32>
    %314 = arith.mulf %298, %306 : vector<8x128xf32>
    %315 = arith.addf %313, %314 : vector<8x128xf32>
    %316 = math.tanh %315 : vector<8x128xf32>
    %317 = arith.mulf %312, %316 : vector<8x128xf32>
    %318 = arith.index_cast %288 : i32 to index
    %c0_89 = arith.constant 0 : index
    %319 = vector.load %arg9[%318, %c0_89] : memref<64x128xf32, #tpu.memory_space<vmem>>, vector<8x128xf32>
    tpu.vector_store %arg9[%318, %c0_89], %317 {strides = array<i32>} : memref<64x128xf32, #tpu.memory_space<vmem>>, vector<8x128xf32>,
    %c1_i32_90 = arith.constant 1 : i32
    %c8_i32_91 = arith.constant 8 : i32
    %320 = arith.muli %c1_i32_90, %c8_i32_91 : i32
    %321 = tpu.assume_multiple %320, 8 : i32
    %322 = arith.index_cast %321 : i32 to index
    %c0_92 = arith.constant 0 : index
    %323 = vector.load %arg10[%322, %c0_92] : memref<64x512xf32, #tpu.memory_space<vmem>>, vector<8x512xf32>
    %cst_93 = arith.constant dense<0.000000e+00> : vector<8x512xf32>
    %324 = tpu.matmul %317, %285, %cst_93 {dimension_numbers = #tpu.dot_dimension_numbers<[1], [0], [0], [1], [0, 0, 1, 1], [], []>} : vector<8x128xf32>, vector<128x512xf32>, vector<8x512xf32> -> vector<8x512xf32>
    %325 = arith.addf %323, %324 : vector<8x512xf32>
    %326 = vector.extract_strided_slice %325 {offsets = [0, 0], sizes = [8, 128], strides = [1, 1]} : vector<8x512xf32> to vector<8x128xf32>
    %327 = arith.negf %326 : vector<8x128xf32>
    %328 = math.exp %327 : vector<8x128xf32>
    %cst_94 = arith.constant 1.000000e+00 : f32
    %329 = vector.broadcast %cst_94 : f32 to vector<8x128xf32>
    %330 = arith.addf %329, %328 : vector<8x128xf32>
    %331 = arith.divf %329, %330 : vector<8x128xf32>
    %332 = vector.extract_strided_slice %325 {offsets = [0, 128], sizes = [8, 128], strides = [1, 1]} : vector<8x512xf32> to vector<8x128xf32>
    %333 = arith.negf %332 : vector<8x128xf32>
    %334 = math.exp %333 : vector<8x128xf32>
    %cst_95 = arith.constant 1.000000e+00 : f32
    %335 = vector.broadcast %cst_95 : f32 to vector<8x128xf32>
    %336 = arith.addf %335, %334 : vector<8x128xf32>
    %337 = arith.divf %335, %336 : vector<8x128xf32>
    %338 = vector.extract_strided_slice %325 {offsets = [0, 256], sizes = [8, 128], strides = [1, 1]} : vector<8x512xf32> to vector<8x128xf32>
    %339 = math.tanh %338 : vector<8x128xf32>
    %340 = vector.extract_strided_slice %325 {offsets = [0, 384], sizes = [8, 128], strides = [1, 1]} : vector<8x512xf32> to vector<8x128xf32>
    %341 = arith.negf %340 : vector<8x128xf32>
    %342 = math.exp %341 : vector<8x128xf32>
    %cst_96 = arith.constant 1.000000e+00 : f32
    %343 = vector.broadcast %cst_96 : f32 to vector<8x128xf32>
    %344 = arith.addf %343, %342 : vector<8x128xf32>
    %345 = arith.divf %343, %344 : vector<8x128xf32>
    %346 = arith.mulf %337, %315 : vector<8x128xf32>
    %347 = arith.mulf %331, %339 : vector<8x128xf32>
    %348 = arith.addf %346, %347 : vector<8x128xf32>
    %349 = math.tanh %348 : vector<8x128xf32>
    %350 = arith.mulf %345, %349 : vector<8x128xf32>
    %351 = arith.index_cast %321 : i32 to index
    %c0_97 = arith.constant 0 : index
    %352 = vector.load %arg9[%351, %c0_97] : memref<64x128xf32, #tpu.memory_space<vmem>>, vector<8x128xf32>
    tpu.vector_store %arg9[%351, %c0_97], %350 {strides = array<i32>} : memref<64x128xf32, #tpu.memory_space<vmem>>, vector<8x128xf32>,
    %c2_i32_98 = arith.constant 2 : i32
    %c8_i32_99 = arith.constant 8 : i32
    %353 = arith.muli %c2_i32_98, %c8_i32_99 : i32
    %354 = tpu.assume_multiple %353, 8 : i32
    %355 = arith.index_cast %354 : i32 to index
    %c0_100 = arith.constant 0 : index
    %356 = vector.load %arg10[%355, %c0_100] : memref<64x512xf32, #tpu.memory_space<vmem>>, vector<8x512xf32>
    %cst_101 = arith.constant dense<0.000000e+00> : vector<8x512xf32>
    %357 = tpu.matmul %350, %285, %cst_101 {dimension_numbers = #tpu.dot_dimension_numbers<[1], [0], [0], [1], [0, 0, 1, 1], [], []>} : vector<8x128xf32>, vector<128x512xf32>, vector<8x512xf32> -> vector<8x512xf32>
    %358 = arith.addf %356, %357 : vector<8x512xf32>
    %359 = vector.extract_strided_slice %358 {offsets = [0, 0], sizes = [8, 128], strides = [1, 1]} : vector<8x512xf32> to vector<8x128xf32>
    %360 = arith.negf %359 : vector<8x128xf32>
    %361 = math.exp %360 : vector<8x128xf32>
    %cst_102 = arith.constant 1.000000e+00 : f32
    %362 = vector.broadcast %cst_102 : f32 to vector<8x128xf32>
    %363 = arith.addf %362, %361 : vector<8x128xf32>
    %364 = arith.divf %362, %363 : vector<8x128xf32>
    %365 = vector.extract_strided_slice %358 {offsets = [0, 128], sizes = [8, 128], strides = [1, 1]} : vector<8x512xf32> to vector<8x128xf32>
    %366 = arith.negf %365 : vector<8x128xf32>
    %367 = math.exp %366 : vector<8x128xf32>
    %cst_103 = arith.constant 1.000000e+00 : f32
    %368 = vector.broadcast %cst_103 : f32 to vector<8x128xf32>
    %369 = arith.addf %368, %367 : vector<8x128xf32>
    %370 = arith.divf %368, %369 : vector<8x128xf32>
    %371 = vector.extract_strided_slice %358 {offsets = [0, 256], sizes = [8, 128], strides = [1, 1]} : vector<8x512xf32> to vector<8x128xf32>
    %372 = math.tanh %371 : vector<8x128xf32>
    %373 = vector.extract_strided_slice %358 {offsets = [0, 384], sizes = [8, 128], strides = [1, 1]} : vector<8x512xf32> to vector<8x128xf32>
    %374 = arith.negf %373 : vector<8x128xf32>
    %375 = math.exp %374 : vector<8x128xf32>
    %cst_104 = arith.constant 1.000000e+00 : f32
    %376 = vector.broadcast %cst_104 : f32 to vector<8x128xf32>
    %377 = arith.addf %376, %375 : vector<8x128xf32>
    %378 = arith.divf %376, %377 : vector<8x128xf32>
    %379 = arith.mulf %370, %348 : vector<8x128xf32>
    %380 = arith.mulf %364, %372 : vector<8x128xf32>
    %381 = arith.addf %379, %380 : vector<8x128xf32>
    %382 = math.tanh %381 : vector<8x128xf32>
    %383 = arith.mulf %378, %382 : vector<8x128xf32>
    %384 = arith.index_cast %354 : i32 to index
    %c0_105 = arith.constant 0 : index
    %385 = vector.load %arg9[%384, %c0_105] : memref<64x128xf32, #tpu.memory_space<vmem>>, vector<8x128xf32>
    tpu.vector_store %arg9[%384, %c0_105], %383 {strides = array<i32>} : memref<64x128xf32, #tpu.memory_space<vmem>>, vector<8x128xf32>,
    %c3_i32_106 = arith.constant 3 : i32
    %c8_i32_107 = arith.constant 8 : i32
    %386 = arith.muli %c3_i32_106, %c8_i32_107 : i32
    %387 = tpu.assume_multiple %386, 8 : i32
    %388 = arith.index_cast %387 : i32 to index
    %c0_108 = arith.constant 0 : index
    %389 = vector.load %arg10[%388, %c0_108] : memref<64x512xf32, #tpu.memory_space<vmem>>, vector<8x512xf32>
    %cst_109 = arith.constant dense<0.000000e+00> : vector<8x512xf32>
    %390 = tpu.matmul %383, %285, %cst_109 {dimension_numbers = #tpu.dot_dimension_numbers<[1], [0], [0], [1], [0, 0, 1, 1], [], []>} : vector<8x128xf32>, vector<128x512xf32>, vector<8x512xf32> -> vector<8x512xf32>
    %391 = arith.addf %389, %390 : vector<8x512xf32>
    %392 = vector.extract_strided_slice %391 {offsets = [0, 0], sizes = [8, 128], strides = [1, 1]} : vector<8x512xf32> to vector<8x128xf32>
    %393 = arith.negf %392 : vector<8x128xf32>
    %394 = math.exp %393 : vector<8x128xf32>
    %cst_110 = arith.constant 1.000000e+00 : f32
    %395 = vector.broadcast %cst_110 : f32 to vector<8x128xf32>
    %396 = arith.addf %395, %394 : vector<8x128xf32>
    %397 = arith.divf %395, %396 : vector<8x128xf32>
    %398 = vector.extract_strided_slice %391 {offsets = [0, 128], sizes = [8, 128], strides = [1, 1]} : vector<8x512xf32> to vector<8x128xf32>
    %399 = arith.negf %398 : vector<8x128xf32>
    %400 = math.exp %399 : vector<8x128xf32>
    %cst_111 = arith.constant 1.000000e+00 : f32
    %401 = vector.broadcast %cst_111 : f32 to vector<8x128xf32>
    %402 = arith.addf %401, %400 : vector<8x128xf32>
    %403 = arith.divf %401, %402 : vector<8x128xf32>
    %404 = vector.extract_strided_slice %391 {offsets = [0, 256], sizes = [8, 128], strides = [1, 1]} : vector<8x512xf32> to vector<8x128xf32>
    %405 = math.tanh %404 : vector<8x128xf32>
    %406 = vector.extract_strided_slice %391 {offsets = [0, 384], sizes = [8, 128], strides = [1, 1]} : vector<8x512xf32> to vector<8x128xf32>
    %407 = arith.negf %406 : vector<8x128xf32>
    %408 = math.exp %407 : vector<8x128xf32>
    %cst_112 = arith.constant 1.000000e+00 : f32
    %409 = vector.broadcast %cst_112 : f32 to vector<8x128xf32>
    %410 = arith.addf %409, %408 : vector<8x128xf32>
    %411 = arith.divf %409, %410 : vector<8x128xf32>
    %412 = arith.mulf %403, %381 : vector<8x128xf32>
    %413 = arith.mulf %397, %405 : vector<8x128xf32>
    %414 = arith.addf %412, %413 : vector<8x128xf32>
    %415 = math.tanh %414 : vector<8x128xf32>
    %416 = arith.mulf %411, %415 : vector<8x128xf32>
    %417 = arith.index_cast %387 : i32 to index
    %c0_113 = arith.constant 0 : index
    %418 = vector.load %arg9[%417, %c0_113] : memref<64x128xf32, #tpu.memory_space<vmem>>, vector<8x128xf32>
    tpu.vector_store %arg9[%417, %c0_113], %416 {strides = array<i32>} : memref<64x128xf32, #tpu.memory_space<vmem>>, vector<8x128xf32>,
    %c4_i32_114 = arith.constant 4 : i32
    %c8_i32_115 = arith.constant 8 : i32
    %419 = arith.muli %c4_i32_114, %c8_i32_115 : i32
    %420 = tpu.assume_multiple %419, 8 : i32
    %421 = arith.index_cast %420 : i32 to index
    %c0_116 = arith.constant 0 : index
    %422 = vector.load %arg10[%421, %c0_116] : memref<64x512xf32, #tpu.memory_space<vmem>>, vector<8x512xf32>
    %cst_117 = arith.constant dense<0.000000e+00> : vector<8x512xf32>
    %423 = tpu.matmul %416, %285, %cst_117 {dimension_numbers = #tpu.dot_dimension_numbers<[1], [0], [0], [1], [0, 0, 1, 1], [], []>} : vector<8x128xf32>, vector<128x512xf32>, vector<8x512xf32> -> vector<8x512xf32>
    %424 = arith.addf %422, %423 : vector<8x512xf32>
    %425 = vector.extract_strided_slice %424 {offsets = [0, 0], sizes = [8, 128], strides = [1, 1]} : vector<8x512xf32> to vector<8x128xf32>
    %426 = arith.negf %425 : vector<8x128xf32>
    %427 = math.exp %426 : vector<8x128xf32>
    %cst_118 = arith.constant 1.000000e+00 : f32
    %428 = vector.broadcast %cst_118 : f32 to vector<8x128xf32>
    %429 = arith.addf %428, %427 : vector<8x128xf32>
    %430 = arith.divf %428, %429 : vector<8x128xf32>
    %431 = vector.extract_strided_slice %424 {offsets = [0, 128], sizes = [8, 128], strides = [1, 1]} : vector<8x512xf32> to vector<8x128xf32>
    %432 = arith.negf %431 : vector<8x128xf32>
    %433 = math.exp %432 : vector<8x128xf32>
    %cst_119 = arith.constant 1.000000e+00 : f32
    %434 = vector.broadcast %cst_119 : f32 to vector<8x128xf32>
    %435 = arith.addf %434, %433 : vector<8x128xf32>
    %436 = arith.divf %434, %435 : vector<8x128xf32>
    %437 = vector.extract_strided_slice %424 {offsets = [0, 256], sizes = [8, 128], strides = [1, 1]} : vector<8x512xf32> to vector<8x128xf32>
    %438 = math.tanh %437 : vector<8x128xf32>
    %439 = vector.extract_strided_slice %424 {offsets = [0, 384], sizes = [8, 128], strides = [1, 1]} : vector<8x512xf32> to vector<8x128xf32>
    %440 = arith.negf %439 : vector<8x128xf32>
    %441 = math.exp %440 : vector<8x128xf32>
    %cst_120 = arith.constant 1.000000e+00 : f32
    %442 = vector.broadcast %cst_120 : f32 to vector<8x128xf32>
    %443 = arith.addf %442, %441 : vector<8x128xf32>
    %444 = arith.divf %442, %443 : vector<8x128xf32>
    %445 = arith.mulf %436, %414 : vector<8x128xf32>
    %446 = arith.mulf %430, %438 : vector<8x128xf32>
    %447 = arith.addf %445, %446 : vector<8x128xf32>
    %448 = math.tanh %447 : vector<8x128xf32>
    %449 = arith.mulf %444, %448 : vector<8x128xf32>
    %450 = arith.index_cast %420 : i32 to index
    %c0_121 = arith.constant 0 : index
    %451 = vector.load %arg9[%450, %c0_121] : memref<64x128xf32, #tpu.memory_space<vmem>>, vector<8x128xf32>
    tpu.vector_store %arg9[%450, %c0_121], %449 {strides = array<i32>} : memref<64x128xf32, #tpu.memory_space<vmem>>, vector<8x128xf32>,
    %c5_i32_122 = arith.constant 5 : i32
    %c8_i32_123 = arith.constant 8 : i32
    %452 = arith.muli %c5_i32_122, %c8_i32_123 : i32
    %453 = tpu.assume_multiple %452, 8 : i32
    %454 = arith.index_cast %453 : i32 to index
    %c0_124 = arith.constant 0 : index
    %455 = vector.load %arg10[%454, %c0_124] : memref<64x512xf32, #tpu.memory_space<vmem>>, vector<8x512xf32>
    %cst_125 = arith.constant dense<0.000000e+00> : vector<8x512xf32>
    %456 = tpu.matmul %449, %285, %cst_125 {dimension_numbers = #tpu.dot_dimension_numbers<[1], [0], [0], [1], [0, 0, 1, 1], [], []>} : vector<8x128xf32>, vector<128x512xf32>, vector<8x512xf32> -> vector<8x512xf32>
    %457 = arith.addf %455, %456 : vector<8x512xf32>
    %458 = vector.extract_strided_slice %457 {offsets = [0, 0], sizes = [8, 128], strides = [1, 1]} : vector<8x512xf32> to vector<8x128xf32>
    %459 = arith.negf %458 : vector<8x128xf32>
    %460 = math.exp %459 : vector<8x128xf32>
    %cst_126 = arith.constant 1.000000e+00 : f32
    %461 = vector.broadcast %cst_126 : f32 to vector<8x128xf32>
    %462 = arith.addf %461, %460 : vector<8x128xf32>
    %463 = arith.divf %461, %462 : vector<8x128xf32>
    %464 = vector.extract_strided_slice %457 {offsets = [0, 128], sizes = [8, 128], strides = [1, 1]} : vector<8x512xf32> to vector<8x128xf32>
    %465 = arith.negf %464 : vector<8x128xf32>
    %466 = math.exp %465 : vector<8x128xf32>
    %cst_127 = arith.constant 1.000000e+00 : f32
    %467 = vector.broadcast %cst_127 : f32 to vector<8x128xf32>
    %468 = arith.addf %467, %466 : vector<8x128xf32>
    %469 = arith.divf %467, %468 : vector<8x128xf32>
    %470 = vector.extract_strided_slice %457 {offsets = [0, 256], sizes = [8, 128], strides = [1, 1]} : vector<8x512xf32> to vector<8x128xf32>
    %471 = math.tanh %470 : vector<8x128xf32>
    %472 = vector.extract_strided_slice %457 {offsets = [0, 384], sizes = [8, 128], strides = [1, 1]} : vector<8x512xf32> to vector<8x128xf32>
    %473 = arith.negf %472 : vector<8x128xf32>
    %474 = math.exp %473 : vector<8x128xf32>
    %cst_128 = arith.constant 1.000000e+00 : f32
    %475 = vector.broadcast %cst_128 : f32 to vector<8x128xf32>
    %476 = arith.addf %475, %474 : vector<8x128xf32>
    %477 = arith.divf %475, %476 : vector<8x128xf32>
    %478 = arith.mulf %469, %447 : vector<8x128xf32>
    %479 = arith.mulf %463, %471 : vector<8x128xf32>
    %480 = arith.addf %478, %479 : vector<8x128xf32>
    %481 = math.tanh %480 : vector<8x128xf32>
    %482 = arith.mulf %477, %481 : vector<8x128xf32>
    %483 = arith.index_cast %453 : i32 to index
    %c0_129 = arith.constant 0 : index
    %484 = vector.load %arg9[%483, %c0_129] : memref<64x128xf32, #tpu.memory_space<vmem>>, vector<8x128xf32>
    tpu.vector_store %arg9[%483, %c0_129], %482 {strides = array<i32>} : memref<64x128xf32, #tpu.memory_space<vmem>>, vector<8x128xf32>,
    %c6_i32_130 = arith.constant 6 : i32
    %c8_i32_131 = arith.constant 8 : i32
    %485 = arith.muli %c6_i32_130, %c8_i32_131 : i32
    %486 = tpu.assume_multiple %485, 8 : i32
    %487 = arith.index_cast %486 : i32 to index
    %c0_132 = arith.constant 0 : index
    %488 = vector.load %arg10[%487, %c0_132] : memref<64x512xf32, #tpu.memory_space<vmem>>, vector<8x512xf32>
    %cst_133 = arith.constant dense<0.000000e+00> : vector<8x512xf32>
    %489 = tpu.matmul %482, %285, %cst_133 {dimension_numbers = #tpu.dot_dimension_numbers<[1], [0], [0], [1], [0, 0, 1, 1], [], []>} : vector<8x128xf32>, vector<128x512xf32>, vector<8x512xf32> -> vector<8x512xf32>
    %490 = arith.addf %488, %489 : vector<8x512xf32>
    %491 = vector.extract_strided_slice %490 {offsets = [0, 0], sizes = [8, 128], strides = [1, 1]} : vector<8x512xf32> to vector<8x128xf32>
    %492 = arith.negf %491 : vector<8x128xf32>
    %493 = math.exp %492 : vector<8x128xf32>
    %cst_134 = arith.constant 1.000000e+00 : f32
    %494 = vector.broadcast %cst_134 : f32 to vector<8x128xf32>
    %495 = arith.addf %494, %493 : vector<8x128xf32>
    %496 = arith.divf %494, %495 : vector<8x128xf32>
    %497 = vector.extract_strided_slice %490 {offsets = [0, 128], sizes = [8, 128], strides = [1, 1]} : vector<8x512xf32> to vector<8x128xf32>
    %498 = arith.negf %497 : vector<8x128xf32>
    %499 = math.exp %498 : vector<8x128xf32>
    %cst_135 = arith.constant 1.000000e+00 : f32
    %500 = vector.broadcast %cst_135 : f32 to vector<8x128xf32>
    %501 = arith.addf %500, %499 : vector<8x128xf32>
    %502 = arith.divf %500, %501 : vector<8x128xf32>
    %503 = vector.extract_strided_slice %490 {offsets = [0, 256], sizes = [8, 128], strides = [1, 1]} : vector<8x512xf32> to vector<8x128xf32>
    %504 = math.tanh %503 : vector<8x128xf32>
    %505 = vector.extract_strided_slice %490 {offsets = [0, 384], sizes = [8, 128], strides = [1, 1]} : vector<8x512xf32> to vector<8x128xf32>
    %506 = arith.negf %505 : vector<8x128xf32>
    %507 = math.exp %506 : vector<8x128xf32>
    %cst_136 = arith.constant 1.000000e+00 : f32
    %508 = vector.broadcast %cst_136 : f32 to vector<8x128xf32>
    %509 = arith.addf %508, %507 : vector<8x128xf32>
    %510 = arith.divf %508, %509 : vector<8x128xf32>
    %511 = arith.mulf %502, %480 : vector<8x128xf32>
    %512 = arith.mulf %496, %504 : vector<8x128xf32>
    %513 = arith.addf %511, %512 : vector<8x128xf32>
    %514 = math.tanh %513 : vector<8x128xf32>
    %515 = arith.mulf %510, %514 : vector<8x128xf32>
    %516 = arith.index_cast %486 : i32 to index
    %c0_137 = arith.constant 0 : index
    %517 = vector.load %arg9[%516, %c0_137] : memref<64x128xf32, #tpu.memory_space<vmem>>, vector<8x128xf32>
    tpu.vector_store %arg9[%516, %c0_137], %515 {strides = array<i32>} : memref<64x128xf32, #tpu.memory_space<vmem>>, vector<8x128xf32>,
    %c7_i32_138 = arith.constant 7 : i32
    %c8_i32_139 = arith.constant 8 : i32
    %518 = arith.muli %c7_i32_138, %c8_i32_139 : i32
    %519 = tpu.assume_multiple %518, 8 : i32
    %520 = arith.index_cast %519 : i32 to index
    %c0_140 = arith.constant 0 : index
    %521 = vector.load %arg10[%520, %c0_140] : memref<64x512xf32, #tpu.memory_space<vmem>>, vector<8x512xf32>
    %cst_141 = arith.constant dense<0.000000e+00> : vector<8x512xf32>
    %522 = tpu.matmul %515, %285, %cst_141 {dimension_numbers = #tpu.dot_dimension_numbers<[1], [0], [0], [1], [0, 0, 1, 1], [], []>} : vector<8x128xf32>, vector<128x512xf32>, vector<8x512xf32> -> vector<8x512xf32>
    %523 = arith.addf %521, %522 : vector<8x512xf32>
    %524 = vector.extract_strided_slice %523 {offsets = [0, 0], sizes = [8, 128], strides = [1, 1]} : vector<8x512xf32> to vector<8x128xf32>
    %525 = arith.negf %524 : vector<8x128xf32>
    %526 = math.exp %525 : vector<8x128xf32>
    %cst_142 = arith.constant 1.000000e+00 : f32
    %527 = vector.broadcast %cst_142 : f32 to vector<8x128xf32>
    %528 = arith.addf %527, %526 : vector<8x128xf32>
    %529 = arith.divf %527, %528 : vector<8x128xf32>
    %530 = vector.extract_strided_slice %523 {offsets = [0, 128], sizes = [8, 128], strides = [1, 1]} : vector<8x512xf32> to vector<8x128xf32>
    %531 = arith.negf %530 : vector<8x128xf32>
    %532 = math.exp %531 : vector<8x128xf32>
    %cst_143 = arith.constant 1.000000e+00 : f32
    %533 = vector.broadcast %cst_143 : f32 to vector<8x128xf32>
    %534 = arith.addf %533, %532 : vector<8x128xf32>
    %535 = arith.divf %533, %534 : vector<8x128xf32>
    %536 = vector.extract_strided_slice %523 {offsets = [0, 256], sizes = [8, 128], strides = [1, 1]} : vector<8x512xf32> to vector<8x128xf32>
    %537 = math.tanh %536 : vector<8x128xf32>
    %538 = vector.extract_strided_slice %523 {offsets = [0, 384], sizes = [8, 128], strides = [1, 1]} : vector<8x512xf32> to vector<8x128xf32>
    %539 = arith.negf %538 : vector<8x128xf32>
    %540 = math.exp %539 : vector<8x128xf32>
    %cst_144 = arith.constant 1.000000e+00 : f32
    %541 = vector.broadcast %cst_144 : f32 to vector<8x128xf32>
    %542 = arith.addf %541, %540 : vector<8x128xf32>
    %543 = arith.divf %541, %542 : vector<8x128xf32>
    %544 = arith.mulf %535, %513 : vector<8x128xf32>
    %545 = arith.mulf %529, %537 : vector<8x128xf32>
    %546 = arith.addf %544, %545 : vector<8x128xf32>
    %547 = math.tanh %546 : vector<8x128xf32>
    %548 = arith.mulf %543, %547 : vector<8x128xf32>
    %549 = arith.index_cast %519 : i32 to index
    %c0_145 = arith.constant 0 : index
    %550 = vector.load %arg9[%549, %c0_145] : memref<64x128xf32, #tpu.memory_space<vmem>>, vector<8x128xf32>
    tpu.vector_store %arg9[%549, %c0_145], %548 {strides = array<i32>} : memref<64x128xf32, #tpu.memory_space<vmem>>, vector<8x128xf32>,
    %c8_i32_146 = arith.constant 8 : i32
    %c0_147 = arith.constant 0 : index
    %c0_148 = arith.constant 0 : index
    %551 = vector.load %arg6[%c0_147, %c0_148] : memref<128x128xf32, #tpu.memory_space<vmem>>, vector<128x128xf32>
    %cst_149 = arith.constant dense<0.000000e+00> : vector<8x128xf32>
    %552 = tpu.matmul %548, %551, %cst_149 {dimension_numbers = #tpu.dot_dimension_numbers<[1], [0], [0], [1], [0, 0, 1, 1], [], []>} : vector<8x128xf32>, vector<128x128xf32>, vector<8x128xf32> -> vector<8x128xf32>
    %c0_150 = arith.constant 0 : index
    %c0_151 = arith.constant 0 : index
    %553 = vector.load %arg7[%c0_150, %c0_151] : memref<1x128xf32, #tpu.memory_space<vmem>>, vector<1x128xf32>
    %554 = vector.broadcast %553 : vector<1x128xf32> to vector<8x128xf32>
    %555 = arith.addf %552, %554 : vector<8x128xf32>
    %c0_152 = arith.constant 0 : index
    %c0_153 = arith.constant 0 : index
    %556 = vector.load %arg8[%c0_152, %c0_153] : memref<8x128xf32, #tpu.memory_space<vmem>>, vector<8x128xf32>
    tpu.vector_store %arg8[%c0_152, %c0_153], %555 {strides = array<i32>} : memref<8x128xf32, #tpu.memory_space<vmem>>, vector<8x128xf32>,
    return
  }
  func.func @transform_0(%arg0: i32) -> (i32, i32) {
    %c0_i32 = arith.constant 0 : i32
    %c0_i32_0 = arith.constant 0 : i32
    %c0_i32_1 = arith.constant 0 : i32
    return %c0_i32, %c0_i32_0 : i32, i32
  }
  func.func @transform_1(%arg0: i32) -> (i32, i32) {
    %c0_i32 = arith.constant 0 : i32
    %c0_i32_0 = arith.constant 0 : i32
    %c0_i32_1 = arith.constant 0 : i32
    return %c0_i32, %c0_i32_0 : i32, i32
  }
  func.func @transform_2(%arg0: i32) -> (i32, i32, i32) {
    %c0_i32 = arith.constant 0 : i32
    %c0_i32_0 = arith.constant 0 : i32
    %c0_i32_1 = arith.constant 0 : i32
    %c0_i32_2 = arith.constant 0 : i32
    return %c0_i32, %c0_i32_0, %c0_i32_1 : i32, i32, i32
  }
  func.func @transform_3(%arg0: i32) -> (i32, i32, i32) {
    %c0_i32 = arith.constant 0 : i32
    %c0_i32_0 = arith.constant 0 : i32
    %c0_i32_1 = arith.constant 0 : i32
    %c0_i32_2 = arith.constant 0 : i32
    return %c0_i32, %c0_i32_0, %c0_i32_1 : i32, i32, i32
  }
  func.func @transform_4(%arg0: i32) -> (i32, i32, i32) {
    %c0_i32 = arith.constant 0 : i32
    %c0_i32_0 = arith.constant 0 : i32
    %c0_i32_1 = arith.constant 0 : i32
    %c0_i32_2 = arith.constant 0 : i32
    return %c0_i32, %c0_i32_0, %c0_i32_1 : i32, i32, i32
  }
  func.func @transform_5(%arg0: i32) -> (i32, i32) {
    %c0_i32 = arith.constant 0 : i32
    %c0_i32_0 = arith.constant 0 : i32
    %c0_i32_1 = arith.constant 0 : i32
    return %c0_i32, %c0_i32_0 : i32, i32
  }
  func.func @transform_6(%arg0: i32) -> (i32, i32) {
    %c0_i32 = arith.constant 0 : i32
    %c0_i32_0 = arith.constant 0 : i32
    %c0_i32_1 = arith.constant 0 : i32
    return %c0_i32, %c0_i32_0 : i32, i32
  }
  func.func @transform_7(%arg0: i32) -> (i32, i32) {
    %c0_i32 = arith.constant 0 : i32
    %c0_i32_0 = arith.constant 0 : i32
    %c0_i32_1 = arith.constant 0 : i32
    return %c0_i32, %c0_i32_0 : i32, i32
  }
}

</mosaic_0001>

<bundles_post_ra>
// kernel: tpu_custom_call.1
= control target key start
LH: loop header
LB: loop body
LE: loop exit
PB: predicated region body
PF: predicated region fallthrough
CT: control target
= control target key end

     0   :  { %12 = vsyncpa [#allocation5], 0  ;;  %s5993_s0 = inlined_call_operand.hbm [shape: f32[64,128], index: 0, kind: input, shape index: {}]   ;;  %s5994_s1 = inlined_call_operand.hbm [shape: f32[128,512], index: 1, kind: input, shape index: {}]   ;;  %s5995_s2 = inlined_call_operand.hbm [shape: f32[1,128,512], index: 2, kind: input, shape index: {}]   ;;  %s5996_s3 = inlined_call_operand.hbm [shape: f32[2,128,512], index: 3, kind: input, shape index: {}]   ;;  %s5997_s4 = inlined_call_operand.hbm [shape: f32[2,1,512], index: 4, kind: input, shape index: {}]   ;;  %s5998_s5 = inlined_call_operand.hbm [shape: f32[128,128], index: 5, kind: input, shape index: {}]   ;;  %s5999_s6 = inlined_call_operand.vmem [shape: f32[1,128], index: 6, kind: input, shape index: {}]   ;;  %s6000_s7 = inlined_call_operand.hbm [shape: f32[8,128], index: 7, kind: output, shape index: {}]  }
   0x1   :  { %13 = vsyncpa [#allocation8], 0 }
   0x2   :  { %14 = vsyncpa [#allocation11], 0 }
   0x3   :  { %15 = vsyncpa [#allocation14], 0  ;;  %s34_s26 = sshll.u32 %s5994_s1, 4  ;;  %s35_s26 = int_to_ptr.hbm [resolvable:$true] %s34_s26 }
   0x4   :  { %16 = vsyncpa [#allocation6], 0  ;;  %s3963_s27 = smov [#allocation7]   ;;  %s60_s8 = sshll.u32 %s5996_s3, 4  ;;  %s61_s8 = int_to_ptr.hbm [resolvable:$true] %s60_s8 }
   0x5   :  { %s36_s28 = sshll.u32 %s3963_s27, 4  ;;  %s3964_s9 = smov 512   ;;  %s37_s28 = int_to_ptr.vmem [resolvable:$true] %s36_s28 }
   0x6   :  { %s3965_s10 = smov 32   ;;  %s3966_s11 = smov [#allocation10]  }
   0x7   :  { %42 = dma.hbm_to_vmem [thread:$0]  %s35_s26, 8192, %s37_s28, [#allocation8], %s3964_s9, %s3964_s9, %s3965_s10  }
   0x8   :  { %s62_s12 = sshll.u32 %s3966_s11, 4  ;;  %s21_s15 = sshll.u32 %s5993_s0, 4  ;;  %s63_s12 = int_to_ptr.vmem [resolvable:$true] %s62_s12  ;;  %s22_s15 = int_to_ptr.hbm [resolvable:$true] %s21_s15 }
   0x9   :  { %68 = dma.hbm_to_vmem [thread:$0]  %s61_s8, 16384, %s63_s12, [#allocation11], %s3964_s9, %s3964_s9, %s3965_s10  }
   0xa   :  { %s3967_s1 = smov [#allocation4]   ;;  %s47_s3 = sshll.u32 %s5995_s2, 4  ;;  %s48_s3 = int_to_ptr.hbm [resolvable:$true] %s47_s3 }
   0xb   :  { %s23_s16 = sshll.u32 %s3967_s1, 4  ;;  %s3968_s19 = smov 128   ;;  %s24_s16 = int_to_ptr.vmem [resolvable:$true] %s23_s16 }
   0xc   :  { %s3969_s20 = smov 8   ;;  %s3970_s21 = smov [#allocation9]  }
   0xd   :  { %29 = dma.hbm_to_vmem [thread:$0]  %s22_s15, 1024, %s24_s16, [#allocation5], %s3968_s19, %s3968_s19, %s3969_s20  }
   0xe   :  { %s49_s22 = sshll.u32 %s3970_s21, 4  ;;  %s73_s0 = sshll.u32 %s5997_s4, 4  ;;  %s50_s22 = int_to_ptr.vmem [resolvable:$true] %s49_s22  ;;  %s74_s0 = int_to_ptr.hbm [resolvable:$true] %s73_s0 }
   0xf   :  { %55 = dma.hbm_to_vmem [thread:$0]  %s48_s3, 8192, %s50_s22, [#allocation8], %s3964_s9, %s3964_s9, %s3965_s10  }
  0x10   :  { %s3971_s25 = smov [#allocation12]   ;;  %s86_s2 = sshll.u32 %s5998_s5, 4  ;;  %s87_s2 = int_to_ptr.hbm [resolvable:$true] %s86_s2 }
  0x11   :  { %s75_s26 = sshll.u32 %s3971_s25, 4  ;;  %s3972_s29 = smov 64   ;;  %s76_s26 = int_to_ptr.vmem [resolvable:$true] %s75_s26 }
  0x12   :  { %s3973_s30 = smov 4   ;;  %s3974_s8 = smov [#allocation13]  }
  0x13   :  { %81 = dma.hbm_to_vmem [thread:$0]  %s74_s0, 128, %s76_s26, [#allocation11], %s3972_s29, %s3972_s29, %s3973_s30  }
  0x14   :  { %s88_s11 = sshll.u32 %s3974_s8, 4  ;;  %s89_s11 = int_to_ptr.vmem [resolvable:$true] %s88_s11 }
  0x15   :  { %94 = dma.hbm_to_vmem [thread:$0]  %s87_s2, 2048, %s89_s11, [#allocation14], %s3968_s19, %s3968_s19, %s3969_s20  }
  0x16   :  { %3953 = dma.done.wait [#allocation5], 1024  }
  0x17   :  { %3954 = vsyncadd [#allocation5], 4294966272 }
  0x18   :  { %3955 = dma.done.wait [#allocation8], 16384  }
  0x19   :  { %3956 = vsyncadd [#allocation8], 4294950912 }
  0x1a   :  { %3957 = dma.done.wait [#allocation11], 16512  }
  0x1b   :  { %3958 = vsyncadd [#allocation11], 4294950784 }
  0x1c   :  { %3959 = dma.done.wait [#allocation14], 2048  }
  0x1d   :  { %3960 = vsyncadd [#allocation14], 4294965248  ;;  %v189_v0 = vld [vmem:[#allocation7 + $0x1e0] sm:$0xff]  ;;  %v190_v1 = vld [vmem:[#allocation7 + $0x1e8] sm:$0xff]  ;;  %s3976_s9 = smov [#allocation15]   ;;  %s3318_s14 = sshll.u32 %s6000_s7, 4  ;;  %s3319_s14 = int_to_ptr.hbm [resolvable:$true] %s3318_s14 }
  0x1e   :  { %v191_v2 = vld [vmem:[#allocation7 + $0x1f0] sm:$0xff]  ;;  %203 = vmatpush.msra.mxu0 %v189_v0  ;;  %244 = vmatpush.msra.mxu1 %v190_v1  ;;  %v192_v3 = vld [vmem:[#allocation7 + $0x1f8] sm:$0xff]  ;;  %v185_v4 = vld [vmem:[#allocation7 + $0x1c0] sm:$0xff]  ;;  %s3316_s10 = sshll.u32 %s3976_s9, 4  ;;  %s3317_s10 = int_to_ptr.vmem [resolvable:$true] %s3316_s10 }
  0x1f   :  { %v186_v5 = vld [vmem:[#allocation7 + $0x1c8] sm:$0xff]  ;;  %285 = vmatpush.msra.mxu2 %v191_v2  ;;  %326 = vmatpush.msra.mxu3 %v192_v3  ;;  %v187_v6 = vld [vmem:[#allocation7 + $0x1d0] sm:$0xff]  ;;  %v188_v7 = vld [vmem:[#allocation7 + $0x1d8] sm:$0xff] }
  0x20   :  { %v181_v8 = vld [vmem:[#allocation7 + $0x1a0] sm:$0xff]  ;;  %204 = vmatpush.msra.mxu0 %v185_v4  ;;  %245 = vmatpush.msra.mxu1 %v186_v5  ;;  %v182_v9 = vld [vmem:[#allocation7 + $0x1a8] sm:$0xff]  ;;  %v183_v10 = vld [vmem:[#allocation7 + $0x1b0] sm:$0xff] }
  0x21   :  { %v184_v11 = vld [vmem:[#allocation7 + $0x1b8] sm:$0xff]  ;;  %286 = vmatpush.msra.mxu2 %v187_v6  ;;  %327 = vmatpush.msra.mxu3 %v188_v7  ;;  %v177_v12 = vld [vmem:[#allocation7 + $0x180] sm:$0xff]  ;;  %v178_v13 = vld [vmem:[#allocation7 + $0x188] sm:$0xff] }
  0x22   :  { %205 = vmatpush.msra.mxu0 %v181_v8  ;;  %246 = vmatpush.msra.mxu1 %v182_v9  ;;  %v179_v14 = vld [vmem:[#allocation7 + $0x190] sm:$0xff]  ;;  %v180_v15 = vld [vmem:[#allocation7 + $0x198] sm:$0xff]  ;;  %v173_v16 = vld [vmem:[#allocation7 + $0x160] sm:$0xff] }
  0x23   :  { %287 = vmatpush.msra.mxu2 %v183_v10  ;;  %328 = vmatpush.msra.mxu3 %v184_v11  ;;  %v174_v17 = vld [vmem:[#allocation7 + $0x168] sm:$0xff]  ;;  %v175_v18 = vld [vmem:[#allocation7 + $0x170] sm:$0xff]  ;;  %v176_v19 = vld [vmem:[#allocation7 + $0x178] sm:$0xff] }
  0x24   :  { %206 = vmatpush.msra.mxu0 %v177_v12  ;;  %247 = vmatpush.msra.mxu1 %v178_v13  ;;  %v169_v20 = vld [vmem:[#allocation7 + $0x140] sm:$0xff]  ;;  %v170_v21 = vld [vmem:[#allocation7 + $0x148] sm:$0xff]  ;;  %v171_v22 = vld [vmem:[#allocation7 + $0x150] sm:$0xff] }
  0x25   :  { %288 = vmatpush.msra.mxu2 %v179_v14  ;;  %329 = vmatpush.msra.mxu3 %v180_v15  ;;  %v172_v23 = vld [vmem:[#allocation7 + $0x158] sm:$0xff]  ;;  %v165_v24 = vld [vmem:[#allocation7 + $0x120] sm:$0xff]  ;;  %v166_v25 = vld [vmem:[#allocation7 + $0x128] sm:$0xff] }
  0x26   :  { %207 = vmatpush.msra.mxu0 %v173_v16  ;;  %248 = vmatpush.msra.mxu1 %v174_v17  ;;  %v167_v26 = vld [vmem:[#allocation7 + $0x130] sm:$0xff]  ;;  %v168_v27 = vld [vmem:[#allocation7 + $0x138] sm:$0xff]  ;;  %v161_v28 = vld [vmem:[#allocation7 + $0x100] sm:$0xff] }
  0x27   :  { %289 = vmatpush.msra.mxu2 %v175_v18  ;;  %330 = vmatpush.msra.mxu3 %v176_v19  ;;  %v162_v29 = vld [vmem:[#allocation7 + $0x108] sm:$0xff]  ;;  %v163_v30 = vld [vmem:[#allocation7 + $0x110] sm:$0xff]  ;;  %v164_v31 = vld [vmem:[#allocation7 + $0x118] sm:$0xff] }
  0x28   :  { %208 = vmatpush.msra.mxu0 %v169_v20  ;;  %249 = vmatpush.msra.mxu1 %v170_v21  ;;  %v157_v32 = vld [vmem:[#allocation7 + $0xe0] sm:$0xff]  ;;  %v158_v33 = vld [vmem:[#allocation7 + $0xe8] sm:$0xff]  ;;  %v159_v34 = vld [vmem:[#allocation7 + $0xf0] sm:$0xff] }
  0x29   :  { %290 = vmatpush.msra.mxu2 %v171_v22  ;;  %331 = vmatpush.msra.mxu3 %v172_v23  ;;  %v160_v35 = vld [vmem:[#allocation7 + $0xf8] sm:$0xff]  ;;  %v153_v36 = vld [vmem:[#allocation7 + $0xc0] sm:$0xff]  ;;  %v154_v37 = vld [vmem:[#allocation7 + $0xc8] sm:$0xff] }
  0x2a   :  { %209 = vmatpush.msra.mxu0 %v165_v24  ;;  %250 = vmatpush.msra.mxu1 %v166_v25  ;;  %v155_v38 = vld [vmem:[#allocation7 + $0xd0] sm:$0xff]  ;;  %v156_v39 = vld [vmem:[#allocation7 + $0xd8] sm:$0xff]  ;;  %v149_v40 = vld [vmem:[#allocation7 + $0xa0] sm:$0xff] }
  0x2b   :  { %291 = vmatpush.msra.mxu2 %v167_v26  ;;  %332 = vmatpush.msra.mxu3 %v168_v27  ;;  %v150_v41 = vld [vmem:[#allocation7 + $0xa8] sm:$0xff]  ;;  %v151_v42 = vld [vmem:[#allocation7 + $0xb0] sm:$0xff]  ;;  %v152_v43 = vld [vmem:[#allocation7 + $0xb8] sm:$0xff] }
  0x2c   :  { %210 = vmatpush.msra.mxu0 %v161_v28  ;;  %251 = vmatpush.msra.mxu1 %v162_v29  ;;  %v145_v44 = vld [vmem:[#allocation7 + $0x80] sm:$0xff]  ;;  %v146_v45 = vld [vmem:[#allocation7 + $0x88] sm:$0xff]  ;;  %v147_v46 = vld [vmem:[#allocation7 + $0x90] sm:$0xff] }
  0x2d   :  { %292 = vmatpush.msra.mxu2 %v163_v30  ;;  %333 = vmatpush.msra.mxu3 %v164_v31  ;;  %v148_v47 = vld [vmem:[#allocation7 + $0x98] sm:$0xff]  ;;  %v141_v48 = vld [vmem:[#allocation7 + $0x60] sm:$0xff]  ;;  %v142_v49 = vld [vmem:[#allocation7 + $0x68] sm:$0xff] }
  0x2e   :  { %211 = vmatpush.msra.mxu0 %v157_v32  ;;  %252 = vmatpush.msra.mxu1 %v158_v33  ;;  %v143_v50 = vld [vmem:[#allocation7 + $0x70] sm:$0xff]  ;;  %v144_v51 = vld [vmem:[#allocation7 + $0x78] sm:$0xff]  ;;  %v137_v52 = vld [vmem:[#allocation7 + $0x40] sm:$0xff] }
  0x2f   :  { %293 = vmatpush.msra.mxu2 %v159_v34  ;;  %334 = vmatpush.msra.mxu3 %v160_v35  ;;  %v138_v53 = vld [vmem:[#allocation7 + $0x48] sm:$0xff]  ;;  %v139_v54 = vld [vmem:[#allocation7 + $0x50] sm:$0xff]  ;;  %v140_v55 = vld [vmem:[#allocation7 + $0x58] sm:$0xff] }
  0x30   :  { %212 = vmatpush.msra.mxu0 %v153_v36  ;;  %253 = vmatpush.msra.mxu1 %v154_v37  ;;  %v133_v56 = vld [vmem:[#allocation7 + $0x20] sm:$0xff]  ;;  %v134_v57 = vld [vmem:[#allocation7 + $0x28] sm:$0xff]  ;;  %v135_v58 = vld [vmem:[#allocation7 + $0x30] sm:$0xff] }
  0x31   :  { %294 = vmatpush.msra.mxu2 %v155_v38  ;;  %335 = vmatpush.msra.mxu3 %v156_v39  ;;  %v136_v59 = vld [vmem:[#allocation7 + $0x38] sm:$0xff]  ;;  %v129_v60 = vld [vmem:[#allocation7] sm:$0xff]  ;;  %v130_v61 = vld [vmem:[#allocation7 + $0x8] sm:$0xff] }
  0x32   :  { %213 = vmatpush.msra.mxu0 %v149_v40  ;;  %254 = vmatpush.msra.mxu1 %v150_v41  ;;  %v131_v62 = vld [vmem:[#allocation7 + $0x10] sm:$0xff]  ;;  %v132_v63 = vld [vmem:[#allocation7 + $0x18] sm:$0xff]  ;;  %v121_v0 = vld [vmem:[#allocation4] sm:$0xff] }
  0x33   :  { %295 = vmatpush.msra.mxu2 %v151_v42  ;;  %336 = vmatpush.msra.mxu3 %v152_v43  ;;  %v4035_v1 = vld [vmem:[#allocation10 + $0x1e0] sm:$0xff]  ;;  %v4037_v2 = vld [vmem:[#allocation10 + $0x1e8] sm:$0xff]  ;;  %v4039_v3 = vld [vmem:[#allocation10 + $0x1f8] sm:$0xff] }
  0x34   :  { %214 = vmatpush.msra.mxu0 %v145_v44  ;;  %255 = vmatpush.msra.mxu1 %v146_v45  ;;  %v4041_v4 = vld [vmem:[#allocation10 + $0x1f0] sm:$0xff]  ;;  %v4043_v5 = vld [vmem:[#allocation10 + $0x1c0] sm:$0xff]  ;;  %v4045_v6 = vld [vmem:[#allocation10 + $0x1c8] sm:$0xff] }
  0x35   :  { %296 = vmatpush.msra.mxu2 %v147_v46  ;;  %337 = vmatpush.msra.mxu3 %v148_v47  ;;  %v4049_v7 = vld [vmem:[#allocation10 + $0x1d8] sm:$0xff]  ;;  %v4051_v8 = vld [vmem:[#allocation10 + $0x1d0] sm:$0xff]  ;;  %v4054_v9 = vld [vmem:[#allocation10 + $0x1a0] sm:$0xff] }
  0x36   :  { %215 = vmatpush.msra.mxu0 %v141_v48  ;;  %256 = vmatpush.msra.mxu1 %v142_v49  ;;  %v4056_v10 = vld [vmem:[#allocation10 + $0x1a8] sm:$0xff]  ;;  %v4061_v11 = vld [vmem:[#allocation10 + $0x1b8] sm:$0xff]  ;;  %v4063_v12 = vld [vmem:[#allocation10 + $0x1b0] sm:$0xff] }
  0x37   :  { %297 = vmatpush.msra.mxu2 %v143_v50  ;;  %338 = vmatpush.msra.mxu3 %v144_v51  ;;  %v122_v13 = vld [vmem:[#allocation4 + $0x8] sm:$0xff]  ;;  %v4069_v14 = vld [vmem:[#allocation10 + $0x180] sm:$0xff]  ;;  %v4075_v16 = vld [vmem:[#allocation10 + $0x198] sm:$0xff] }
  0x38   :  { %216 = vmatpush.msra.mxu0 %v137_v52  ;;  %257 = vmatpush.msra.mxu1 %v138_v53  ;;  %v4071_v15 = vld [vmem:[#allocation10 + $0x188] sm:$0xff]  ;;  %v4077_v17 = vld [vmem:[#allocation10 + $0x190] sm:$0xff]  ;;  %v4079_v18 = vld [vmem:[#allocation10 + $0x160] sm:$0xff] }
  0x39   :  { %298 = vmatpush.msra.mxu2 %v139_v54  ;;  %339 = vmatpush.msra.mxu3 %v140_v55  ;;  %v4081_v19 = vld [vmem:[#allocation10 + $0x168] sm:$0xff]  ;;  %v4085_v20 = vld [vmem:[#allocation10 + $0x178] sm:$0xff]  ;;  %v4087_v21 = vld [vmem:[#allocation10 + $0x170] sm:$0xff] }
  0x3a   :  { %217 = vmatpush.msra.mxu0 %v133_v56  ;;  %258 = vmatpush.msra.mxu1 %v134_v57  ;;  %v4090_v22 = vld [vmem:[#allocation10 + $0x140] sm:$0xff]  ;;  %v4092_v23 = vld [vmem:[#allocation10 + $0x148] sm:$0xff]  ;;  %v4097_v24 = vld [vmem:[#allocation10 + $0x158] sm:$0xff] }
  0x3b   :  { %299 = vmatpush.msra.mxu2 %v135_v58  ;;  %340 = vmatpush.msra.mxu3 %v136_v59  ;;  %v4099_v25 = vld [vmem:[#allocation10 + $0x150] sm:$0xff]  ;;  %v4105_v27 = vld [vmem:[#allocation10 + $0x120] sm:$0xff]  ;;  %v4107_v28 = vld [vmem:[#allocation10 + $0x128] sm:$0xff] }
  0x3c   :  { %218 = vmatpush.msra.mxu0 %v129_v60  ;;  %259 = vmatpush.msra.mxu1 %v130_v61  ;;  %v123_v26 = vld [vmem:[#allocation4 + $0x10] sm:$0xff]  ;;  %v4111_v29 = vld [vmem:[#allocation10 + $0x138] sm:$0xff]  ;;  %v4115_v31 = vld [vmem:[#allocation10 + $0x100] sm:$0xff] }
  0x3d   :  { %300 = vmatpush.msra.mxu2 %v131_v62  ;;  %341 = vmatpush.msra.mxu3 %v132_v63  ;;  %v4113_v30 = vld [vmem:[#allocation10 + $0x130] sm:$0xff]  ;;  %v4117_v32 = vld [vmem:[#allocation10 + $0x108] sm:$0xff]  ;;  %v4121_v33 = vld [vmem:[#allocation10 + $0x118] sm:$0xff] }
  0x3e   :  { %219 = vmatmul.f32.vlgmr.msra.gmra.mxu0 %v121_v0  ;;  %260 = vmatmul.f32.vlgmr.msra.gmra.mxu1 %v121_v0  ;;  %v4123_v34 = vld [vmem:[#allocation10 + $0x110] sm:$0xff]  ;;  %v4126_v35 = vld [vmem:[#allocation10 + $0xe0] sm:$0xff]  ;;  %v4128_v36 = vld [vmem:[#allocation10 + $0xe8] sm:$0xff] }
  0x3f   :  { %301 = vmatmul.f32.vlgmr.msra.gmra.mxu2 %v121_v0  ;;  %342 = vmatmul.f32.vlgmr.msra.gmra.mxu3 %v121_v0  ;;  %v4133_v37 = vld [vmem:[#allocation10 + $0xf8] sm:$0xff]  ;;  %v4135_v38 = vld [vmem:[#allocation10 + $0xf0] sm:$0xff]  ;;  %v4141_v40 = vld [vmem:[#allocation10 + $0xc0] sm:$0xff] }
  0x40   :  { %470 = vmatpush.msrb.mxu0 %v4035_v1  ;;  %490 = vmatpush.msrb.mxu1 %v4037_v2  ;;  %v124_v39 = vld [vmem:[#allocation4 + $0x18] sm:$0xff]  ;;  %v4143_v41 = vld [vmem:[#allocation10 + $0xc8] sm:$0xff]  ;;  %v4149_v43 = vld [vmem:[#allocation10 + $0xd0] sm:$0xff] }
  0x41   :  { %530 = vmatpush.msrb.mxu3 %v4039_v3  ;;  %510 = vmatpush.msrb.mxu2 %v4041_v4  ;;  %v4147_v42 = vld [vmem:[#allocation10 + $0xd8] sm:$0xff]  ;;  %6271 = vst [vmem:[#allocation22_spill] sm:$0xff] %v4149_v43  ;;  %v4151_v44 = vld [vmem:[#allocation10 + $0xa0] sm:$0xff]  ;;  %v4153_v45 = vld [vmem:[#allocation10 + $0xa8] sm:$0xff] }
  0x42   :  { %471 = vmatpush.msrb.mxu0 %v4043_v5  ;;  %491 = vmatpush.msrb.mxu1 %v4045_v6  ;;  %6270 = vst [vmem:[#allocation21_spill] sm:$0xff] %v4147_v42  ;;  %v4157_v46 = vld [vmem:[#allocation10 + $0xb8] sm:$0xff]  ;;  %v4159_v47 = vld [vmem:[#allocation10 + $0xb0] sm:$0xff]  ;;  %v4162_v48 = vld [vmem:[#allocation10 + $0x80] sm:$0xff] }
  0x43   :  { %531 = vmatpush.msrb.mxu3 %v4049_v7  ;;  %511 = vmatpush.msrb.mxu2 %v4051_v8  ;;  %6272 = vst [vmem:[#allocation23_spill] sm:$0xff] %v4151_v44  ;;  %v4164_v49 = vld [vmem:[#allocation10 + $0x88] sm:$0xff]  ;;  %v4169_v50 = vld [vmem:[#allocation10 + $0x98] sm:$0xff]  ;;  %v4171_v51 = vld [vmem:[#allocation10 + $0x90] sm:$0xff] }
  0x44   :  { %472 = vmatpush.msrb.mxu0 %v4054_v9  ;;  %492 = vmatpush.msrb.mxu1 %v4056_v10  ;;  %6273 = vst [vmem:[#allocation24_spill] sm:$0xff] %v4153_v45  ;;  %v125_v52 = vld [vmem:[#allocation4 + $0x20] sm:$0xff]  ;;  %v4179_v54 = vld [vmem:[#allocation10 + $0x68] sm:$0xff]  ;;  %v4183_v55 = vld [vmem:[#allocation10 + $0x78] sm:$0xff] }
  0x45   :  { %532 = vmatpush.msrb.mxu3 %v4061_v11  ;;  %512 = vmatpush.msrb.mxu2 %v4063_v12  ;;  %6274 = vst [vmem:[#allocation25_spill] sm:$0xff] %v4157_v46  ;;  %v4177_v53 = vld [vmem:[#allocation10 + $0x60] sm:$0xff]  ;;  %v4185_v56 = vld [vmem:[#allocation10 + $0x70] sm:$0xff]  ;;  %v4189_v58 = vld [vmem:[#allocation10 + $0x48] sm:$0xff] }
  0x46   :  { %222 = vmatmul.f32.gmra.mxu0 %v122_v13  ;;  %263 = vmatmul.f32.gmra.mxu1 %v122_v13  ;;  %6275 = vst [vmem:[#allocation26_spill] sm:$0xff] %v4159_v47  ;;  %v4187_v57 = vld [vmem:[#allocation10 + $0x40] sm:$0xff]  ;;  %v4193_v59 = vld [vmem:[#allocation10 + $0x58] sm:$0xff]  ;;  %v4195_v60 = vld [vmem:[#allocation10 + $0x50] sm:$0xff] }
  0x47   :  { %304 = vmatmul.f32.gmra.mxu2 %v122_v13  ;;  %345 = vmatmul.f32.gmra.mxu3 %v122_v13  ;;  %6276 = vst [vmem:[#allocation27_spill] sm:$0xff] %v4162_v48  ;;  %v4198_v61 = vld [vmem:[#allocation10 + $0x20] sm:$0xff]  ;;  %v4200_v62 = vld [vmem:[#allocation10 + $0x28] sm:$0xff]  ;;  %v4205_v63 = vld [vmem:[#allocation10 + $0x30] sm:$0xff] }
  0x48   :  { %473 = vmatpush.msrb.mxu0 %v4069_v14  ;;  %493 = vmatpush.msrb.mxu1 %v4071_v15  ;;  %6277 = vst [vmem:[#allocation28_spill] sm:$0xff] %v4164_v49  ;;  %v4207_v0 = vld [vmem:[#allocation10 + $0x38] sm:$0xff]  ;;  %v126_v13 = vld [vmem:[#allocation4 + $0x28] sm:$0xff] }
  0x49   :  { %533 = vmatpush.msrb.mxu3 %v4075_v16  ;;  %513 = vmatpush.msrb.mxu2 %v4077_v17  ;;  %6278 = vst [vmem:[#allocation29_spill] sm:$0xff] %v4169_v50 }
  0x4a   :  { %474 = vmatpush.msrb.mxu0 %v4079_v18  ;;  %494 = vmatpush.msrb.mxu1 %v4081_v19  ;;  %6279 = vst [vmem:[#allocation30_spill] sm:$0xff] %v4171_v51 }
  0x4b   :  { %534 = vmatpush.msrb.mxu3 %v4085_v20  ;;  %514 = vmatpush.msrb.mxu2 %v4087_v21  ;;  %6280 = vst [vmem:[#allocation31_spill] sm:$0xff] %v4177_v53 }
  0x4c   :  { %475 = vmatpush.msrb.mxu0 %v4090_v22  ;;  %495 = vmatpush.msrb.mxu1 %v4092_v23  ;;  %6281 = vst [vmem:[#allocation32_spill] sm:$0xff] %v4179_v54 }
  0x4d   :  { %535 = vmatpush.msrb.mxu3 %v4097_v24  ;;  %515 = vmatpush.msrb.mxu2 %v4099_v25  ;;  %6282 = vst [vmem:[#allocation33_spill] sm:$0xff] %v4183_v55 }
  0x4e   :  { %225 = vmatmul.f32.gmra.mxu0 %v123_v26  ;;  %266 = vmatmul.f32.gmra.mxu1 %v123_v26  ;;  %6283 = vst [vmem:[#allocation34_spill] sm:$0xff] %v4185_v56 }
  0x4f   :  { %307 = vmatmul.f32.gmra.mxu2 %v123_v26  ;;  %348 = vmatmul.f32.gmra.mxu3 %v123_v26  ;;  %6284 = vst [vmem:[#allocation35_spill] sm:$0xff] %v4187_v57  ;;  %v4213_v26 = vld [vmem:[#allocation10] sm:$0xff] }
  0x50   :  { %476 = vmatpush.msrb.mxu0 %v4105_v27  ;;  %496 = vmatpush.msrb.mxu1 %v4107_v28  ;;  %6285 = vst [vmem:[#allocation36_spill] sm:$0xff] %v4189_v58 }
  0x51   :  { %536 = vmatpush.msrb.mxu3 %v4111_v29  ;;  %516 = vmatpush.msrb.mxu2 %v4113_v30  ;;  %6286 = vst [vmem:[#allocation37_spill] sm:$0xff] %v4193_v59 }
  0x52   :  { %477 = vmatpush.msrb.mxu0 %v4115_v31  ;;  %497 = vmatpush.msrb.mxu1 %v4117_v32  ;;  %6287 = vst [vmem:[#allocation38_spill] sm:$0xff] %v4195_v60 }
  0x53   :  { %537 = vmatpush.msrb.mxu3 %v4121_v33  ;;  %517 = vmatpush.msrb.mxu2 %v4123_v34  ;;  %6288 = vst [vmem:[#allocation39_spill] sm:$0xff] %v4198_v61 }
  0x54   :  { %478 = vmatpush.msrb.mxu0 %v4126_v35  ;;  %498 = vmatpush.msrb.mxu1 %v4128_v36  ;;  %6289 = vst [vmem:[#allocation40_spill] sm:$0xff] %v4200_v62 }
  0x55   :  { %538 = vmatpush.msrb.mxu3 %v4133_v37  ;;  %518 = vmatpush.msrb.mxu2 %v4135_v38  ;;  %6290 = vst [vmem:[#allocation41_spill] sm:$0xff] %v4205_v63 }
  0x56   :  { %228 = vmatmul.f32.gmra.mxu0 %v124_v39  ;;  %269 = vmatmul.f32.gmra.mxu1 %v124_v39  ;;  %6291 = vst [vmem:[#allocation42_spill] sm:$0xff] %v4207_v0 }
  0x57   :  { %310 = vmatmul.f32.gmra.mxu2 %v124_v39  ;;  %351 = vmatmul.f32.gmra.mxu3 %v124_v39  ;;  %6292 = vst [vmem:[#allocation43_spill] sm:$0xff] %v4213_v26  ;;  %v4215_v39 = vld [vmem:[#allocation10 + $0x8] sm:$0xff] }
  0x58   :  { %479 = vmatpush.msrb.mxu0 %v4141_v40  ;;  %499 = vmatpush.msrb.mxu1 %v4143_v41  ;;  %6293 = vst [vmem:[#allocation44_spill] sm:$0xff] %v4215_v39 }
  0x59   :  { %539 = vmatpush.msrb.mxu3 %v4147_v42  ;;  %519 = vmatpush.msrb.mxu2 %v4149_v43 }
  0x5a   :  { %480 = vmatpush.msrb.mxu0 %v4151_v44  ;;  %500 = vmatpush.msrb.mxu1 %v4153_v45 }
  0x5b   :  { %540 = vmatpush.msrb.mxu3 %v4157_v46  ;;  %520 = vmatpush.msrb.mxu2 %v4159_v47 }
  0x5c   :  { %481 = vmatpush.msrb.mxu0 %v4162_v48  ;;  %501 = vmatpush.msrb.mxu1 %v4164_v49 }
  0x5d   :  { %541 = vmatpush.msrb.mxu3 %v4169_v50  ;;  %521 = vmatpush.msrb.mxu2 %v4171_v51 }
  0x5e   :  { %231 = vmatmul.f32.gmra.mxu0 %v125_v52  ;;  %272 = vmatmul.f32.gmra.mxu1 %v125_v52 }
  0x5f   :  { %313 = vmatmul.f32.gmra.mxu2 %v125_v52  ;;  %354 = vmatmul.f32.gmra.mxu3 %v125_v52  ;;  %v4219_v52 = vld [vmem:[#allocation10 + $0x10] sm:$0xff] }
  0x60   :  { %482 = vmatpush.msrb.mxu0 %v4177_v53  ;;  %502 = vmatpush.msrb.mxu1 %v4179_v54  ;;  %6294 = vst [vmem:[#allocation45_spill] sm:$0xff] %v4219_v52 }
  0x61   :  { %542 = vmatpush.msrb.mxu3 %v4183_v55  ;;  %522 = vmatpush.msrb.mxu2 %v4185_v56 }
  0x62   :  { %483 = vmatpush.msrb.mxu0 %v4187_v57  ;;  %503 = vmatpush.msrb.mxu1 %v4189_v58  ;;  %v4221_v58 = vld [vmem:[#allocation10 + $0x18] sm:$0xff] }
  0x63   :  { %543 = vmatpush.msrb.mxu3 %v4193_v59  ;;  %523 = vmatpush.msrb.mxu2 %v4195_v60  ;;  %6295 = vst [vmem:[#allocation46_spill] sm:$0xff] %v4221_v58 }
  0x64   :  { %484 = vmatpush.msrb.mxu0 %v4198_v61  ;;  %504 = vmatpush.msrb.mxu1 %v4200_v62 }
  0x65   :  { %524 = vmatpush.msrb.mxu2 %v4205_v63  ;;  %544 = vmatpush.msrb.mxu3 %v4207_v0  ;;  %v127_v0 = vld [vmem:[#allocation4 + $0x30] sm:$0xff] }
  0x66   :  { %234 = vmatmul.f32.gmra.mxu0 %v126_v13  ;;  %275 = vmatmul.f32.gmra.mxu1 %v126_v13 }
  0x67   :  { %316 = vmatmul.f32.gmra.mxu2 %v126_v13  ;;  %357 = vmatmul.f32.gmra.mxu3 %v126_v13  ;;  %v128_v13 = vld [vmem:[#allocation4 + $0x38] sm:$0xff] }
  0x68   :  { %485 = vmatpush.msrb.mxu0 %v4213_v26  ;;  %505 = vmatpush.msrb.mxu1 %v4215_v39 }
  0x69   :  { %525 = vmatpush.msrb.mxu2 %v4219_v52  ;;  %545 = vmatpush.msrb.mxu3 %v4221_v58 }
  0x6a   :  { %625 = vmatpush.msra.mxu0 %v4035_v1  ;;  %645 = vmatpush.msra.mxu1 %v4037_v2 }
  0x6b   :  { %665 = vmatpush.msra.mxu2 %v4041_v4  ;;  %685 = vmatpush.msra.mxu3 %v4039_v3 }
  0x6c   :  { %626 = vmatpush.msra.mxu0 %v4043_v5  ;;  %646 = vmatpush.msra.mxu1 %v4045_v6 }
  0x6d   :  { %666 = vmatpush.msra.mxu2 %v4051_v8  ;;  %686 = vmatpush.msra.mxu3 %v4049_v7 }
  0x6e   :  { %237 = vmatmul.f32.gmra.mxu0 %v127_v0  ;;  %278 = vmatmul.f32.gmra.mxu1 %v127_v0 }
  0x6f   :  { %319 = vmatmul.f32.gmra.mxu2 %v127_v0  ;;  %360 = vmatmul.f32.gmra.mxu3 %v127_v0  ;;  %v6005_v0 = vmov 0.0  }
  0x70   :  { %627 = vmatpush.msra.mxu0 %v4054_v9  ;;  %647 = vmatpush.msra.mxu1 %v4056_v10 }
  0x71   :  { %667 = vmatpush.msra.mxu2 %v4063_v12  ;;  %687 = vmatpush.msra.mxu3 %v4061_v11 }
  0x72   :  { %628 = vmatpush.msra.mxu0 %v4069_v14  ;;  %648 = vmatpush.msra.mxu1 %v4071_v15 }
  0x73   :  { %668 = vmatpush.msra.mxu2 %v4077_v17  ;;  %688 = vmatpush.msra.mxu3 %v4075_v16 }
  0x74   :  { %629 = vmatpush.msra.mxu0 %v4079_v18  ;;  %649 = vmatpush.msra.mxu1 %v4081_v19 }
  0x75   :  { %669 = vmatpush.msra.mxu2 %v4087_v21  ;;  %689 = vmatpush.msra.mxu3 %v4085_v20 }
  0x76   :  { %240 = vmatmul.f32.gmra.mxu0 %v128_v13  ;;  %281 = vmatmul.f32.gmra.mxu1 %v128_v13 }
  0x77   :  { %322 = vmatmul.f32.gmra.mxu2 %v128_v13  ;;  %363 = vmatmul.f32.gmra.mxu3 %v128_v13  ;;  %v6296_v13 = vld [vmem:[#allocation36_spill] sm:$0xff] }
  0x78   :  { %630 = vmatpush.msra.mxu0 %v4090_v22  ;;  %650 = vmatpush.msra.mxu1 %v4092_v23 }
  0x79   :  { %670 = vmatpush.msra.mxu2 %v4099_v25  ;;  %690 = vmatpush.msra.mxu3 %v4097_v24 }
  0x7a   :  { %631 = vmatpush.msra.mxu0 %v4105_v27  ;;  %651 = vmatpush.msra.mxu1 %v4107_v28 }
  0x7b   :  { %671 = vmatpush.msra.mxu2 %v4113_v30  ;;  %691 = vmatpush.msra.mxu3 %v4111_v29 }
  0x7c   :  { %632 = vmatpush.msra.mxu0 %v4115_v31  ;;  %652 = vmatpush.msra.mxu1 %v4117_v32 }
  0x7d   :  { %672 = vmatpush.msra.mxu2 %v4123_v34  ;;  %692 = vmatpush.msra.mxu3 %v4121_v33 }
  0x7e   :  { %486 = vmatmul.f32.vlgmr.msrb.gmra.mxu0 %v6005_v0  ;;  %506 = vmatmul.f32.vlgmr.msrb.gmra.mxu1 %v6005_v0 }
  0x7f   :  { %526 = vmatmul.f32.vlgmr.msrb.gmra.mxu2 %v6005_v0  ;;  %546 = vmatmul.f32.vlgmr.msrb.gmra.mxu3 %v6005_v0  ;;  %v6297_v0 = vld [vmem:[#allocation42_spill] sm:$0xff] }
  0x80   :  { %633 = vmatpush.msra.mxu0 %v4126_v35  ;;  %653 = vmatpush.msra.mxu1 %v4128_v36 }
  0x81   :  { %673 = vmatpush.msra.mxu2 %v4135_v38  ;;  %693 = vmatpush.msra.mxu3 %v4133_v37 }
  0x82   :  { %634 = vmatpush.msra.mxu0 %v4141_v40  ;;  %654 = vmatpush.msra.mxu1 %v4143_v41 }
  0x83   :  { %674 = vmatpush.msra.mxu2 %v4149_v43  ;;  %694 = vmatpush.msra.mxu3 %v4147_v42 }
  0x84   :  { %635 = vmatpush.msra.mxu0 %v4151_v44  ;;  %655 = vmatpush.msra.mxu1 %v4153_v45 }
  0x85   :  { %675 = vmatpush.msra.mxu2 %v4159_v47  ;;  %695 = vmatpush.msra.mxu3 %v4157_v46 }
  0x86   :  { %636 = vmatpush.msra.mxu0 %v4162_v48  ;;  %656 = vmatpush.msra.mxu1 %v4164_v49 }
  0x87   :  { %676 = vmatpush.msra.mxu2 %v4171_v51  ;;  %696 = vmatpush.msra.mxu3 %v4169_v50 }
  0x88   :  { %637 = vmatpush.msra.mxu0 %v4177_v53  ;;  %657 = vmatpush.msra.mxu1 %v4179_v54 }
  0x89   :  { %677 = vmatpush.msra.mxu2 %v4185_v56  ;;  %697 = vmatpush.msra.mxu3 %v4183_v55 }
  0x8a   :  { %638 = vmatpush.msra.mxu0 %v4187_v57  ;;  %658 = vmatpush.msra.mxu1 %v6296_v13 }
  0x8b   :  { %678 = vmatpush.msra.mxu2 %v4195_v60  ;;  %698 = vmatpush.msra.mxu3 %v4193_v59 }
  0x8c   :  { %639 = vmatpush.msra.mxu0 %v4198_v61  ;;  %659 = vmatpush.msra.mxu1 %v4200_v62 }
  0x8d   :  { %679 = vmatpush.msra.mxu2 %v4205_v63  ;;  %699 = vmatpush.msra.mxu3 %v6297_v0 }
  0x8e   :  { %640 = vmatpush.msra.mxu0 %v4213_v26  ;;  %660 = vmatpush.msra.mxu1 %v4215_v39 }
  0x8f   :  { %680 = vmatpush.msra.mxu2 %v4219_v52  ;;  %700 = vmatpush.msra.mxu3 %v4221_v58 }
  0x90   :  { %781 = vmatpush.msrb.mxu0 %v4035_v1  ;;  %801 = vmatpush.msrb.mxu1 %v4037_v2 }
  0x91   :  { %821 = vmatpush.msrb.mxu2 %v4041_v4  ;;  %841 = vmatpush.msrb.mxu3 %v4039_v3 }
  0x92   :  { %782 = vmatpush.msrb.mxu0 %v4043_v5  ;;  %802 = vmatpush.msrb.mxu1 %v4045_v6 }
  0x93   :  { %822 = vmatpush.msrb.mxu2 %v4051_v8  ;;  %842 = vmatpush.msrb.mxu3 %v4049_v7 }
  0x94   :  { %783 = vmatpush.msrb.mxu0 %v4054_v9  ;;  %803 = vmatpush.msrb.mxu1 %v4056_v10 }
  0x95   :  { %823 = vmatpush.msrb.mxu2 %v4063_v12  ;;  %843 = vmatpush.msrb.mxu3 %v4061_v11 }
  0x96   :  { %784 = vmatpush.msrb.mxu0 %v4069_v14  ;;  %804 = vmatpush.msrb.mxu1 %v4071_v15 }
  0x97   :  { %824 = vmatpush.msrb.mxu2 %v4077_v17  ;;  %844 = vmatpush.msrb.mxu3 %v4075_v16 }
  0x98   :  { %785 = vmatpush.msrb.mxu0 %v4079_v18  ;;  %805 = vmatpush.msrb.mxu1 %v4081_v19 }
  0x99   :  { %825 = vmatpush.msrb.mxu2 %v4087_v21  ;;  %845 = vmatpush.msrb.mxu3 %v4085_v20 }
  0x9a   :  { %786 = vmatpush.msrb.mxu0 %v4090_v22  ;;  %806 = vmatpush.msrb.mxu1 %v4092_v23 }
  0x9b   :  { %826 = vmatpush.msrb.mxu2 %v4099_v25  ;;  %846 = vmatpush.msrb.mxu3 %v4097_v24 }
  0x9c   :  { %787 = vmatpush.msrb.mxu0 %v4105_v27  ;;  %807 = vmatpush.msrb.mxu1 %v4107_v28 }
  0x9d   :  { %827 = vmatpush.msrb.mxu2 %v4113_v30  ;;  %847 = vmatpush.msrb.mxu3 %v4111_v29 }
  0x9e   :  { %788 = vmatpush.msrb.mxu0 %v4115_v31  ;;  %808 = vmatpush.msrb.mxu1 %v4117_v32 }
  0x9f   :  { %828 = vmatpush.msrb.mxu2 %v4123_v34  ;;  %848 = vmatpush.msrb.mxu3 %v4121_v33 }
  0xa0   :  { %789 = vmatpush.msrb.mxu0 %v4126_v35  ;;  %809 = vmatpush.msrb.mxu1 %v4128_v36 }
  0xa1   :  { %829 = vmatpush.msrb.mxu2 %v4135_v38  ;;  %849 = vmatpush.msrb.mxu3 %v4133_v37 }
  0xa2   :  { %790 = vmatpush.msrb.mxu0 %v4141_v40  ;;  %810 = vmatpush.msrb.mxu1 %v4143_v41 }
  0xa3   :  { %830 = vmatpush.msrb.mxu2 %v4149_v43  ;;  %850 = vmatpush.msrb.mxu3 %v4147_v42 }
  0xa4   :  { %791 = vmatpush.msrb.mxu0 %v4151_v44  ;;  %811 = vmatpush.msrb.mxu1 %v4153_v45 }
  0xa5   :  { %831 = vmatpush.msrb.mxu2 %v4159_v47  ;;  %851 = vmatpush.msrb.mxu3 %v4157_v46 }
  0xa6   :  { %792 = vmatpush.msrb.mxu0 %v4162_v48  ;;  %812 = vmatpush.msrb.mxu1 %v4164_v49 }
  0xa7   :  { %832 = vmatpush.msrb.mxu2 %v4171_v51  ;;  %852 = vmatpush.msrb.mxu3 %v4169_v50 }
  0xa8   :  { %793 = vmatpush.msrb.mxu0 %v4177_v53  ;;  %813 = vmatpush.msrb.mxu1 %v4179_v54 }
  0xa9   :  { %833 = vmatpush.msrb.mxu2 %v4185_v56  ;;  %853 = vmatpush.msrb.mxu3 %v4183_v55 }
  0xaa   :  { %794 = vmatpush.msrb.mxu0 %v4187_v57  ;;  %814 = vmatpush.msrb.mxu1 %v6296_v13 }
  0xab   :  { %834 = vmatpush.msrb.mxu2 %v4195_v60  ;;  %854 = vmatpush.msrb.mxu3 %v4193_v59 }
  0xac   :  { %795 = vmatpush.msrb.mxu0 %v4198_v61  ;;  %815 = vmatpush.msrb.mxu1 %v4200_v62 }
  0xad   :  { %835 = vmatpush.msrb.mxu2 %v4205_v63  ;;  %855 = vmatpush.msrb.mxu3 %v6297_v0 }
  0xae   :  { %796 = vmatpush.msrb.mxu0 %v4213_v26  ;;  %816 = vmatpush.msrb.mxu1 %v4215_v39 }
  0xaf   :  { %836 = vmatpush.msrb.mxu2 %v4219_v52  ;;  %856 = vmatpush.msrb.mxu3 %v4221_v58 }
  0xbb   :  { %v220_v13 = vpop.f32.mrf.mxu0  ;;  %v261_v60 = vpop.f32.mrf.mxu1 }
  0xc2   :  { %v302_v57 = vpop.f32.mrf.mxu2  ;;  %v343_v59 = vpop.f32.mrf.mxu3 }
  0xc3   :  { %v4359_v55 = vpop.f32.mrf.mxu0  ;;  %v4361_v61 = vpop.f32.mrf.mxu1 }
  0xc4   :  { %6298 = vst [vmem:[#allocation47_spill] sm:$0xff] %v4359_v55 }
  0xc5   :  { %6299 = vst [vmem:[#allocation48_spill] sm:$0xff] %v4361_v61 }
  0xca   :  { %v4363_v62 = vpop.f32.mrf.mxu2  ;;  %v4365_v63 = vpop.f32.mrf.mxu3 }
  0xcb   :  { %6300 = vst [vmem:[#allocation49_spill] sm:$0xff] %v4363_v62  ;;  %v4367_v0 = vpop.f32.mrf.mxu0  ;;  %v4369_v26 = vpop.f32.mrf.mxu1 }
  0xcc   :  { %6301 = vst [vmem:[#allocation50_spill] sm:$0xff] %v4365_v63 }
  0xcd   :  { %6302 = vst [vmem:[#allocation51_spill] sm:$0xff] %v4367_v0 }
  0xce   :  { %6303 = vst [vmem:[#allocation52_spill] sm:$0xff] %v4369_v26 }
  0xd2   :  { %v4371_v39 = vpop.f32.mrf.mxu2  ;;  %v4373_v52 = vpop.f32.mrf.mxu3 }
  0xd3   :  { %6304 = vst [vmem:[#allocation53_spill] sm:$0xff] %v4371_v39  ;;  %v4375_v58 = vpop.f32.mrf.mxu0  ;;  %v4377_v56 = vpop.f32.mrf.mxu1 }
  0xd4   :  { %6305 = vst [vmem:[#allocation54_spill] sm:$0xff] %v4373_v52 }
  0xd5   :  { %6306 = vst [vmem:[#allocation55_spill] sm:$0xff] %v4375_v58 }
  0xd6   :  { %6307 = vst [vmem:[#allocation56_spill] sm:$0xff] %v4377_v56 }
  0xda   :  { %v4379_v54 = vpop.f32.mrf.mxu2  ;;  %v4381_v55 = vpop.f32.mrf.mxu3 }
  0xdb   :  { %6308 = vst [vmem:[#allocation57_spill] sm:$0xff] %v4379_v54  ;;  %v4383_v61 = vpop.f32.mrf.mxu0  ;;  %v4385_v62 = vpop.f32.mrf.mxu1 }
  0xdc   :  { %6309 = vst [vmem:[#allocation58_spill] sm:$0xff] %v4381_v55 }
  0xdd   :  { %6310 = vst [vmem:[#allocation59_spill] sm:$0xff] %v4383_v61  ;;  %v193_v61 = vld [vmem:[#allocation12] sm:$0xf] }
  0xde   :  { %6311 = vst [vmem:[#allocation60_spill] sm:$0xff] %v4385_v62  ;;  %v4419_v51 = vperm.slane %v193_v61, 3 }
  0xe0   :  { %6327 = vst [vmem:[#allocation76_spill] sm:$0xff] %v4419_v51  ;;  %v344_v49 = vadd.f32 %v343_v59, %v4419_v51 }
  0xe2   :  { %v4387_v63 = vpop.f32.mrf.mxu3  ;;  %v4393_v39 = vpop.f32.mrf.mxu2 }
  0xe3   :  { %6312 = vst [vmem:[#allocation61_spill] sm:$0xff] %v4387_v63  ;;  %v4389_v0 = vpop.f32.mrf.mxu0  ;;  %v4391_v26 = vpop.f32.mrf.mxu1 }
  0xe4   :  { %6313 = vst [vmem:[#allocation62_spill] sm:$0xff] %v4389_v0  ;;  %v4409_v0 = vperm.slane %v193_v61, 0 }
  0xe5   :  { %6314 = vst [vmem:[#allocation63_spill] sm:$0xff] %v4391_v26  ;;  %v4411_v26 = vperm.slane %v193_v61, 1 }
  0xe6   :  { %6315 = vst [vmem:[#allocation64_spill] sm:$0xff] %v4393_v39 }
  0xe7   :  { %6323 = vst [vmem:[#allocation72_spill] sm:$0xff] %v4409_v0 }
  0xe8   :  { %6324 = vst [vmem:[#allocation73_spill] sm:$0xff] %v4411_v26 }
  0xea   :  { %v4395_v52 = vpop.f32.mrf.mxu3  ;;  %v4401_v54 = vpop.f32.mrf.mxu2 }
  0xeb   :  { %6316 = vst [vmem:[#allocation65_spill] sm:$0xff] %v4395_v52  ;;  %v4397_v58 = vpop.f32.mrf.mxu0  ;;  %v4399_v56 = vpop.f32.mrf.mxu1  ;;  %v221_v52 = vadd.f32 %v220_v13, %v4409_v0 }
  0xec   :  { %6317 = vst [vmem:[#allocation66_spill] sm:$0xff] %v4397_v58  ;;  %v262_v58 = vadd.f32 %v261_v60, %v4411_v26 }
  0xed   :  { %6318 = vst [vmem:[#allocation67_spill] sm:$0xff] %v4399_v56 }
  0xee   :  { %6319 = vst [vmem:[#allocation68_spill] sm:$0xff] %v4401_v54 }
  0xf2   :  { %v4403_v55 = vpop.f32.mrf.mxu3  ;;  %v4413_v39 = vpop.f32.mrf.mxu2 }
  0xf3   :  { %6320 = vst [vmem:[#allocation69_spill] sm:$0xff] %v4403_v55  ;;  %v4405_v62 = vpop.f32.mrf.mxu0  ;;  %v4407_v63 = vpop.f32.mrf.mxu1 }
  0xf4   :  { %6321 = vst [vmem:[#allocation70_spill] sm:$0xff] %v4405_v62 }
  0xf5   :  { %6322 = vst [vmem:[#allocation71_spill] sm:$0xff] %v4407_v63 }
  0xf6   :  { %6325 = vst [vmem:[#allocation74_spill] sm:$0xff] %v4413_v39 }
  0xfa   :  { %v4417_v56 = vpop.f32.mrf.mxu3  ;;  %v4422_v48 = vpop.f32.mrf.mxu2 }
  0xfb   :  { %6326 = vst [vmem:[#allocation75_spill] sm:$0xff] %v4417_v56  ;;  %v487_v54 = vpop.f32.mrf.mxu0  ;;  %v507_v53 = vpop.f32.mrf.mxu1 }
  0xfc   :  { %v550_v55 = vadd.f32 %v487_v54, %v221_v52  ;;  %v551_v50 = vadd.f32 %v507_v53, %v262_v58  ;;  %6328 = vst [vmem:[#allocation77_spill] sm:$0xff] %v4422_v48  ;;  %v4424_v54 = vperm.slane %v193_v61, 2 }
  0xfe   :  { %v3338_v62 = vmul.f32 -1.442695, %v550_v55  ;;  %v3339_v63 = vmul.f32 -1.442695, %v551_v50  ;;  %6329 = vst [vmem:[#allocation78_spill] sm:$0xff] %v4424_v54  ;;  %v303_v55 = vadd.f32 %v302_v57, %v4424_v54 }
 0x100   :  { %3401 = vpow2.f32 %v3338_v62 }
 0x101   :  { %3403 = vpow2.f32 %v3339_v63 }
 0x102   :  { %v547_v39 = vpop.f32.mrf.mxu3  ;;  %v527_v53 = vpop.f32.mrf.mxu2 }
 0x103   :  { %v553_v13 = vadd.f32 %v547_v39, %v344_v49  ;;  %v552_v62 = vadd.f32 %v527_v53, %v303_v55 }
 0x105   :  { %v3340_v0 = vmul.f32 -1.442695, %v553_v13 }
 0x106   :  { %v3402_v60 = vpop.eup %3401 }
 0x107   :  { %v3404_v26 = vpop.eup %3403  ;;  %v557_v56 = vadd.f32 1.0, %v3402_v60  ;;  %3405 = vpow2.f32 %v3340_v0 }
 0x108   :  { %v576_v46 = vadd.f32 1.0, %v3404_v26 }
 0x109   :  { %3407 = vrcp.f32 %v557_v56  ;;  %v569_v60 = vand.u32 2147483648, %v557_v56  ;;  %v567_v0 = vand.u32 2147483647, %v557_v56  ;;  %vm563_vm2 = vweird.f32 %v557_v56 }
 0x10a   :  { %3409 = vrcp.f32 %v576_v46  ;;  %v588_v26 = vand.u32 2147483648, %v576_v46  ;;  %v586_v51 = vand.u32 2147483647, %v576_v46  ;;  %vm582_vm3 = vweird.f32 %v576_v46 }
 0x10b   :  { %v570_v53 = vor.u32 1.1754944e-38, %v569_v60  ;;  %vm568_vm5 = vcmp.eq.f32.partialorder %v567_v0, 8.507059e+37 }
 0x10c   :  { %v589_v54 = vor.u32 1.1754944e-38, %v588_v26  ;;  %vm587_vm7 = vcmp.eq.f32.partialorder %v586_v51, 8.507059e+37 }
 0x10d   :  { %v3406_v50 = vpop.eup %3405 }
 0x10e   :  { %v596_v58 = vadd.f32 1.0, %v3406_v50 }
 0x10f   :  { %v3408_v59 = vpop.eup %3407 }
 0x110   :  { %v3410_v63 = vpop.eup %3409  ;;  %v559_v52 = vmul.f32 %v3408_v59, %v557_v56  ;;  %3411 = vrcp.f32 %v596_v58  ;;  %vm564_vm0 = vweird.f32 %v3408_v59  ;;  %vm602_vm9 = vweird.f32 %v596_v58 }
 0x111   :  { %v578_v49 = vmul.f32 %v3410_v63, %v576_v46  ;;  %3413 = vtanh.f32 %v552_v62  ;;  %vm583_vm1 = vweird.f32 %v3410_v63  ;;  %vm565_vm4 = vmor %vm563_vm2, %vm564_vm0  ;;  %v606_v56 = vand.u32 2147483647, %v596_v58 }
 0x112   :  { %v560_v39 = vsub.f32 1.0, %v559_v52  ;;  %vm584_vm6 = vmor %vm582_vm3, %vm583_vm1 }
 0x113   :  { %v579_v13 = vsub.f32 1.0, %v578_v49  ;;  %vm607_vm11 = vcmp.eq.f32.partialorder %v606_v56, 8.507059e+37 }
 0x114   :  { %v561_v61 = vmul.f32 %v3408_v59, %v560_v39 }
 0x115   :  { %v580_v48 = vmul.f32 %v3410_v63, %v579_v13 }
 0x116   :  { %v3412_v47 = vpop.eup %3411  ;;  %v562_v57 = vadd.f32 %v3408_v59, %v561_v61 }
 0x117   :  { %v581_v50 = vadd.f32 %v3410_v63, %v580_v48  ;;  %v598_v55 = vmul.f32 %v3412_v47, %v596_v58  ;;  %v3414_v62 = vpop.eup %3413  ;;  %vm603_vm8 = vweird.f32 %v3412_v47  ;;  %v608_v48 = vand.u32 2147483648, %v596_v58 }
 0x118   :  { %v566_v52 = vsel %vm565_vm4, %v3408_v59, %v562_v57  ;;  %vm604_vm10 = vmor %vm602_vm9, %vm603_vm8 }
 0x119   :  { %v571_v49 = vsel %vm568_vm5, %v570_v53, %v566_v52  ;;  %v585_v39 = vsel %vm584_vm6, %v3410_v63, %v581_v50  ;;  %v599_v45 = vsub.f32 1.0, %v598_v55  ;;  %v609_v60 = vor.u32 1.1754944e-38, %v608_v48  ;;  %v6363_v52 = vld [vmem:[#allocation78_spill] sm:$0xff] }
 0x11a   :  { %v590_v13 = vsel %vm587_vm7, %v589_v54, %v585_v39  ;;  %v613_v44 = vmul.f32 %v3414_v62, %v571_v49  ;;  %v6364_v62 = vld [vmem:[#allocation49_spill] sm:$0xff] }
 0x11b   :  { %v612_v42 = vmul.f32 0.0, %v590_v13  ;;  %v600_v43 = vmul.f32 %v3412_v47, %v599_v45  ;;  %v306_v49 = vadd.f32 %v6364_v62, %v6363_v52 }
 0x11d   :  { %v4427_v61 = vadd.f32 %v613_v44, %v612_v42  ;;  %v601_v46 = vadd.f32 %v3412_v47, %v600_v43  ;;  %v6361_v42 = vld [vmem:[#allocation76_spill] sm:$0xff]  ;;  %v6362_v43 = vld [vmem:[#allocation50_spill] sm:$0xff] }
 0x11e   :  { %v347_v44 = vadd.f32 %v6362_v43, %v6361_v42 }
 0x11f   :  { %3415 = vtanh.f32 %v4427_v61  ;;  %v605_v59 = vsel %vm604_vm10, %v3412_v47, %v601_v46 }
 0x120   :  { %v610_v51 = vsel %vm607_vm11, %v609_v60, %v605_v59 }
 0x125   :  { %v3416_v63 = vpop.eup %3415 }
 0x126   :  { %v4430_v26 = vmul.f32 %v3416_v63, %v610_v51 }
 0x128   :  { %6330 = vst [vmem:[#allocation79_spill] sm:$0xff] %v4430_v26  ;;  %641 = vmatmul.f32.vlgmr.msra.gmra.mxu0 %v4430_v26  ;;  %661 = vmatmul.f32.vlgmr.msra.gmra.mxu1 %v4430_v26 }
 0x129   :  { %681 = vmatmul.f32.vlgmr.msra.gmra.mxu2 %v4430_v26  ;;  %701 = vmatmul.f32.vlgmr.msra.gmra.mxu3 %v4430_v26  ;;  %v4614_v26 = vld [vmem:[#allocation10 + $0xe0] sm:$0xff] }
 0x12a   :  { %937 = vmatpush.msra.mxu0 %v4035_v1  ;;  %957 = vmatpush.msra.mxu1 %v4037_v2  ;;  %v6331_v1 = vld [vmem:[#allocation22_spill] sm:$0xff]  ;;  %v6332_v2 = vld [vmem:[#allocation21_spill] sm:$0xff] }
 0x12b   :  { %977 = vmatpush.msra.mxu2 %v4041_v4  ;;  %997 = vmatpush.msra.mxu3 %v4039_v3  ;;  %v6333_v3 = vld [vmem:[#allocation23_spill] sm:$0xff]  ;;  %v6334_v4 = vld [vmem:[#allocation24_spill] sm:$0xff] }
 0x12c   :  { %938 = vmatpush.msra.mxu0 %v4043_v5  ;;  %958 = vmatpush.msra.mxu1 %v4045_v6  ;;  %v6335_v5 = vld [vmem:[#allocation26_spill] sm:$0xff]  ;;  %v6336_v6 = vld [vmem:[#allocation25_spill] sm:$0xff] }
 0x12d   :  { %978 = vmatpush.msra.mxu2 %v4051_v8  ;;  %998 = vmatpush.msra.mxu3 %v4049_v7  ;;  %v6337_v7 = vld [vmem:[#allocation27_spill] sm:$0xff]  ;;  %v6338_v8 = vld [vmem:[#allocation28_spill] sm:$0xff] }
 0x12e   :  { %939 = vmatpush.msra.mxu0 %v4054_v9  ;;  %959 = vmatpush.msra.mxu1 %v4056_v10  ;;  %v6339_v9 = vld [vmem:[#allocation30_spill] sm:$0xff]  ;;  %v6340_v10 = vld [vmem:[#allocation29_spill] sm:$0xff] }
 0x12f   :  { %979 = vmatpush.msra.mxu2 %v4063_v12  ;;  %999 = vmatpush.msra.mxu3 %v4061_v11  ;;  %v6341_v11 = vld [vmem:[#allocation31_spill] sm:$0xff]  ;;  %v6342_v12 = vld [vmem:[#allocation32_spill] sm:$0xff] }
 0x130   :  { %940 = vmatpush.msra.mxu0 %v4069_v14  ;;  %960 = vmatpush.msra.mxu1 %v4071_v15  ;;  %v6343_v14 = vld [vmem:[#allocation34_spill] sm:$0xff]  ;;  %v6344_v15 = vld [vmem:[#allocation33_spill] sm:$0xff] }
 0x131   :  { %980 = vmatpush.msra.mxu2 %v4077_v17  ;;  %1000 = vmatpush.msra.mxu3 %v4075_v16  ;;  %v6345_v16 = vld [vmem:[#allocation35_spill] sm:$0xff]  ;;  %v6346_v17 = vld [vmem:[#allocation36_spill] sm:$0xff] }
 0x132   :  { %941 = vmatpush.msra.mxu0 %v4079_v18  ;;  %961 = vmatpush.msra.mxu1 %v4081_v19  ;;  %v6347_v18 = vld [vmem:[#allocation38_spill] sm:$0xff]  ;;  %v6348_v19 = vld [vmem:[#allocation37_spill] sm:$0xff] }
 0x133   :  { %981 = vmatpush.msra.mxu2 %v4087_v21  ;;  %1001 = vmatpush.msra.mxu3 %v4085_v20  ;;  %v6349_v20 = vld [vmem:[#allocation39_spill] sm:$0xff]  ;;  %v6350_v21 = vld [vmem:[#allocation40_spill] sm:$0xff] }
 0x134   :  { %942 = vmatpush.msra.mxu0 %v4090_v22  ;;  %962 = vmatpush.msra.mxu1 %v4092_v23  ;;  %v6351_v22 = vld [vmem:[#allocation41_spill] sm:$0xff]  ;;  %v6352_v23 = vld [vmem:[#allocation42_spill] sm:$0xff] }
 0x135   :  { %982 = vmatpush.msra.mxu2 %v4099_v25  ;;  %1002 = vmatpush.msra.mxu3 %v4097_v24  ;;  %v6353_v24 = vld [vmem:[#allocation43_spill] sm:$0xff]  ;;  %v6354_v25 = vld [vmem:[#allocation44_spill] sm:$0xff] }
 0x136   :  { %943 = vmatpush.msra.mxu0 %v4105_v27  ;;  %963 = vmatpush.msra.mxu1 %v4107_v28  ;;  %v6355_v27 = vld [vmem:[#allocation45_spill] sm:$0xff]  ;;  %v6356_v28 = vld [vmem:[#allocation46_spill] sm:$0xff] }
 0x137   :  { %983 = vmatpush.msra.mxu2 %v4113_v30  ;;  %1003 = vmatpush.msra.mxu3 %v4111_v29  ;;  %v6357_v29 = vld [vmem:[#allocation72_spill] sm:$0xff]  ;;  %v6358_v30 = vld [vmem:[#allocation47_spill] sm:$0xff] }
 0x138   :  { %944 = vmatpush.msra.mxu0 %v4115_v31  ;;  %964 = vmatpush.msra.mxu1 %v4117_v32  ;;  %v224_v31 = vadd.f32 %v6358_v30, %v6357_v29  ;;  %v6359_v32 = vld [vmem:[#allocation73_spill] sm:$0xff] }
 0x139   :  { %984 = vmatpush.msra.mxu2 %v4123_v34  ;;  %1004 = vmatpush.msra.mxu3 %v4121_v33  ;;  %v6360_v33 = vld [vmem:[#allocation48_spill] sm:$0xff] }
 0x13a   :  { %945 = vmatpush.msra.mxu0 %v4126_v35  ;;  %965 = vmatpush.msra.mxu1 %v4128_v36  ;;  %v265_v34 = vadd.f32 %v6360_v33, %v6359_v32 }
 0x13b   :  { %985 = vmatpush.msra.mxu2 %v4135_v38  ;;  %1005 = vmatpush.msra.mxu3 %v4133_v37 }
 0x13c   :  { %946 = vmatpush.msra.mxu0 %v4141_v40  ;;  %966 = vmatpush.msra.mxu1 %v4143_v41 }
 0x13d   :  { %986 = vmatpush.msra.mxu2 %v6331_v1  ;;  %1006 = vmatpush.msra.mxu3 %v6332_v2 }
 0x13e   :  { %947 = vmatpush.msra.mxu0 %v6333_v3  ;;  %967 = vmatpush.msra.mxu1 %v6334_v4 }
 0x13f   :  { %987 = vmatpush.msra.mxu2 %v6335_v5  ;;  %1007 = vmatpush.msra.mxu3 %v6336_v6 }
 0x140   :  { %948 = vmatpush.msra.mxu0 %v6337_v7  ;;  %968 = vmatpush.msra.mxu1 %v6338_v8 }
 0x141   :  { %988 = vmatpush.msra.mxu2 %v6339_v9  ;;  %1008 = vmatpush.msra.mxu3 %v6340_v10 }
 0x142   :  { %949 = vmatpush.msra.mxu0 %v6341_v11  ;;  %969 = vmatpush.msra.mxu1 %v6342_v12 }
 0x143   :  { %989 = vmatpush.msra.mxu2 %v6343_v14  ;;  %1009 = vmatpush.msra.mxu3 %v6344_v15 }
 0x144   :  { %950 = vmatpush.msra.mxu0 %v6345_v16  ;;  %970 = vmatpush.msra.mxu1 %v6346_v17 }
 0x145   :  { %990 = vmatpush.msra.mxu2 %v6347_v18  ;;  %1010 = vmatpush.msra.mxu3 %v6348_v19 }
 0x146   :  { %951 = vmatpush.msra.mxu0 %v6349_v20  ;;  %971 = vmatpush.msra.mxu1 %v6350_v21 }
 0x147   :  { %991 = vmatpush.msra.mxu2 %v6351_v22  ;;  %1011 = vmatpush.msra.mxu3 %v6352_v23 }
 0x148   :  { %952 = vmatpush.msra.mxu0 %v6353_v24  ;;  %972 = vmatpush.msra.mxu1 %v6354_v25 }
 0x149   :  { %992 = vmatpush.msra.mxu2 %v6355_v27  ;;  %1012 = vmatpush.msra.mxu3 %v6356_v28 }
 0x1a5   :  { %v642_v35 = vpop.f32.mrf.mxu0  ;;  %v662_v36 = vpop.f32.mrf.mxu1 }
 0x1a6   :  { %v705_v37 = vadd.f32 %v642_v35, %v224_v31  ;;  %v706_v38 = vadd.f32 %v662_v36, %v265_v34 }
 0x1a8   :  { %v3341_v40 = vmul.f32 -1.442695, %v705_v37  ;;  %v3342_v41 = vmul.f32 -1.442695, %v706_v38 }
 0x1aa   :  { %3417 = vpow2.f32 %v3341_v40 }
 0x1ab   :  { %3419 = vpow2.f32 %v3342_v41 }
 0x1ac   :  { %v702_v45 = vpop.f32.mrf.mxu3  ;;  %v682_v50 = vpop.f32.mrf.mxu2 }
 0x1ad   :  { %v708_v47 = vadd.f32 %v702_v45, %v347_v44  ;;  %v707_v46 = vadd.f32 %v682_v50, %v306_v49 }
 0x1af   :  { %v3343_v54 = vmul.f32 -1.442695, %v708_v47 }
 0x1b0   :  { %v3418_v58 = vpop.eup %3417 }
 0x1b1   :  { %v3420_v0 = vpop.eup %3419  ;;  %v712_v57 = vadd.f32 1.0, %v3418_v58  ;;  %3421 = vpow2.f32 %v3343_v54 }
 0x1b2   :  { %v731_v53 = vadd.f32 1.0, %v3420_v0 }
 0x1b3   :  { %3423 = vrcp.f32 %v712_v57  ;;  %v724_v51 = vand.u32 2147483648, %v712_v57  ;;  %v722_v33 = vand.u32 2147483647, %v712_v57  ;;  %vm718_vm14 = vweird.f32 %v712_v57 }
 0x1b4   :  { %3425 = vrcp.f32 %v731_v53  ;;  %v743_v30 = vand.u32 2147483648, %v731_v53  ;;  %v741_v35 = vand.u32 2147483647, %v731_v53  ;;  %vm737_vm15 = vweird.f32 %v731_v53 }
 0x1b5   :  { %v725_v38 = vor.u32 1.1754944e-38, %v724_v51  ;;  %vm723_vm2 = vcmp.eq.f32.partialorder %v722_v33, 8.507059e+37  ;;  %v4527_v51 = vld [vmem:[#allocation10 + $0x1f8] sm:$0xff]  ;;  %v4536_v33 = vld [vmem:[#allocation10 + $0x1d0] sm:$0xff] }
 0x1b6   :  { %v744_v43 = vor.u32 1.1754944e-38, %v743_v30  ;;  %vm742_vm3 = vcmp.eq.f32.partialorder %v741_v35, 8.507059e+37  ;;  %v4530_v30 = vld [vmem:[#allocation10 + $0x1c0] sm:$0xff] }
 0x1b7   :  { %v3422_v55 = vpop.eup %3421  ;;  %v4542_v35 = vld [vmem:[#allocation10 + $0x1a0] sm:$0xff] }
 0x1b8   :  { %v751_v39 = vadd.f32 1.0, %v3422_v55 }
 0x1b9   :  { %v3424_v13 = vpop.eup %3423 }
 0x1ba   :  { %v3426_v48 = vpop.eup %3425  ;;  %v714_v56 = vmul.f32 %v3424_v13, %v712_v57  ;;  %3427 = vrcp.f32 %v751_v39  ;;  %vm719_vm12 = vweird.f32 %v3424_v13  ;;  %v763_v49 = vand.u32 2147483648, %v751_v39 }
 0x1bb   :  { %v733_v59 = vmul.f32 %v3426_v48, %v731_v53  ;;  %3429 = vtanh.f32 %v707_v46  ;;  %vm738_vm13 = vweird.f32 %v3426_v48  ;;  %vm720_vm0 = vmor %vm718_vm14, %vm719_vm12  ;;  %vm757_vm5 = vweird.f32 %v751_v39 }
 0x1bc   :  { %v715_v60 = vsub.f32 1.0, %v714_v56  ;;  %vm739_vm1 = vmor %vm737_vm15, %vm738_vm13  ;;  %v764_v56 = vor.u32 1.1754944e-38, %v763_v49  ;;  %v4593_v49 = vld [vmem:[#allocation10 + $0x128] sm:$0xff] }
 0x1bd   :  { %v734_v63 = vsub.f32 1.0, %v733_v59 }
 0x1be   :  { %v716_v31 = vmul.f32 %v3424_v13, %v715_v60 }
 0x1bf   :  { %v735_v34 = vmul.f32 %v3426_v48, %v734_v63  ;;  %v4524_v63 = vld [vmem:[#allocation10 + $0x1f0] sm:$0xff] }
 0x1c0   :  { %v3428_v36 = vpop.eup %3427  ;;  %v717_v37 = vadd.f32 %v3424_v13, %v716_v31  ;;  %v4533_v31 = vld [vmem:[#allocation10 + $0x1c8] sm:$0xff] }
 0x1c1   :  { %v736_v40 = vadd.f32 %v3426_v48, %v735_v34  ;;  %v753_v41 = vmul.f32 %v3428_v36, %v751_v39  ;;  %v3430_v45 = vpop.eup %3429  ;;  %vm758_vm4 = vweird.f32 %v3428_v36  ;;  %v4539_v34 = vld [vmem:[#allocation10 + $0x1d8] sm:$0xff] }
 0x1c2   :  { %v721_v44 = vsel %vm720_vm0, %v3424_v13, %v717_v37  ;;  %v761_v13 = vand.u32 2147483647, %v751_v39  ;;  %vm759_vm6 = vmor %vm757_vm5, %vm758_vm4  ;;  %v4521_v39 = vld [vmem:[#allocation10 + $0x1e8] sm:$0xff]  ;;  %v4548_v37 = vld [vmem:[#allocation10 + $0x1b0] sm:$0xff] }
 0x1c3   :  { %v726_v47 = vsel %vm723_vm2, %v725_v38, %v721_v44  ;;  %v740_v54 = vsel %vm739_vm1, %v3426_v48, %v736_v40  ;;  %v754_v58 = vsub.f32 1.0, %v753_v41  ;;  %v4551_v38 = vld [vmem:[#allocation10 + $0x1b8] sm:$0xff]  ;;  %v4554_v40 = vld [vmem:[#allocation10 + $0x180] sm:$0xff]  ;;  %v4557_v41 = vld [vmem:[#allocation10 + $0x188] sm:$0xff] }
 0x1c4   :  { %v745_v0 = vsel %vm742_vm3, %v744_v43, %v740_v54  ;;  %v768_v50 = vmul.f32 %v3430_v45, %v726_v47  ;;  %vm762_vm7 = vcmp.eq.f32.partialorder %v761_v13, 8.507059e+37  ;;  %v4560_v43 = vld [vmem:[#allocation10 + $0x190] sm:$0xff]  ;;  %v4563_v44 = vld [vmem:[#allocation10 + $0x198] sm:$0xff]  ;;  %v4566_v45 = vld [vmem:[#allocation10 + $0x160] sm:$0xff] }
 0x1c5   :  { %v767_v55 = vmul.f32 %v745_v0, %v4427_v61  ;;  %v755_v62 = vmul.f32 %v3428_v36, %v754_v58  ;;  %v4518_v61 = vld [vmem:[#allocation10 + $0x1e0] sm:$0xff]  ;;  %v4569_v47 = vld [vmem:[#allocation10 + $0x168] sm:$0xff]  ;;  %v4572_v54 = vld [vmem:[#allocation10 + $0x170] sm:$0xff] }
 0x1c6   :  { %v4575_v58 = vld [vmem:[#allocation10 + $0x178] sm:$0xff]  ;;  %v4578_v0 = vld [vmem:[#allocation10 + $0x140] sm:$0xff]  ;;  %v4596_v13 = vld [vmem:[#allocation10 + $0x130] sm:$0xff] }
 0x1c7   :  { %v4509_v57 = vadd.f32 %v768_v50, %v767_v55  ;;  %v756_v53 = vadd.f32 %v3428_v36, %v755_v62  ;;  %v4581_v50 = vld [vmem:[#allocation10 + $0x148] sm:$0xff]  ;;  %v4584_v55 = vld [vmem:[#allocation10 + $0x150] sm:$0xff]  ;;  %v4587_v62 = vld [vmem:[#allocation10 + $0x158] sm:$0xff] }
 0x1c9   :  { %3431 = vtanh.f32 %v4509_v57  ;;  %v760_v46 = vsel %vm759_vm6, %v3428_v36, %v756_v53  ;;  %v4545_v36 = vld [vmem:[#allocation10 + $0x1a8] sm:$0xff]  ;;  %v4590_v53 = vld [vmem:[#allocation10 + $0x120] sm:$0xff] }
 0x1ca   :  { %v765_v59 = vsel %vm762_vm7, %v764_v56, %v760_v46  ;;  %v4599_v46 = vld [vmem:[#allocation10 + $0x138] sm:$0xff]  ;;  %v4602_v56 = vld [vmem:[#allocation10 + $0x100] sm:$0xff] }
 0x1cb   :  { %6366 = vst [vmem:[#allocation21_spill] sm:$0xff] %v4599_v46 }
 0x1cc   :  { %6367 = vst [vmem:[#allocation23_spill] sm:$0xff] %v4602_v56 }
 0x1cf   :  { %v3432_v48 = vpop.eup %3431 }
 0x1d0   :  { %v4512_v60 = vmul.f32 %v3432_v48, %v765_v59  ;;  %v4605_v48 = vld [vmem:[#allocation10 + $0x108] sm:$0xff]  ;;  %v4608_v59 = vld [vmem:[#allocation10 + $0x110] sm:$0xff] }
 0x1d1   :  { %6368 = vst [vmem:[#allocation24_spill] sm:$0xff] %v4605_v48 }
 0x1d2   :  { %6365 = vst [vmem:[#allocation22_spill] sm:$0xff] %v4512_v60  ;;  %797 = vmatmul.f32.vlgmr.msrb.gmra.mxu0 %v4512_v60  ;;  %817 = vmatmul.f32.vlgmr.msrb.gmra.mxu1 %v4512_v60 }
 0x1d3   :  { %837 = vmatmul.f32.vlgmr.msrb.gmra.mxu2 %v4512_v60  ;;  %857 = vmatmul.f32.vlgmr.msrb.gmra.mxu3 %v4512_v60  ;;  %6369 = vst [vmem:[#allocation26_spill] sm:$0xff] %v4608_v59  ;;  %v4611_v60 = vld [vmem:[#allocation10 + $0x118] sm:$0xff] }
 0x1d4   :  { %1093 = vmatpush.msrb.mxu0 %v4518_v61  ;;  %1113 = vmatpush.msrb.mxu1 %v4521_v39  ;;  %6370 = vst [vmem:[#allocation25_spill] sm:$0xff] %v4611_v60 }
 0x1d5   :  { %1133 = vmatpush.msrb.mxu2 %v4524_v63  ;;  %1153 = vmatpush.msrb.mxu3 %v4527_v51 }
 0x1d6   :  { %1094 = vmatpush.msrb.mxu0 %v4530_v30  ;;  %1114 = vmatpush.msrb.mxu1 %v4533_v31 }
 0x1d7   :  { %1134 = vmatpush.msrb.mxu2 %v4536_v33  ;;  %1154 = vmatpush.msrb.mxu3 %v4539_v34 }
 0x1d8   :  { %1095 = vmatpush.msrb.mxu0 %v4542_v35  ;;  %1115 = vmatpush.msrb.mxu1 %v4545_v36 }
 0x1d9   :  { %1135 = vmatpush.msrb.mxu2 %v4548_v37  ;;  %1155 = vmatpush.msrb.mxu3 %v4551_v38 }
 0x1da   :  { %1096 = vmatpush.msrb.mxu0 %v4554_v40  ;;  %1116 = vmatpush.msrb.mxu1 %v4557_v41 }
 0x1db   :  { %1136 = vmatpush.msrb.mxu2 %v4560_v43  ;;  %1156 = vmatpush.msrb.mxu3 %v4563_v44 }
 0x1dc   :  { %1097 = vmatpush.msrb.mxu0 %v4566_v45  ;;  %1117 = vmatpush.msrb.mxu1 %v4569_v47 }
 0x1dd   :  { %1137 = vmatpush.msrb.mxu2 %v4572_v54  ;;  %1157 = vmatpush.msrb.mxu3 %v4575_v58 }
 0x1de   :  { %1098 = vmatpush.msrb.mxu0 %v4578_v0  ;;  %1118 = vmatpush.msrb.mxu1 %v4581_v50 }
 0x1df   :  { %1138 = vmatpush.msrb.mxu2 %v4584_v55  ;;  %1158 = vmatpush.msrb.mxu3 %v4587_v62 }
 0x1e0   :  { %1099 = vmatpush.msrb.mxu0 %v4590_v53  ;;  %1119 = vmatpush.msrb.mxu1 %v4593_v49 }
 0x1e1   :  { %1139 = vmatpush.msrb.mxu2 %v4596_v13  ;;  %1159 = vmatpush.msrb.mxu3 %v4599_v46  ;;  %v4617_v46 = vld [vmem:[#allocation10 + $0xe8] sm:$0xff] }
 0x1e2   :  { %1100 = vmatpush.msrb.mxu0 %v4602_v56  ;;  %1120 = vmatpush.msrb.mxu1 %v4605_v48  ;;  %v4620_v56 = vld [vmem:[#allocation10 + $0xf0] sm:$0xff]  ;;  %v4623_v48 = vld [vmem:[#allocation10 + $0xf8] sm:$0xff] }
 0x1e3   :  { %1140 = vmatpush.msrb.mxu2 %v4608_v59  ;;  %1160 = vmatpush.msrb.mxu3 %v4611_v60  ;;  %v4626_v59 = vld [vmem:[#allocation10 + $0xc0] sm:$0xff]  ;;  %v4629_v60 = vld [vmem:[#allocation10 + $0xc8] sm:$0xff] }
 0x1e4   :  { %1101 = vmatpush.msrb.mxu0 %v4614_v26  ;;  %1121 = vmatpush.msrb.mxu1 %v4617_v46 }
 0x1e5   :  { %1141 = vmatpush.msrb.mxu2 %v4620_v56  ;;  %1161 = vmatpush.msrb.mxu3 %v4623_v48 }
 0x1e6   :  { %1102 = vmatpush.msrb.mxu0 %v4626_v59  ;;  %1122 = vmatpush.msrb.mxu1 %v4629_v60 }
 0x1e7   :  { %1142 = vmatpush.msrb.mxu2 %v6331_v1  ;;  %1162 = vmatpush.msrb.mxu3 %v6332_v2  ;;  %v6371_v1 = vld [vmem:[#allocation51_spill] sm:$0xff] }
 0x1e8   :  { %1103 = vmatpush.msrb.mxu0 %v6333_v3  ;;  %1123 = vmatpush.msrb.mxu1 %v6334_v4  ;;  %v227_v2 = vadd.f32 %v6371_v1, %v6357_v29  ;;  %v6372_v3 = vld [vmem:[#allocation52_spill] sm:$0xff] }
 0x1e9   :  { %1143 = vmatpush.msrb.mxu2 %v6335_v5  ;;  %1163 = vmatpush.msrb.mxu3 %v6336_v6  ;;  %v268_v4 = vadd.f32 %v6372_v3, %v6359_v32 }
 0x1ea   :  { %1104 = vmatpush.msrb.mxu0 %v6337_v7  ;;  %1124 = vmatpush.msrb.mxu1 %v6338_v8 }
 0x1eb   :  { %1144 = vmatpush.msrb.mxu2 %v6339_v9  ;;  %1164 = vmatpush.msrb.mxu3 %v6340_v10 }
 0x1ec   :  { %1105 = vmatpush.msrb.mxu0 %v6341_v11  ;;  %1125 = vmatpush.msrb.mxu1 %v6342_v12  ;;  %v6373_v11 = vld [vmem:[#allocation54_spill] sm:$0xff] }
 0x1ed   :  { %1145 = vmatpush.msrb.mxu2 %v6343_v14  ;;  %1165 = vmatpush.msrb.mxu3 %v6344_v15  ;;  %v350_v12 = vadd.f32 %v6373_v11, %v6361_v42 }
 0x1ee   :  { %1106 = vmatpush.msrb.mxu0 %v6345_v16  ;;  %1126 = vmatpush.msrb.mxu1 %v6346_v17 }
 0x1ef   :  { %1146 = vmatpush.msrb.mxu2 %v6347_v18  ;;  %1166 = vmatpush.msrb.mxu3 %v6348_v19 }
 0x1f0   :  { %1107 = vmatpush.msrb.mxu0 %v6349_v20  ;;  %1127 = vmatpush.msrb.mxu1 %v6350_v21 }
 0x1f1   :  { %1147 = vmatpush.msrb.mxu2 %v6351_v22  ;;  %1167 = vmatpush.msrb.mxu3 %v6352_v23  ;;  %v6374_v23 = vld [vmem:[#allocation53_spill] sm:$0xff] }
 0x1f2   :  { %1108 = vmatpush.msrb.mxu0 %v6353_v24  ;;  %1128 = vmatpush.msrb.mxu1 %v6354_v25  ;;  %v309_v24 = vadd.f32 %v6374_v23, %v6363_v52 }
 0x1f3   :  { %1148 = vmatpush.msrb.mxu2 %v6355_v27  ;;  %1168 = vmatpush.msrb.mxu3 %v6356_v28 }
 0x24f   :  { %v798_v5 = vpop.f32.mrf.mxu0  ;;  %v818_v6 = vpop.f32.mrf.mxu1 }
 0x250   :  { %v861_v7 = vadd.f32 %v798_v5, %v227_v2  ;;  %v862_v8 = vadd.f32 %v818_v6, %v268_v4 }
 0x252   :  { %v3344_v9 = vmul.f32 -1.442695, %v861_v7  ;;  %v3345_v10 = vmul.f32 -1.442695, %v862_v8 }
 0x254   :  { %3433 = vpow2.f32 %v3344_v9 }
 0x255   :  { %3435 = vpow2.f32 %v3345_v10 }
 0x256   :  { %v858_v14 = vpop.f32.mrf.mxu3  ;;  %v838_v21 = vpop.f32.mrf.mxu2 }
 0x257   :  { %v864_v15 = vadd.f32 %v858_v14, %v350_v12  ;;  %v863_v28 = vadd.f32 %v838_v21, %v309_v24 }
 0x259   :  { %v3346_v16 = vmul.f32 -1.442695, %v864_v15 }
 0x25a   :  { %v3434_v17 = vpop.eup %3433 }
 0x25b   :  { %v3436_v18 = vpop.eup %3435  ;;  %v868_v19 = vadd.f32 1.0, %v3434_v17  ;;  %3437 = vpow2.f32 %v3346_v16 }
 0x25c   :  { %v887_v20 = vadd.f32 1.0, %v3436_v18 }
 0x25d   :  { %3439 = vrcp.f32 %v868_v19  ;;  %v880_v6 = vand.u32 2147483648, %v868_v19  ;;  %v878_v9 = vand.u32 2147483647, %v868_v19  ;;  %vm874_vm10 = vweird.f32 %v868_v19 }
 0x25e   :  { %3441 = vrcp.f32 %v887_v20  ;;  %v899_v7 = vand.u32 2147483648, %v887_v20  ;;  %v897_v11 = vand.u32 2147483647, %v887_v20  ;;  %vm893_vm11 = vweird.f32 %v887_v20 }
 0x25f   :  { %v881_v15 = vor.u32 1.1754944e-38, %v880_v6  ;;  %vm879_vm14 = vcmp.eq.f32.partialorder %v878_v9, 8.507059e+37 }
 0x260   :  { %v900_v18 = vor.u32 1.1754944e-38, %v899_v7  ;;  %vm898_vm15 = vcmp.eq.f32.partialorder %v897_v11, 8.507059e+37  ;;  %v6378_v11 = vld [vmem:[#allocation24_spill] sm:$0xff] }
 0x261   :  { %v3438_v22 = vpop.eup %3437 }
 0x262   :  { %v907_v25 = vadd.f32 1.0, %v3438_v22 }
 0x263   :  { %v3440_v27 = vpop.eup %3439 }
 0x264   :  { %v3442_v1 = vpop.eup %3441  ;;  %v870_v2 = vmul.f32 %v3440_v27, %v868_v19  ;;  %3443 = vrcp.f32 %v907_v25  ;;  %vm875_vm8 = vweird.f32 %v3440_v27  ;;  %v919_v6 = vand.u32 2147483648, %v907_v25 }
 0x265   :  { %v889_v3 = vmul.f32 %v3442_v1, %v887_v20  ;;  %3445 = vtanh.f32 %v863_v28  ;;  %vm894_vm9 = vweird.f32 %v3442_v1  ;;  %vm876_vm12 = vmor %vm874_vm10, %vm875_vm8  ;;  %vm913_vm1 = vweird.f32 %v907_v25 }
 0x266   :  { %v871_v4 = vsub.f32 1.0, %v870_v2  ;;  %vm895_vm13 = vmor %vm893_vm11, %vm894_vm9 }
 0x267   :  { %v890_v5 = vsub.f32 1.0, %v889_v3 }
 0x268   :  { %v872_v8 = vmul.f32 %v3440_v27, %v871_v4 }
 0x269   :  { %v891_v10 = vmul.f32 %v3442_v1, %v890_v5 }
 0x26a   :  { %v3444_v12 = vpop.eup %3443  ;;  %v873_v14 = vadd.f32 %v3440_v27, %v872_v8  ;;  %v920_v8 = vor.u32 1.1754944e-38, %v919_v6  ;;  %v4756_v6 = vld [vmem:[#allocation10 + $0x40] sm:$0xff] }
 0x26b   :  { %v892_v16 = vadd.f32 %v3442_v1, %v891_v10  ;;  %v909_v17 = vmul.f32 %v3444_v12, %v907_v25  ;;  %v3446_v22 = vpop.eup %3445  ;;  %vm914_vm0 = vweird.f32 %v3444_v12  ;;  %6395 = vst [vmem:[#allocation42_spill] sm:$0xff] %v4756_v6 }
 0x26c   :  { %v877_v21 = vsel %vm876_vm12, %v3440_v27, %v873_v14  ;;  %v917_v27 = vand.u32 2147483647, %v907_v25  ;;  %vm915_vm2 = vmor %vm913_vm1, %vm914_vm0  ;;  %v6377_v25 = vld [vmem:[#allocation23_spill] sm:$0xff]  ;;  %v6380_v14 = vld [vmem:[#allocation25_spill] sm:$0xff] }
 0x26d   :  { %v882_v23 = vsel %vm879_vm14, %v881_v15, %v877_v21  ;;  %v896_v24 = vsel %vm895_vm13, %v3442_v1, %v892_v16  ;;  %v910_v28 = vsub.f32 1.0, %v909_v17  ;;  %v4714_v15 = vld [vmem:[#allocation10 + $0xd0] sm:$0xff]  ;;  %v4717_v16 = vld [vmem:[#allocation10 + $0xd8] sm:$0xff]  ;;  %v4720_v17 = vld [vmem:[#allocation10 + $0xa0] sm:$0xff] }
 0x26e   :  { %v901_v2 = vsel %vm898_vm15, %v900_v18, %v896_v24  ;;  %v924_v3 = vmul.f32 %v3446_v22, %v882_v23  ;;  %vm918_vm3 = vcmp.eq.f32.partialorder %v917_v27, 8.507059e+37  ;;  %6381 = vst [vmem:[#allocation28_spill] sm:$0xff] %v4714_v15  ;;  %v4723_v18 = vld [vmem:[#allocation10 + $0xa8] sm:$0xff]  ;;  %v4726_v21 = vld [vmem:[#allocation10 + $0xb0] sm:$0xff]  ;;  %v4729_v22 = vld [vmem:[#allocation10 + $0xb8] sm:$0xff] }
 0x26f   :  { %v923_v4 = vmul.f32 %v901_v2, %v4509_v57  ;;  %v911_v5 = vmul.f32 %v3444_v12, %v910_v28  ;;  %v6376_v57 = vld [vmem:[#allocation21_spill] sm:$0xff]  ;;  %6382 = vst [vmem:[#allocation30_spill] sm:$0xff] %v4717_v16  ;;  %v4732_v23 = vld [vmem:[#allocation10 + $0x80] sm:$0xff]  ;;  %v4735_v24 = vld [vmem:[#allocation10 + $0x88] sm:$0xff] }
 0x270   :  { %6383 = vst [vmem:[#allocation29_spill] sm:$0xff] %v4720_v17  ;;  %v4738_v28 = vld [vmem:[#allocation10 + $0x90] sm:$0xff]  ;;  %v4741_v2 = vld [vmem:[#allocation10 + $0x98] sm:$0xff]  ;;  %v4759_v27 = vld [vmem:[#allocation10 + $0x48] sm:$0xff] }
 0x271   :  { %v4667_v19 = vadd.f32 %v924_v3, %v923_v4  ;;  %v912_v20 = vadd.f32 %v3444_v12, %v911_v5  ;;  %6384 = vst [vmem:[#allocation31_spill] sm:$0xff] %v4723_v18  ;;  %v4744_v3 = vld [vmem:[#allocation10 + $0x60] sm:$0xff]  ;;  %v4747_v4 = vld [vmem:[#allocation10 + $0x68] sm:$0xff]  ;;  %v4750_v5 = vld [vmem:[#allocation10 + $0x70] sm:$0xff] }
 0x272   :  { %6385 = vst [vmem:[#allocation32_spill] sm:$0xff] %v4726_v21 }
 0x273   :  { %3447 = vtanh.f32 %v4667_v19  ;;  %v916_v7 = vsel %vm915_vm2, %v3444_v12, %v912_v20  ;;  %v6379_v12 = vld [vmem:[#allocation26_spill] sm:$0xff]  ;;  %6386 = vst [vmem:[#allocation34_spill] sm:$0xff] %v4729_v22 }
 0x274   :  { %v921_v9 = vsel %vm918_vm3, %v920_v8, %v916_v7  ;;  %6387 = vst [vmem:[#allocation33_spill] sm:$0xff] %v4732_v23  ;;  %v4753_v20 = vld [vmem:[#allocation10 + $0x78] sm:$0xff]  ;;  %v4762_v7 = vld [vmem:[#allocation10 + $0x50] sm:$0xff] }
 0x275   :  { %6388 = vst [vmem:[#allocation35_spill] sm:$0xff] %v4735_v24  ;;  %v4765_v8 = vld [vmem:[#allocation10 + $0x58] sm:$0xff] }
 0x276   :  { %6389 = vst [vmem:[#allocation36_spill] sm:$0xff] %v4738_v28 }
 0x277   :  { %6390 = vst [vmem:[#allocation38_spill] sm:$0xff] %v4741_v2 }
 0x278   :  { %6391 = vst [vmem:[#allocation37_spill] sm:$0xff] %v4744_v3 }
 0x279   :  { %v3448_v1 = vpop.eup %3447  ;;  %6392 = vst [vmem:[#allocation39_spill] sm:$0xff] %v4747_v4 }
 0x27a   :  { %v4670_v10 = vmul.f32 %v3448_v1, %v921_v9  ;;  %6393 = vst [vmem:[#allocation40_spill] sm:$0xff] %v4750_v5  ;;  %v4768_v1 = vld [vmem:[#allocation10 + $0x20] sm:$0xff]  ;;  %v4771_v9 = vld [vmem:[#allocation10 + $0x28] sm:$0xff] }
 0x27b   :  { %6394 = vst [vmem:[#allocation41_spill] sm:$0xff] %v4753_v20 }
 0x27c   :  { %6375 = vst [vmem:[#allocation27_spill] sm:$0xff] %v4670_v10  ;;  %953 = vmatmul.f32.vlgmr.msra.gmra.mxu0 %v4670_v10  ;;  %973 = vmatmul.f32.vlgmr.msra.gmra.mxu1 %v4670_v10 }
 0x27d   :  { %993 = vmatmul.f32.vlgmr.msra.gmra.mxu2 %v4670_v10  ;;  %1013 = vmatmul.f32.vlgmr.msra.gmra.mxu3 %v4670_v10  ;;  %6396 = vst [vmem:[#allocation43_spill] sm:$0xff] %v4759_v27  ;;  %v4774_v10 = vld [vmem:[#allocation10 + $0x30] sm:$0xff] }
 0x27e   :  { %1249 = vmatpush.msra.mxu0 %v4518_v61  ;;  %1269 = vmatpush.msra.mxu1 %v4521_v39  ;;  %6397 = vst [vmem:[#allocation44_spill] sm:$0xff] %v4762_v7 }
 0x27f   :  { %1289 = vmatpush.msra.mxu2 %v4524_v63  ;;  %1309 = vmatpush.msra.mxu3 %v4527_v51  ;;  %6398 = vst [vmem:[#allocation45_spill] sm:$0xff] %v4765_v8 }
 0x280   :  { %1250 = vmatpush.msra.mxu0 %v4530_v30  ;;  %1270 = vmatpush.msra.mxu1 %v4533_v31  ;;  %6399 = vst [vmem:[#allocation46_spill] sm:$0xff] %v4768_v1 }
 0x281   :  { %1290 = vmatpush.msra.mxu2 %v4536_v33  ;;  %1310 = vmatpush.msra.mxu3 %v4539_v34  ;;  %6400 = vst [vmem:[#allocation47_spill] sm:$0xff] %v4771_v9 }
 0x282   :  { %1251 = vmatpush.msra.mxu0 %v4542_v35  ;;  %1271 = vmatpush.msra.mxu1 %v4545_v36  ;;  %6401 = vst [vmem:[#allocation48_spill] sm:$0xff] %v4774_v10 }
 0x283   :  { %1291 = vmatpush.msra.mxu2 %v4548_v37  ;;  %1311 = vmatpush.msra.mxu3 %v4551_v38 }
 0x284   :  { %1252 = vmatpush.msra.mxu0 %v4554_v40  ;;  %1272 = vmatpush.msra.mxu1 %v4557_v41 }
 0x285   :  { %1292 = vmatpush.msra.mxu2 %v4560_v43  ;;  %1312 = vmatpush.msra.mxu3 %v4563_v44 }
 0x286   :  { %1253 = vmatpush.msra.mxu0 %v4566_v45  ;;  %1273 = vmatpush.msra.mxu1 %v4569_v47 }
 0x287   :  { %1293 = vmatpush.msra.mxu2 %v4572_v54  ;;  %1313 = vmatpush.msra.mxu3 %v4575_v58 }
 0x288   :  { %1254 = vmatpush.msra.mxu0 %v4578_v0  ;;  %1274 = vmatpush.msra.mxu1 %v4581_v50 }
 0x289   :  { %1294 = vmatpush.msra.mxu2 %v4584_v55  ;;  %1314 = vmatpush.msra.mxu3 %v4587_v62 }
 0x28a   :  { %1255 = vmatpush.msra.mxu0 %v4590_v53  ;;  %1275 = vmatpush.msra.mxu1 %v4593_v49 }
 0x28b   :  { %1295 = vmatpush.msra.mxu2 %v4596_v13  ;;  %1315 = vmatpush.msra.mxu3 %v6376_v57 }
 0x28c   :  { %1256 = vmatpush.msra.mxu0 %v6377_v25  ;;  %1276 = vmatpush.msra.mxu1 %v6378_v11 }
 0x28d   :  { %1296 = vmatpush.msra.mxu2 %v6379_v12  ;;  %1316 = vmatpush.msra.mxu3 %v6380_v14 }
 0x28e   :  { %1257 = vmatpush.msra.mxu0 %v4614_v26  ;;  %1277 = vmatpush.msra.mxu1 %v4617_v46 }
 0x28f   :  { %1297 = vmatpush.msra.mxu2 %v4620_v56  ;;  %1317 = vmatpush.msra.mxu3 %v4623_v48 }
 0x290   :  { %1258 = vmatpush.msra.mxu0 %v4626_v59  ;;  %1278 = vmatpush.msra.mxu1 %v4629_v60 }
 0x291   :  { %1298 = vmatpush.msra.mxu2 %v4714_v15  ;;  %1318 = vmatpush.msra.mxu3 %v4717_v16 }
 0x292   :  { %1259 = vmatpush.msra.mxu0 %v4720_v17  ;;  %1279 = vmatpush.msra.mxu1 %v4723_v18 }
 0x293   :  { %1299 = vmatpush.msra.mxu2 %v4726_v21  ;;  %1319 = vmatpush.msra.mxu3 %v4729_v22 }
 0x294   :  { %1260 = vmatpush.msra.mxu0 %v4732_v23  ;;  %1280 = vmatpush.msra.mxu1 %v4735_v24 }
 0x295   :  { %1300 = vmatpush.msra.mxu2 %v4738_v28  ;;  %1320 = vmatpush.msra.mxu3 %v4741_v2  ;;  %v6409_v28 = vld [vmem:[#allocation58_spill] sm:$0xff] }
 0x296   :  { %1261 = vmatpush.msra.mxu0 %v4744_v3  ;;  %1281 = vmatpush.msra.mxu1 %v4747_v4 }
 0x297   :  { %1301 = vmatpush.msra.mxu2 %v4750_v5  ;;  %1321 = vmatpush.msra.mxu3 %v4753_v20 }
 0x298   :  { %1262 = vmatpush.msra.mxu0 %v4756_v6  ;;  %1282 = vmatpush.msra.mxu1 %v4759_v27  ;;  %v4777_v27 = vld [vmem:[#allocation10 + $0x38] sm:$0xff] }
 0x299   :  { %1302 = vmatpush.msra.mxu2 %v4762_v7  ;;  %1322 = vmatpush.msra.mxu3 %v4765_v8  ;;  %6402 = vst [vmem:[#allocation50_spill] sm:$0xff] %v4777_v27  ;;  %v4780_v7 = vld [vmem:[#allocation10] sm:$0xff]  ;;  %v4783_v8 = vld [vmem:[#allocation10 + $0x8] sm:$0xff] }
 0x29a   :  { %1263 = vmatpush.msra.mxu0 %v4768_v1  ;;  %1283 = vmatpush.msra.mxu1 %v4771_v9  ;;  %6403 = vst [vmem:[#allocation49_spill] sm:$0xff] %v4780_v7  ;;  %v4786_v1 = vld [vmem:[#allocation10 + $0x10] sm:$0xff]  ;;  %v4789_v9 = vld [vmem:[#allocation10 + $0x18] sm:$0xff] }
 0x29b   :  { %1303 = vmatpush.msra.mxu2 %v4774_v10  ;;  %1323 = vmatpush.msra.mxu3 %v4777_v27  ;;  %6404 = vst [vmem:[#allocation51_spill] sm:$0xff] %v4783_v8  ;;  %v6407_v10 = vld [vmem:[#allocation55_spill] sm:$0xff]  ;;  %v6408_v27 = vld [vmem:[#allocation56_spill] sm:$0xff] }
 0x29c   :  { %1264 = vmatpush.msra.mxu0 %v4780_v7  ;;  %1284 = vmatpush.msra.mxu1 %v4783_v8  ;;  %6405 = vst [vmem:[#allocation52_spill] sm:$0xff] %v4786_v1  ;;  %v230_v6 = vadd.f32 %v6407_v10, %v6357_v29  ;;  %v271_v20 = vadd.f32 %v6408_v27, %v6359_v32 }
 0x29d   :  { %1304 = vmatpush.msra.mxu2 %v4786_v1  ;;  %6406 = vst [vmem:[#allocation54_spill] sm:$0xff] %v4789_v9  ;;  %1324 = vmatpush.msra.mxu3 %v4789_v9  ;;  %v353_v1 = vadd.f32 %v6409_v28, %v6361_v42 }
 0x2f9   :  { %v954_v5 = vpop.f32.mrf.mxu0  ;;  %v974_v7 = vpop.f32.mrf.mxu1 }
 0x2fa   :  { %v1017_v4 = vadd.f32 %v954_v5, %v230_v6  ;;  %v1018_v3 = vadd.f32 %v974_v7, %v271_v20 }
 0x2fc   :  { %v3347_v2 = vmul.f32 -1.442695, %v1017_v4  ;;  %v3348_v8 = vmul.f32 -1.442695, %v1018_v3  ;;  %v6410_v4 = vld [vmem:[#allocation57_spill] sm:$0xff] }
 0x2fd   :  { %v312_v3 = vadd.f32 %v6410_v4, %v6363_v52 }
 0x2fe   :  { %3449 = vpow2.f32 %v3347_v2 }
 0x2ff   :  { %3451 = vpow2.f32 %v3348_v8 }
 0x300   :  { %v1014_v24 = vpop.f32.mrf.mxu3  ;;  %v994_v27 = vpop.f32.mrf.mxu2 }
 0x301   :  { %v1020_v23 = vadd.f32 %v1014_v24, %v353_v1  ;;  %v1019_v6 = vadd.f32 %v994_v27, %v312_v3 }
 0x303   :  { %v3349_v9 = vmul.f32 -1.442695, %v1020_v23 }
 0x304   :  { %v3450_v22 = vpop.eup %3449 }
 0x305   :  { %v3452_v21 = vpop.eup %3451  ;;  %v1024_v10 = vadd.f32 1.0, %v3450_v22  ;;  %3453 = vpow2.f32 %v3349_v9 }
 0x306   :  { %v1043_v29 = vadd.f32 1.0, %v3452_v21 }
 0x307   :  { %3455 = vrcp.f32 %v1024_v10  ;;  %v1036_v1 = vand.u32 2147483648, %v1024_v10  ;;  %v1034_v9 = vand.u32 2147483647, %v1024_v10  ;;  %vm1030_vm6 = vweird.f32 %v1024_v10 }
 0x308   :  { %3457 = vrcp.f32 %v1043_v29  ;;  %v1055_v22 = vand.u32 2147483648, %v1043_v29  ;;  %v1053_v32 = vand.u32 2147483647, %v1043_v29  ;;  %vm1049_vm7 = vweird.f32 %v1043_v29 }
 0x309   :  { %v1037_v27 = vor.u32 1.1754944e-38, %v1036_v1  ;;  %vm1035_vm10 = vcmp.eq.f32.partialorder %v1034_v9, 8.507059e+37 }
 0x30a   :  { %vm1054_vm11 = vcmp.eq.f32.partialorder %v1053_v32, 8.507059e+37 }
 0x30b   :  { %v3454_v5 = vpop.eup %3453 }
 0x30c   :  { %v1063_v2 = vadd.f32 1.0, %v3454_v5 }
 0x30d   :  { %v3456_v20 = vpop.eup %3455 }
 0x30e   :  { %v3458_v28 = vpop.eup %3457  ;;  %v1026_v7 = vmul.f32 %v3456_v20, %v1024_v10  ;;  %3459 = vrcp.f32 %v1063_v2  ;;  %vm1031_vm4 = vweird.f32 %v3456_v20  ;;  %vm1069_vm13 = vweird.f32 %v1063_v2 }
 0x30f   :  { %v1045_v24 = vmul.f32 %v3458_v28, %v1043_v29  ;;  %3461 = vtanh.f32 %v1019_v6  ;;  %vm1050_vm5 = vweird.f32 %v3458_v28  ;;  %vm1032_vm8 = vmor %vm1030_vm6, %vm1031_vm4 }
 0x310   :  { %v1027_v23 = vsub.f32 1.0, %v1026_v7  ;;  %vm1051_vm9 = vmor %vm1049_vm7, %vm1050_vm5  ;;  %v1056_v7 = vor.u32 1.1754944e-38, %v1055_v22 }
 0x311   :  { %v1046_v8 = vsub.f32 1.0, %v1045_v24 }
 0x312   :  { %v1028_v21 = vmul.f32 %v3456_v20, %v1027_v23 }
 0x313   :  { %v1047_v42 = vmul.f32 %v3458_v28, %v1046_v8 }
 0x314   :  { %v3460_v18 = vpop.eup %3459  ;;  %v1029_v4 = vadd.f32 %v3456_v20, %v1028_v21 }
 0x315   :  { %v1048_v5 = vadd.f32 %v3458_v28, %v1047_v42  ;;  %v1065_v3 = vmul.f32 %v3460_v18, %v1063_v2  ;;  %v3462_v6 = vpop.eup %3461  ;;  %vm1070_vm12 = vweird.f32 %v3460_v18  ;;  %v1075_v42 = vand.u32 2147483648, %v1063_v2 }
 0x316   :  { %v1033_v24 = vsel %vm1032_vm8, %v3456_v20, %v1029_v4  ;;  %v1073_v20 = vand.u32 2147483647, %v1063_v2  ;;  %vm1071_vm14 = vmor %vm1069_vm13, %vm1070_vm12  ;;  %v6418_v2 = vld [vmem:[#allocation33_spill] sm:$0xff]  ;;  %v6419_v4 = vld [vmem:[#allocation35_spill] sm:$0xff] }
 0x317   :  { %v1038_v52 = vsel %vm1035_vm10, %v1037_v27, %v1033_v24  ;;  %v1052_v23 = vsel %vm1051_vm9, %v3458_v28, %v1048_v5  ;;  %v1066_v17 = vsub.f32 1.0, %v1065_v3  ;;  %v1076_v22 = vor.u32 1.1754944e-38, %v1075_v42  ;;  %v6420_v27 = vld [vmem:[#allocation36_spill] sm:$0xff]  ;;  %v6421_v5 = vld [vmem:[#allocation38_spill] sm:$0xff]  ;;  %v6422_v3 = vld [vmem:[#allocation37_spill] sm:$0xff] }
 0x318   :  { %v1057_v8 = vsel %vm1054_vm11, %v1056_v7, %v1052_v23  ;;  %v1080_v16 = vmul.f32 %v3462_v6, %v1038_v52  ;;  %vm1074_vm15 = vcmp.eq.f32.partialorder %v1073_v20, 8.507059e+37  ;;  %v6412_v52 = vld [vmem:[#allocation28_spill] sm:$0xff]  ;;  %v6423_v7 = vld [vmem:[#allocation39_spill] sm:$0xff]  ;;  %v6425_v6 = vld [vmem:[#allocation41_spill] sm:$0xff] }
 0x319   :  { %v1079_v15 = vmul.f32 %v1057_v8, %v4667_v19  ;;  %v1067_v21 = vmul.f32 %v3460_v18, %v1066_v17  ;;  %v6413_v19 = vld [vmem:[#allocation30_spill] sm:$0xff]  ;;  %v6416_v17 = vld [vmem:[#allocation32_spill] sm:$0xff]  ;;  %v6427_v8 = vld [vmem:[#allocation43_spill] sm:$0xff] }
 0x31a   :  { %v6424_v24 = vld [vmem:[#allocation40_spill] sm:$0xff]  ;;  %v6426_v23 = vld [vmem:[#allocation42_spill] sm:$0xff]  ;;  %v6431_v20 = vld [vmem:[#allocation47_spill] sm:$0xff] }
 0x31b   :  { %v4801_v10 = vadd.f32 %v1080_v16, %v1079_v15  ;;  %v1068_v29 = vadd.f32 %v3460_v18, %v1067_v21  ;;  %v6414_v15 = vld [vmem:[#allocation29_spill] sm:$0xff]  ;;  %v6415_v16 = vld [vmem:[#allocation31_spill] sm:$0xff]  ;;  %v6428_v21 = vld [vmem:[#allocation44_spill] sm:$0xff] }
 0x31c   :  { %v6430_v42 = vld [vmem:[#allocation46_spill] sm:$0xff] }
 0x31d   :  { %3463 = vtanh.f32 %v4801_v10  ;;  %v1072_v1 = vsel %vm1071_vm14, %v3460_v18, %v1068_v29  ;;  %v6417_v18 = vld [vmem:[#allocation34_spill] sm:$0xff]  ;;  %v6429_v29 = vld [vmem:[#allocation45_spill] sm:$0xff] }
 0x31e   :  { %v1077_v28 = vsel %vm1074_vm15, %v1076_v22, %v1072_v1  ;;  %v6432_v1 = vld [vmem:[#allocation48_spill] sm:$0xff]  ;;  %v6433_v22 = vld [vmem:[#allocation50_spill] sm:$0xff] }
 0x323   :  { %v3464_v32 = vpop.eup %3463 }
 0x324   :  { %v4804_v9 = vmul.f32 %v3464_v32, %v1077_v28  ;;  %v6434_v32 = vld [vmem:[#allocation49_spill] sm:$0xff]  ;;  %v6435_v28 = vld [vmem:[#allocation51_spill] sm:$0xff] }
 0x326   :  { %6411 = vst [vmem:[#allocation53_spill] sm:$0xff] %v4804_v9  ;;  %1109 = vmatmul.f32.vlgmr.msrb.gmra.mxu0 %v4804_v9  ;;  %1129 = vmatmul.f32.vlgmr.msrb.gmra.mxu1 %v4804_v9 }
 0x327   :  { %1149 = vmatmul.f32.vlgmr.msrb.gmra.mxu2 %v4804_v9  ;;  %1169 = vmatmul.f32.vlgmr.msrb.gmra.mxu3 %v4804_v9  ;;  %v6436_v9 = vld [vmem:[#allocation52_spill] sm:$0xff] }
 0x328   :  { %1405 = vmatpush.msrb.mxu0 %v4518_v61  ;;  %1425 = vmatpush.msrb.mxu1 %v4521_v39 }
 0x329   :  { %1445 = vmatpush.msrb.mxu2 %v4524_v63  ;;  %1465 = vmatpush.msrb.mxu3 %v4527_v51 }
 0x32a   :  { %1406 = vmatpush.msrb.mxu0 %v4530_v30  ;;  %1426 = vmatpush.msrb.mxu1 %v4533_v31 }
 0x32b   :  { %1446 = vmatpush.msrb.mxu2 %v4536_v33  ;;  %1466 = vmatpush.msrb.mxu3 %v4539_v34 }
 0x32c   :  { %1407 = vmatpush.msrb.mxu0 %v4542_v35  ;;  %1427 = vmatpush.msrb.mxu1 %v4545_v36 }
 0x32d   :  { %1447 = vmatpush.msrb.mxu2 %v4548_v37  ;;  %1467 = vmatpush.msrb.mxu3 %v4551_v38 }
 0x32e   :  { %1408 = vmatpush.msrb.mxu0 %v4554_v40  ;;  %1428 = vmatpush.msrb.mxu1 %v4557_v41 }
 0x32f   :  { %1448 = vmatpush.msrb.mxu2 %v4560_v43  ;;  %1468 = vmatpush.msrb.mxu3 %v4563_v44 }
 0x330   :  { %1409 = vmatpush.msrb.mxu0 %v4566_v45  ;;  %1429 = vmatpush.msrb.mxu1 %v4569_v47 }
 0x331   :  { %1449 = vmatpush.msrb.mxu2 %v4572_v54  ;;  %1469 = vmatpush.msrb.mxu3 %v4575_v58 }
 0x332   :  { %1410 = vmatpush.msrb.mxu0 %v4578_v0  ;;  %1430 = vmatpush.msrb.mxu1 %v4581_v50 }
 0x333   :  { %1450 = vmatpush.msrb.mxu2 %v4584_v55  ;;  %1470 = vmatpush.msrb.mxu3 %v4587_v62 }
 0x334   :  { %1411 = vmatpush.msrb.mxu0 %v4590_v53  ;;  %1431 = vmatpush.msrb.mxu1 %v4593_v49 }
 0x335   :  { %1451 = vmatpush.msrb.mxu2 %v4596_v13  ;;  %1471 = vmatpush.msrb.mxu3 %v6376_v57 }
 0x336   :  { %1412 = vmatpush.msrb.mxu0 %v6377_v25  ;;  %1432 = vmatpush.msrb.mxu1 %v6378_v11 }
 0x337   :  { %1452 = vmatpush.msrb.mxu2 %v6379_v12  ;;  %1472 = vmatpush.msrb.mxu3 %v6380_v14 }
 0x338   :  { %1413 = vmatpush.msrb.mxu0 %v4614_v26  ;;  %1433 = vmatpush.msrb.mxu1 %v4617_v46 }
 0x339   :  { %1453 = vmatpush.msrb.mxu2 %v4620_v56  ;;  %1473 = vmatpush.msrb.mxu3 %v4623_v48 }
 0x33a   :  { %1414 = vmatpush.msrb.mxu0 %v4626_v59  ;;  %1434 = vmatpush.msrb.mxu1 %v4629_v60 }
 0x33b   :  { %1454 = vmatpush.msrb.mxu2 %v6412_v52  ;;  %1474 = vmatpush.msrb.mxu3 %v6413_v19 }
 0x33c   :  { %1415 = vmatpush.msrb.mxu0 %v6414_v15  ;;  %1435 = vmatpush.msrb.mxu1 %v6415_v16 }
 0x33d   :  { %1455 = vmatpush.msrb.mxu2 %v6416_v17  ;;  %1475 = vmatpush.msrb.mxu3 %v6417_v18 }
 0x33e   :  { %1416 = vmatpush.msrb.mxu0 %v6418_v2  ;;  %1436 = vmatpush.msrb.mxu1 %v6419_v4 }
 0x33f   :  { %1456 = vmatpush.msrb.mxu2 %v6420_v27  ;;  %1476 = vmatpush.msrb.mxu3 %v6421_v5  ;;  %v6443_v27 = vld [vmem:[#allocation61_spill] sm:$0xff] }
 0x340   :  { %1417 = vmatpush.msrb.mxu0 %v6422_v3  ;;  %1437 = vmatpush.msrb.mxu1 %v6423_v7 }
 0x341   :  { %1457 = vmatpush.msrb.mxu2 %v6424_v24  ;;  %1477 = vmatpush.msrb.mxu3 %v6425_v6  ;;  %v6441_v24 = vld [vmem:[#allocation60_spill] sm:$0xff] }
 0x342   :  { %1418 = vmatpush.msrb.mxu0 %v6426_v23  ;;  %1438 = vmatpush.msrb.mxu1 %v6427_v8  ;;  %v6437_v23 = vld [vmem:[#allocation54_spill] sm:$0xff]  ;;  %v6438_v8 = vld [vmem:[#allocation72_spill] sm:$0xff] }
 0x343   :  { %1458 = vmatpush.msrb.mxu2 %v6428_v21  ;;  %1478 = vmatpush.msrb.mxu3 %v6429_v29  ;;  %v6439_v21 = vld [vmem:[#allocation59_spill] sm:$0xff]  ;;  %v6440_v29 = vld [vmem:[#allocation73_spill] sm:$0xff] }
 0x344   :  { %1419 = vmatpush.msrb.mxu0 %v6430_v42  ;;  %1439 = vmatpush.msrb.mxu1 %v6431_v20  ;;  %v233_v6 = vadd.f32 %v6439_v21, %v6438_v8  ;;  %v274_v42 = vadd.f32 %v6441_v24, %v6440_v29 }
 0x345   :  { %1459 = vmatpush.msrb.mxu2 %v6432_v1  ;;  %1479 = vmatpush.msrb.mxu3 %v6433_v22 }
 0x346   :  { %1420 = vmatpush.msrb.mxu0 %v6434_v32  ;;  %1440 = vmatpush.msrb.mxu1 %v6435_v28  ;;  %v6442_v32 = vld [vmem:[#allocation76_spill] sm:$0xff] }
 0x347   :  { %1460 = vmatpush.msrb.mxu2 %v6436_v9  ;;  %1480 = vmatpush.msrb.mxu3 %v6437_v23  ;;  %v356_v28 = vadd.f32 %v6443_v27, %v6442_v32 }
 0x3a3   :  { %v1110_v7 = vpop.f32.mrf.mxu0  ;;  %v1130_v20 = vpop.f32.mrf.mxu1 }
 0x3a4   :  { %v1173_v3 = vadd.f32 %v1110_v7, %v233_v6  ;;  %v1174_v1 = vadd.f32 %v1130_v20, %v274_v42  ;;  %v6444_v6 = vld [vmem:[#allocation78_spill] sm:$0xff] }
 0x3a6   :  { %v3350_v5 = vmul.f32 -1.442695, %v1173_v3  ;;  %v3351_v22 = vmul.f32 -1.442695, %v1174_v1  ;;  %v6445_v3 = vld [vmem:[#allocation64_spill] sm:$0xff] }
 0x3a7   :  { %v315_v42 = vadd.f32 %v6445_v3, %v6444_v6 }
 0x3a8   :  { %3465 = vpow2.f32 %v3350_v5 }
 0x3a9   :  { %3467 = vpow2.f32 %v3351_v22 }
 0x3aa   :  { %v1170_v9 = vpop.f32.mrf.mxu3  ;;  %v1150_v24 = vpop.f32.mrf.mxu2 }
 0x3ab   :  { %v1176_v4 = vadd.f32 %v1170_v9, %v356_v28  ;;  %v1175_v1 = vadd.f32 %v1150_v24, %v315_v42 }
 0x3ad   :  { %v3352_v23 = vmul.f32 -1.442695, %v1176_v4 }
 0x3ae   :  { %v3466_v2 = vpop.eup %3465 }
 0x3af   :  { %v3468_v18 = vpop.eup %3467  ;;  %v1180_v21 = vadd.f32 1.0, %v3466_v2  ;;  %3469 = vpow2.f32 %v3352_v23 }
 0x3b0   :  { %v1199_v8 = vadd.f32 1.0, %v3468_v18 }
 0x3b1   :  { %3471 = vrcp.f32 %v1180_v21  ;;  %v1192_v32 = vand.u32 2147483648, %v1180_v21  ;;  %v1190_v23 = vand.u32 2147483647, %v1180_v21  ;;  %vm1186_vm2 = vweird.f32 %v1180_v21 }
 0x3b2   :  { %3473 = vrcp.f32 %v1199_v8  ;;  %v1211_v2 = vand.u32 2147483648, %v1199_v8  ;;  %v1209_v17 = vand.u32 2147483647, %v1199_v8  ;;  %vm1205_vm3 = vweird.f32 %v1199_v8 }
 0x3b3   :  { %v1193_v24 = vor.u32 1.1754944e-38, %v1192_v32  ;;  %vm1191_vm6 = vcmp.eq.f32.partialorder %v1190_v23, 8.507059e+37 }
 0x3b4   :  { %vm1210_vm7 = vcmp.eq.f32.partialorder %v1209_v17, 8.507059e+37 }
 0x3b5   :  { %v3470_v7 = vpop.eup %3469 }
 0x3b6   :  { %v1219_v5 = vadd.f32 1.0, %v3470_v7 }
 0x3b7   :  { %v3472_v20 = vpop.eup %3471 }
 0x3b8   :  { %v3474_v27 = vpop.eup %3473  ;;  %v1182_v22 = vmul.f32 %v3472_v20, %v1180_v21  ;;  %3475 = vrcp.f32 %v1219_v5  ;;  %vm1187_vm0 = vweird.f32 %v3472_v20  ;;  %vm1225_vm9 = vweird.f32 %v1219_v5 }
 0x3b9   :  { %v1201_v9 = vmul.f32 %v3474_v27, %v1199_v8  ;;  %3477 = vtanh.f32 %v1175_v1  ;;  %vm1206_vm1 = vweird.f32 %v3474_v27  ;;  %vm1188_vm4 = vmor %vm1186_vm2, %vm1187_vm0  ;;  %v1229_v32 = vand.u32 2147483647, %v1219_v5 }
 0x3ba   :  { %v1183_v4 = vsub.f32 1.0, %v1182_v22  ;;  %vm1207_vm5 = vmor %vm1205_vm3, %vm1206_vm1  ;;  %v1212_v22 = vor.u32 1.1754944e-38, %v1211_v2 }
 0x3bb   :  { %v1202_v28 = vsub.f32 1.0, %v1201_v9  ;;  %vm1230_vm11 = vcmp.eq.f32.partialorder %v1229_v32, 8.507059e+37 }
 0x3bc   :  { %v1184_v18 = vmul.f32 %v3472_v20, %v1183_v4 }
 0x3bd   :  { %v1203_v29 = vmul.f32 %v3474_v27, %v1202_v28 }
 0x3be   :  { %v3476_v16 = vpop.eup %3475  ;;  %v1185_v3 = vadd.f32 %v3472_v20, %v1184_v18 }
 0x3bf   :  { %v1204_v7 = vadd.f32 %v3474_v27, %v1203_v29  ;;  %v1221_v42 = vmul.f32 %v3476_v16, %v1219_v5  ;;  %v3478_v1 = vpop.eup %3477  ;;  %vm1226_vm8 = vweird.f32 %v3476_v16  ;;  %v1231_v29 = vand.u32 2147483648, %v1219_v5 }
 0x3c0   :  { %v1189_v9 = vsel %vm1188_vm4, %v3472_v20, %v1185_v3  ;;  %vm1227_vm10 = vmor %vm1225_vm9, %vm1226_vm8 }
 0x3c1   :  { %v1194_v6 = vsel %vm1191_vm6, %v1193_v24, %v1189_v9  ;;  %v1208_v4 = vsel %vm1207_vm5, %v3474_v27, %v1204_v7  ;;  %v1222_v15 = vsub.f32 1.0, %v1221_v42  ;;  %v1232_v2 = vor.u32 1.1754944e-38, %v1231_v29  ;;  %v6478_v9 = vld [vmem:[#allocation78_spill] sm:$0xff] }
 0x3c2   :  { %v1213_v28 = vsel %vm1210_vm7, %v1212_v22, %v1208_v4  ;;  %v1236_v19 = vmul.f32 %v3478_v1, %v1194_v6  ;;  %v6479_v1 = vld [vmem:[#allocation68_spill] sm:$0xff] }
 0x3c3   :  { %v1235_v52 = vmul.f32 %v1213_v28, %v4801_v10  ;;  %v1223_v18 = vmul.f32 %v3476_v16, %v1222_v15  ;;  %v6476_v10 = vld [vmem:[#allocation76_spill] sm:$0xff]  ;;  %v318_v4 = vadd.f32 %v6479_v1, %v6478_v9  ;;  %v6480_v1 = vld [vmem:[#allocation66_spill] sm:$0xff] }
 0x3c5   :  { %v4883_v21 = vadd.f32 %v1236_v19, %v1235_v52  ;;  %v1224_v8 = vadd.f32 %v3476_v16, %v1223_v18  ;;  %v6477_v52 = vld [vmem:[#allocation65_spill] sm:$0xff] }
 0x3c6   :  { %v359_v19 = vadd.f32 %v6477_v52, %v6476_v10  ;;  %v1770_v52 = vld [vmem:[#allocation9 + $0x1a0] sm:$0xff] }
 0x3c7   :  { %3479 = vtanh.f32 %v4883_v21  ;;  %v1228_v20 = vsel %vm1227_vm10, %v3476_v16, %v1224_v8 }
 0x3c8   :  { %v1233_v27 = vsel %vm1230_vm11, %v1232_v2, %v1228_v20 }
 0x3cd   :  { %v3480_v17 = vpop.eup %3479 }
 0x3ce   :  { %v4886_v23 = vmul.f32 %v3480_v17, %v1233_v27 }
 0x3d0   :  { %1265 = vmatmul.f32.vlgmr.msra.gmra.mxu0 %v4886_v23  ;;  %1285 = vmatmul.f32.vlgmr.msra.gmra.mxu1 %v4886_v23 }
 0x3d1   :  { %1305 = vmatmul.f32.vlgmr.msra.gmra.mxu2 %v4886_v23  ;;  %1325 = vmatmul.f32.vlgmr.msra.gmra.mxu3 %v4886_v23 }
 0x3d2   :  { %1561 = vmatpush.msra.mxu0 %v4518_v61  ;;  %1581 = vmatpush.msra.mxu1 %v4521_v39  ;;  %v6446_v61 = vld [vmem:[#allocation28_spill] sm:$0xff]  ;;  %v6447_v39 = vld [vmem:[#allocation30_spill] sm:$0xff] }
 0x3d3   :  { %1601 = vmatpush.msra.mxu2 %v4524_v63  ;;  %1621 = vmatpush.msra.mxu3 %v4527_v51  ;;  %v6448_v63 = vld [vmem:[#allocation29_spill] sm:$0xff]  ;;  %v6449_v51 = vld [vmem:[#allocation31_spill] sm:$0xff] }
 0x3d4   :  { %1562 = vmatpush.msra.mxu0 %v4530_v30  ;;  %1582 = vmatpush.msra.mxu1 %v4533_v31  ;;  %v6450_v30 = vld [vmem:[#allocation32_spill] sm:$0xff]  ;;  %v6452_v31 = vld [vmem:[#allocation33_spill] sm:$0xff] }
 0x3d5   :  { %1602 = vmatpush.msra.mxu2 %v4536_v33  ;;  %1622 = vmatpush.msra.mxu3 %v4539_v34  ;;  %v6453_v33 = vld [vmem:[#allocation35_spill] sm:$0xff]  ;;  %v6454_v34 = vld [vmem:[#allocation36_spill] sm:$0xff] }
 0x3d6   :  { %1563 = vmatpush.msra.mxu0 %v4542_v35  ;;  %1583 = vmatpush.msra.mxu1 %v4545_v36  ;;  %v6455_v35 = vld [vmem:[#allocation38_spill] sm:$0xff]  ;;  %v6457_v36 = vld [vmem:[#allocation39_spill] sm:$0xff] }
 0x3d7   :  { %1603 = vmatpush.msra.mxu2 %v4548_v37  ;;  %1623 = vmatpush.msra.mxu3 %v4551_v38  ;;  %v6458_v37 = vld [vmem:[#allocation40_spill] sm:$0xff]  ;;  %v6459_v38 = vld [vmem:[#allocation41_spill] sm:$0xff] }
 0x3d8   :  { %1564 = vmatpush.msra.mxu0 %v4554_v40  ;;  %1584 = vmatpush.msra.mxu1 %v4557_v41  ;;  %v6460_v40 = vld [vmem:[#allocation42_spill] sm:$0xff]  ;;  %v6461_v41 = vld [vmem:[#allocation43_spill] sm:$0xff] }
 0x3d9   :  { %1604 = vmatpush.msra.mxu2 %v4560_v43  ;;  %1624 = vmatpush.msra.mxu3 %v4563_v44  ;;  %v6462_v43 = vld [vmem:[#allocation44_spill] sm:$0xff]  ;;  %v6463_v44 = vld [vmem:[#allocation45_spill] sm:$0xff] }
 0x3da   :  { %1565 = vmatpush.msra.mxu0 %v4566_v45  ;;  %1585 = vmatpush.msra.mxu1 %v4569_v47  ;;  %v6464_v45 = vld [vmem:[#allocation46_spill] sm:$0xff]  ;;  %v6465_v47 = vld [vmem:[#allocation47_spill] sm:$0xff] }
 0x3db   :  { %1605 = vmatpush.msra.mxu2 %v4572_v54  ;;  %1625 = vmatpush.msra.mxu3 %v4575_v58  ;;  %v6466_v54 = vld [vmem:[#allocation48_spill] sm:$0xff]  ;;  %v6467_v58 = vld [vmem:[#allocation50_spill] sm:$0xff] }
 0x3dc   :  { %1566 = vmatpush.msra.mxu0 %v4578_v0  ;;  %1586 = vmatpush.msra.mxu1 %v4581_v50  ;;  %v6468_v0 = vld [vmem:[#allocation49_spill] sm:$0xff]  ;;  %v6469_v50 = vld [vmem:[#allocation51_spill] sm:$0xff] }
 0x3dd   :  { %1606 = vmatpush.msra.mxu2 %v4584_v55  ;;  %1626 = vmatpush.msra.mxu3 %v4587_v62  ;;  %v6470_v55 = vld [vmem:[#allocation52_spill] sm:$0xff]  ;;  %v6471_v62 = vld [vmem:[#allocation54_spill] sm:$0xff] }
 0x3de   :  { %1567 = vmatpush.msra.mxu0 %v4590_v53  ;;  %1587 = vmatpush.msra.mxu1 %v4593_v49  ;;  %v6472_v53 = vld [vmem:[#allocation72_spill] sm:$0xff]  ;;  %v6473_v49 = vld [vmem:[#allocation62_spill] sm:$0xff] }
 0x3df   :  { %1607 = vmatpush.msra.mxu2 %v4596_v13  ;;  %1627 = vmatpush.msra.mxu3 %v6376_v57  ;;  %v236_v13 = vadd.f32 %v6473_v49, %v6472_v53 }
 0x3e0   :  { %1568 = vmatpush.msra.mxu0 %v6377_v25  ;;  %1588 = vmatpush.msra.mxu1 %v6378_v11 }
 0x3e1   :  { %1608 = vmatpush.msra.mxu2 %v6379_v12  ;;  %1628 = vmatpush.msra.mxu3 %v6380_v14 }
 0x3e2   :  { %1569 = vmatpush.msra.mxu0 %v4614_v26  ;;  %1589 = vmatpush.msra.mxu1 %v4617_v46  ;;  %v6451_v26 = vld [vmem:[#allocation34_spill] sm:$0xff]  ;;  %v6474_v46 = vld [vmem:[#allocation73_spill] sm:$0xff] }
 0x3e3   :  { %1609 = vmatpush.msra.mxu2 %v4620_v56  ;;  %1629 = vmatpush.msra.mxu3 %v4623_v48  ;;  %v6475_v56 = vld [vmem:[#allocation63_spill] sm:$0xff] }
 0x3e4   :  { %1570 = vmatpush.msra.mxu0 %v4626_v59  ;;  %1590 = vmatpush.msra.mxu1 %v4629_v60  ;;  %v6456_v60 = vld [vmem:[#allocation37_spill] sm:$0xff]  ;;  %v277_v48 = vadd.f32 %v6475_v56, %v6474_v46 }
 0x3e5   :  { %1610 = vmatpush.msra.mxu2 %v6446_v61  ;;  %1630 = vmatpush.msra.mxu3 %v6447_v39 }
 0x3e6   :  { %1571 = vmatpush.msra.mxu0 %v6448_v63  ;;  %1591 = vmatpush.msra.mxu1 %v6449_v51 }
 0x3e7   :  { %1611 = vmatpush.msra.mxu2 %v6450_v30  ;;  %1631 = vmatpush.msra.mxu3 %v6451_v26 }
 0x3e8   :  { %1572 = vmatpush.msra.mxu0 %v6452_v31  ;;  %1592 = vmatpush.msra.mxu1 %v6453_v33 }
 0x3e9   :  { %1612 = vmatpush.msra.mxu2 %v6454_v34  ;;  %1632 = vmatpush.msra.mxu3 %v6455_v35 }
 0x3ea   :  { %1573 = vmatpush.msra.mxu0 %v6456_v60  ;;  %1593 = vmatpush.msra.mxu1 %v6457_v36 }
 0x3eb   :  { %1613 = vmatpush.msra.mxu2 %v6458_v37  ;;  %1633 = vmatpush.msra.mxu3 %v6459_v38 }
 0x3ec   :  { %1574 = vmatpush.msra.mxu0 %v6460_v40  ;;  %1594 = vmatpush.msra.mxu1 %v6461_v41 }
 0x3ed   :  { %1614 = vmatpush.msra.mxu2 %v6462_v43  ;;  %1634 = vmatpush.msra.mxu3 %v6463_v44 }
 0x3ee   :  { %1575 = vmatpush.msra.mxu0 %v6464_v45  ;;  %1595 = vmatpush.msra.mxu1 %v6465_v47 }
 0x3ef   :  { %1615 = vmatpush.msra.mxu2 %v6466_v54  ;;  %1635 = vmatpush.msra.mxu3 %v6467_v58 }
 0x3f0   :  { %1576 = vmatpush.msra.mxu0 %v6468_v0  ;;  %1596 = vmatpush.msra.mxu1 %v6469_v50 }
 0x3f1   :  { %1616 = vmatpush.msra.mxu2 %v6470_v55  ;;  %1636 = vmatpush.msra.mxu3 %v6471_v62 }
 0x44d   :  { %v1266_v59 = vpop.f32.mrf.mxu0  ;;  %v1286_v57 = vpop.f32.mrf.mxu1 }
 0x44e   :  { %v1329_v25 = vadd.f32 %v1266_v59, %v236_v13  ;;  %v1330_v11 = vadd.f32 %v1286_v57, %v277_v48  ;;  %v1779_v48 = vld [vmem:[#allocation9 + $0x1e8] sm:$0xff]  ;;  %v1780_v59 = vld [vmem:[#allocation9 + $0x1f0] sm:$0xff]  ;;  %v1781_v57 = vld [vmem:[#allocation9 + $0x1f8] sm:$0xff] }
 0x450   :  { %v3353_v12 = vmul.f32 -1.442695, %v1329_v25  ;;  %v3354_v14 = vmul.f32 -1.442695, %v1330_v11  ;;  %v1774_v25 = vld [vmem:[#allocation9 + $0x1c0] sm:$0xff]  ;;  %v1775_v11 = vld [vmem:[#allocation9 + $0x1c8] sm:$0xff] }
 0x452   :  { %3481 = vpow2.f32 %v3353_v12  ;;  %v1776_v12 = vld [vmem:[#allocation9 + $0x1d0] sm:$0xff] }
 0x453   :  { %3483 = vpow2.f32 %v3354_v14  ;;  %v1777_v14 = vld [vmem:[#allocation9 + $0x1d8] sm:$0xff] }
 0x454   :  { %v1326_v15 = vpop.f32.mrf.mxu3  ;;  %v1306_v42 = vpop.f32.mrf.mxu2 }
 0x455   :  { %v1332_v16 = vadd.f32 %v1326_v15, %v359_v19  ;;  %v1331_v8 = vadd.f32 %v1306_v42, %v318_v4  ;;  %v1771_v19 = vld [vmem:[#allocation9 + $0x1a8] sm:$0xff]  ;;  %v1772_v15 = vld [vmem:[#allocation9 + $0x1b0] sm:$0xff]  ;;  %v239_v4 = vadd.f32 %v6480_v1, %v6472_v53 }
 0x456   :  { %v1763_v42 = vld [vmem:[#allocation9 + $0x168] sm:$0xff] }
 0x457   :  { %v3355_v6 = vmul.f32 -1.442695, %v1332_v16  ;;  %v1773_v16 = vld [vmem:[#allocation9 + $0x1b8] sm:$0xff] }
 0x458   :  { %v3482_v5 = vpop.eup %3481 }
 0x459   :  { %v3484_v3 = vpop.eup %3483  ;;  %v1336_v24 = vadd.f32 1.0, %v3482_v5  ;;  %3485 = vpow2.f32 %v3355_v6  ;;  %v1766_v6 = vld [vmem:[#allocation9 + $0x180] sm:$0xff]  ;;  %v1767_v5 = vld [vmem:[#allocation9 + $0x188] sm:$0xff] }
 0x45a   :  { %v1355_v7 = vadd.f32 1.0, %v3484_v3  ;;  %v1768_v3 = vld [vmem:[#allocation9 + $0x190] sm:$0xff] }
 0x45b   :  { %3487 = vrcp.f32 %v1336_v24  ;;  %v1348_v27 = vand.u32 2147483648, %v1336_v24  ;;  %v1346_v63 = vand.u32 2147483647, %v1336_v24  ;;  %vm1342_vm14 = vweird.f32 %v1336_v24 }
 0x45c   :  { %3489 = vrcp.f32 %v1355_v7  ;;  %v1367_v61 = vand.u32 2147483648, %v1355_v7  ;;  %v1365_v30 = vand.u32 2147483647, %v1355_v7  ;;  %vm1361_vm15 = vweird.f32 %v1355_v7 }
 0x45d   :  { %v1349_v33 = vor.u32 1.1754944e-38, %v1348_v27  ;;  %vm1347_vm2 = vcmp.eq.f32.partialorder %v1346_v63, 8.507059e+37  ;;  %v1754_v63 = vld [vmem:[#allocation9 + $0x120] sm:$0xff] }
 0x45e   :  { %v1368_v60 = vor.u32 1.1754944e-38, %v1367_v61  ;;  %vm1366_vm3 = vcmp.eq.f32.partialorder %v1365_v30, 8.507059e+37  ;;  %v1756_v30 = vld [vmem:[#allocation9 + $0x130] sm:$0xff] }
 0x45f   :  { %v3486_v22 = vpop.eup %3485 }
 0x460   :  { %v1375_v28 = vadd.f32 1.0, %v3486_v22  ;;  %v1764_v22 = vld [vmem:[#allocation9 + $0x170] sm:$0xff] }
 0x461   :  { %v3488_v18 = vpop.eup %3487 }
 0x462   :  { %v3490_v29 = vpop.eup %3489  ;;  %v1338_v32 = vmul.f32 %v3488_v18, %v1336_v24  ;;  %3491 = vrcp.f32 %v1375_v28  ;;  %vm1343_vm12 = vweird.f32 %v3488_v18  ;;  %v1387_v0 = vand.u32 2147483648, %v1375_v28  ;;  %v1769_v24 = vld [vmem:[#allocation9 + $0x198] sm:$0xff] }
 0x463   :  { %v1357_v20 = vmul.f32 %v3490_v29, %v1355_v7  ;;  %3493 = vtanh.f32 %v1331_v8  ;;  %vm1362_vm13 = vweird.f32 %v3490_v29  ;;  %vm1344_vm0 = vmor %vm1342_vm14, %vm1343_vm12  ;;  %vm1381_vm5 = vweird.f32 %v1375_v28  ;;  %v1762_v7 = vld [vmem:[#allocation9 + $0x160] sm:$0xff]  ;;  %v1765_v8 = vld [vmem:[#allocation9 + $0x178] sm:$0xff] }
 0x464   :  { %v1339_v2 = vsub.f32 1.0, %v1338_v32  ;;  %vm1363_vm1 = vmor %vm1361_vm15, %vm1362_vm13  ;;  %v1385_v50 = vand.u32 2147483647, %v1375_v28  ;;  %v1388_v62 = vor.u32 1.1754944e-38, %v1387_v0  ;;  %v1743_v0 = vld [vmem:[#allocation9 + $0xc8] sm:$0xff] }
 0x465   :  { %v1358_v17 = vsub.f32 1.0, %v1357_v20  ;;  %v1758_v20 = vld [vmem:[#allocation9 + $0x140] sm:$0xff] }
 0x466   :  { %v1340_v39 = vmul.f32 %v3488_v18, %v1339_v2  ;;  %vm1386_vm7 = vcmp.eq.f32.partialorder %v1385_v50, 8.507059e+37  ;;  %v1759_v2 = vld [vmem:[#allocation9 + $0x148] sm:$0xff]  ;;  %v1744_v50 = vld [vmem:[#allocation9 + $0xd0] sm:$0xff] }
 0x467   :  { %v1359_v51 = vmul.f32 %v3490_v29, %v1358_v17  ;;  %v1760_v17 = vld [vmem:[#allocation9 + $0x150] sm:$0xff] }
 0x468   :  { %v3492_v26 = vpop.eup %3491  ;;  %v1341_v31 = vadd.f32 %v3488_v18, %v1340_v39  ;;  %v1761_v39 = vld [vmem:[#allocation9 + $0x158] sm:$0xff] }
 0x469   :  { %v1360_v34 = vadd.f32 %v3490_v29, %v1359_v51  ;;  %v1377_v35 = vmul.f32 %v3492_v26, %v1375_v28  ;;  %v3494_v37 = vpop.eup %3493  ;;  %vm1382_vm4 = vweird.f32 %v3492_v26  ;;  %v6481_v28 = vld [vmem:[#allocation67_spill] sm:$0xff]  ;;  %v1755_v51 = vld [vmem:[#allocation9 + $0x128] sm:$0xff] }
 0x46a   :  { %v1345_v36 = vsel %vm1344_vm0, %v3488_v18, %v1341_v31  ;;  %vm1383_vm6 = vmor %vm1381_vm5, %vm1382_vm4  ;;  %v280_v18 = vadd.f32 %v6481_v28, %v6474_v46  ;;  %v1724_v28 = vld [vmem:[#allocation9 + $0x30] sm:$0xff] }
 0x46b   :  { %v1350_v38 = vsel %vm1347_vm2, %v1349_v33, %v1345_v36  ;;  %v1364_v40 = vsel %vm1363_vm1, %v3490_v29, %v1360_v34  ;;  %v1378_v41 = vsub.f32 1.0, %v1377_v35  ;;  %v1757_v33 = vld [vmem:[#allocation9 + $0x138] sm:$0xff]  ;;  %v1750_v34 = vld [vmem:[#allocation9 + $0x100] sm:$0xff]  ;;  %v1751_v35 = vld [vmem:[#allocation9 + $0x108] sm:$0xff] }
 0x46c   :  { %v1369_v43 = vsel %vm1366_vm3, %v1368_v60, %v1364_v40  ;;  %v1392_v44 = vmul.f32 %v3494_v37, %v1350_v38  ;;  %v1752_v60 = vld [vmem:[#allocation9 + $0x110] sm:$0xff]  ;;  %v1753_v36 = vld [vmem:[#allocation9 + $0x118] sm:$0xff]  ;;  %v1746_v40 = vld [vmem:[#allocation9 + $0xe0] sm:$0xff] }
 0x46d   :  { %v1391_v45 = vmul.f32 %v1369_v43, %v4883_v21  ;;  %v1379_v47 = vmul.f32 %v3492_v26, %v1378_v41  ;;  %v1778_v21 = vld [vmem:[#allocation9 + $0x1e0] sm:$0xff]  ;;  %v6482_v37 = vld [vmem:[#allocation69_spill] sm:$0xff]  ;;  %v1747_v41 = vld [vmem:[#allocation9 + $0xe8] sm:$0xff] }
 0x46e   :  { %v362_v38 = vadd.f32 %v6482_v37, %v6476_v10  ;;  %v1748_v43 = vld [vmem:[#allocation9 + $0xf0] sm:$0xff] }
 0x46f   :  { %v4965_v54 = vadd.f32 %v1392_v44, %v1391_v45  ;;  %v1380_v58 = vadd.f32 %v3492_v26, %v1379_v47  ;;  %v1749_v45 = vld [vmem:[#allocation9 + $0xf8] sm:$0xff] }
 0x471   :  { %3495 = vtanh.f32 %v4965_v54  ;;  %v1384_v55 = vsel %vm1383_vm6, %v3492_v26, %v1380_v58  ;;  %v1742_v58 = vld [vmem:[#allocation9 + $0xc0] sm:$0xff] }
 0x472   :  { %v1389_v13 = vsel %vm1386_vm7, %v1388_v62, %v1384_v55  ;;  %v1745_v55 = vld [vmem:[#allocation9 + $0xd8] sm:$0xff] }
 0x477   :  { %v3496_v49 = vpop.eup %3495 }
 0x478   :  { %v4968_v56 = vmul.f32 %v3496_v49, %v1389_v13  ;;  %v1738_v49 = vld [vmem:[#allocation9 + $0xa0] sm:$0xff]  ;;  %v1739_v13 = vld [vmem:[#allocation9 + $0xa8] sm:$0xff] }
 0x47a   :  { %1421 = vmatmul.f32.vlgmr.msrb.gmra.mxu0 %v4968_v56  ;;  %1441 = vmatmul.f32.vlgmr.msrb.gmra.mxu1 %v4968_v56 }
 0x47b   :  { %1461 = vmatmul.f32.vlgmr.msrb.gmra.mxu2 %v4968_v56  ;;  %1481 = vmatmul.f32.vlgmr.msrb.gmra.mxu3 %v4968_v56 }
 0x47c   :  { %1793 = vmatpush.msrb.mxu0 %v1778_v21  ;;  %1834 = vmatpush.msrb.mxu1 %v1779_v48  ;;  %v1740_v21 = vld [vmem:[#allocation9 + $0xb0] sm:$0xff] }
 0x47d   :  { %1875 = vmatpush.msrb.mxu2 %v1780_v59  ;;  %1916 = vmatpush.msrb.mxu3 %v1781_v57  ;;  %v1741_v59 = vld [vmem:[#allocation9 + $0xb8] sm:$0xff]  ;;  %v1734_v57 = vld [vmem:[#allocation9 + $0x80] sm:$0xff] }
 0x47e   :  { %1794 = vmatpush.msrb.mxu0 %v1774_v25  ;;  %1835 = vmatpush.msrb.mxu1 %v1775_v11  ;;  %v1735_v25 = vld [vmem:[#allocation9 + $0x88] sm:$0xff] }
 0x47f   :  { %1876 = vmatpush.msrb.mxu2 %v1776_v12  ;;  %1917 = vmatpush.msrb.mxu3 %v1777_v14  ;;  %v1736_v14 = vld [vmem:[#allocation9 + $0x90] sm:$0xff] }
 0x480   :  { %1795 = vmatpush.msrb.mxu0 %v1770_v52  ;;  %1836 = vmatpush.msrb.mxu1 %v1771_v19  ;;  %v1737_v52 = vld [vmem:[#allocation9 + $0x98] sm:$0xff] }
 0x481   :  { %1877 = vmatpush.msrb.mxu2 %v1772_v15  ;;  %1918 = vmatpush.msrb.mxu3 %v1773_v16  ;;  %v1730_v15 = vld [vmem:[#allocation9 + $0x60] sm:$0xff]  ;;  %v1731_v16 = vld [vmem:[#allocation9 + $0x68] sm:$0xff] }
 0x482   :  { %1796 = vmatpush.msrb.mxu0 %v1766_v6  ;;  %1837 = vmatpush.msrb.mxu1 %v1767_v5  ;;  %v1732_v6 = vld [vmem:[#allocation9 + $0x70] sm:$0xff]  ;;  %v1733_v5 = vld [vmem:[#allocation9 + $0x78] sm:$0xff] }
 0x483   :  { %1878 = vmatpush.msrb.mxu2 %v1768_v3  ;;  %1919 = vmatpush.msrb.mxu3 %v1769_v24  ;;  %v1726_v3 = vld [vmem:[#allocation9 + $0x40] sm:$0xff]  ;;  %v1727_v24 = vld [vmem:[#allocation9 + $0x48] sm:$0xff] }
 0x484   :  { %1797 = vmatpush.msrb.mxu0 %v1762_v7  ;;  %1838 = vmatpush.msrb.mxu1 %v1763_v42  ;;  %v1728_v7 = vld [vmem:[#allocation9 + $0x50] sm:$0xff]  ;;  %v1729_v42 = vld [vmem:[#allocation9 + $0x58] sm:$0xff] }
 0x485   :  { %1879 = vmatpush.msrb.mxu2 %v1764_v22  ;;  %1920 = vmatpush.msrb.mxu3 %v1765_v8  ;;  %v1722_v22 = vld [vmem:[#allocation9 + $0x20] sm:$0xff] }
 0x486   :  { %1798 = vmatpush.msrb.mxu0 %v1758_v20  ;;  %1839 = vmatpush.msrb.mxu1 %v1759_v2  ;;  %v1718_v20 = vld [vmem:[#allocation9] sm:$0xff]  ;;  %v1719_v2 = vld [vmem:[#allocation9 + $0x8] sm:$0xff] }
 0x487   :  { %1880 = vmatpush.msrb.mxu2 %v1760_v17  ;;  %1921 = vmatpush.msrb.mxu3 %v1761_v39 }
 0x488   :  { %1799 = vmatpush.msrb.mxu0 %v1754_v63  ;;  %1840 = vmatpush.msrb.mxu1 %v1755_v51 }
 0x489   :  { %1881 = vmatpush.msrb.mxu2 %v1756_v30  ;;  %1922 = vmatpush.msrb.mxu3 %v1757_v33 }
 0x48a   :  { %1800 = vmatpush.msrb.mxu0 %v1750_v34  ;;  %1841 = vmatpush.msrb.mxu1 %v1751_v35 }
 0x48b   :  { %1882 = vmatpush.msrb.mxu2 %v1752_v60  ;;  %1923 = vmatpush.msrb.mxu3 %v1753_v36 }
 0x48c   :  { %1801 = vmatpush.msrb.mxu0 %v1746_v40  ;;  %1842 = vmatpush.msrb.mxu1 %v1747_v41 }
 0x48d   :  { %1883 = vmatpush.msrb.mxu2 %v1748_v43  ;;  %1924 = vmatpush.msrb.mxu3 %v1749_v45 }
 0x48e   :  { %1802 = vmatpush.msrb.mxu0 %v1742_v58  ;;  %1843 = vmatpush.msrb.mxu1 %v1743_v0 }
 0x48f   :  { %1884 = vmatpush.msrb.mxu2 %v1744_v50  ;;  %1925 = vmatpush.msrb.mxu3 %v1745_v55 }
 0x490   :  { %1803 = vmatpush.msrb.mxu0 %v1738_v49  ;;  %1844 = vmatpush.msrb.mxu1 %v1739_v13 }
 0x491   :  { %1885 = vmatpush.msrb.mxu2 %v1740_v21  ;;  %1926 = vmatpush.msrb.mxu3 %v1741_v59 }
 0x492   :  { %1804 = vmatpush.msrb.mxu0 %v1734_v57  ;;  %1845 = vmatpush.msrb.mxu1 %v1735_v25 }
 0x493   :  { %1886 = vmatpush.msrb.mxu2 %v1736_v14  ;;  %1927 = vmatpush.msrb.mxu3 %v1737_v52 }
 0x494   :  { %1805 = vmatpush.msrb.mxu0 %v1730_v15  ;;  %1846 = vmatpush.msrb.mxu1 %v1731_v16  ;;  %v6485_v16 = vld [vmem:[#allocation22_spill] sm:$0xff] }
 0x495   :  { %1887 = vmatpush.msrb.mxu2 %v1732_v6  ;;  %1928 = vmatpush.msrb.mxu3 %v1733_v5  ;;  %v6486_v6 = vld [vmem:[#allocation27_spill] sm:$0xff] }
 0x496   :  { %1806 = vmatpush.msrb.mxu0 %v1726_v3  ;;  %1847 = vmatpush.msrb.mxu1 %v1727_v24  ;;  %v5012_v5 = vld [vmem:[#allocation10 + $0x3e0] sm:$0xff]  ;;  %v5014_v3 = vld [vmem:[#allocation10 + $0x3e8] sm:$0xff] }
 0x497   :  { %1888 = vmatpush.msrb.mxu2 %v1728_v7  ;;  %1929 = vmatpush.msrb.mxu3 %v1729_v42  ;;  %6487 = vst [vmem:[#allocation21_spill] sm:$0xff] %v5012_v5  ;;  %v5016_v24 = vld [vmem:[#allocation10 + $0x3c0] sm:$0xff]  ;;  %v5020_v7 = vld [vmem:[#allocation10 + $0x3c8] sm:$0xff]  ;;  %v5022_v42 = vld [vmem:[#allocation10 + $0x3f8] sm:$0xff] }
 0x498   :  { %1807 = vmatpush.msrb.mxu0 %v1722_v22  ;;  %6488 = vst [vmem:[#allocation23_spill] sm:$0xff] %v5020_v7  ;;  %v5025_v22 = vld [vmem:[#allocation10 + $0x3a0] sm:$0xff] }
 0x499   :  { %1889 = vmatpush.msrb.mxu2 %v1724_v28  ;;  %v6491_v28 = vld [vmem:[#allocation53_spill] sm:$0xff] }
 0x49a   :  { %1808 = vmatpush.msrb.mxu0 %v1718_v20  ;;  %v5060_v20 = vld [vmem:[#allocation10 + $0x388] sm:$0xff] }
 0x4f7   :  { %v1422_v29 = vpop.f32.mrf.mxu0  ;;  %v1442_v32 = vpop.f32.mrf.mxu1 }
 0x4f8   :  { %v1485_v27 = vadd.f32 %v1422_v29, %v239_v4  ;;  %v1486_v61 = vadd.f32 %v1442_v32, %v280_v18  ;;  %v1723_v4 = vld [vmem:[#allocation9 + $0x28] sm:$0xff]  ;;  %v1725_v18 = vld [vmem:[#allocation9 + $0x38] sm:$0xff] }
 0x4f9   :  { %v6483_v29 = vld [vmem:[#allocation74_spill] sm:$0xff]  ;;  %1848 = vmatpush.msrb.mxu1 %v1723_v4  ;;  %1930 = vmatpush.msrb.mxu3 %v1725_v18  ;;  %v5048_v18 = vld [vmem:[#allocation10 + $0x3f0] sm:$0xff] }
 0x4fa   :  { %v3356_v26 = vmul.f32 -1.442695, %v1485_v27  ;;  %v3357_v31 = vmul.f32 -1.442695, %v1486_v61  ;;  %v321_v32 = vadd.f32 %v6483_v29, %v6478_v9  ;;  %v1720_v27 = vld [vmem:[#allocation9 + $0x10] sm:$0xff]  ;;  %v1721_v61 = vld [vmem:[#allocation9 + $0x18] sm:$0xff] }
 0x4fb   :  { %1849 = vmatpush.msrb.mxu1 %v1719_v2  ;;  %1890 = vmatpush.msrb.mxu2 %v1720_v27  ;;  %v5029_v4 = vld [vmem:[#allocation10 + $0x3d8] sm:$0xff]  ;;  %v5056_v29 = vld [vmem:[#allocation10 + $0x3b0] sm:$0xff]  ;;  %v5068_v2 = vld [vmem:[#allocation10 + $0x368] sm:$0xff] }
 0x4fc   :  { %3497 = vpow2.f32 %v3356_v26  ;;  %1931 = vmatpush.msrb.mxu3 %v1721_v61  ;;  %6490 = vst [vmem:[#allocation26_spill] sm:$0xff] %v5029_v4  ;;  %v5072_v27 = vld [vmem:[#allocation10 + $0x390] sm:$0xff]  ;;  %v5078_v61 = vld [vmem:[#allocation10 + $0x378] sm:$0xff] }
 0x4fd   :  { %3499 = vpow2.f32 %v3357_v31 }
 0x4fe   :  { %v1482_v44 = vpop.f32.mrf.mxu3  ;;  %v1462_v1 = vpop.f32.mrf.mxu2 }
 0x4ff   :  { %v1488_v47 = vadd.f32 %v1482_v44, %v362_v38  ;;  %v1487_v63 = vadd.f32 %v1462_v1, %v321_v32  ;;  %v5027_v1 = vld [vmem:[#allocation10 + $0x3a8] sm:$0xff]  ;;  %v5058_v32 = vld [vmem:[#allocation10 + $0x380] sm:$0xff] }
 0x500   :  { %6489 = vst [vmem:[#allocation24_spill] sm:$0xff] %v5027_v1 }
 0x501   :  { %v3358_v62 = vmul.f32 -1.442695, %v1488_v47  ;;  %6493 = vst [vmem:[#allocation55_spill] sm:$0xff] %v5058_v32 }
 0x502   :  { %v3498_v48 = vpop.eup %3497 }
 0x503   :  { %v3500_v11 = vpop.eup %3499  ;;  %v4980_v12 = vadd.f32 1.0, %v3498_v48  ;;  %3501 = vpow2.f32 %v3358_v62 }
 0x504   :  { %v4982_v19 = vadd.f32 1.0, %v3500_v11 }
 0x505   :  { %3503 = vrcp.f32 %v4980_v12  ;;  %v1504_v34 = vand.u32 2147483648, %v4980_v12  ;;  %v1502_v36 = vand.u32 2147483647, %v4980_v12  ;;  %vm1498_vm10 = vweird.f32 %v4980_v12 }
 0x506   :  { %3505 = vrcp.f32 %v4982_v19  ;;  %v1523_v35 = vand.u32 2147483648, %v4982_v19  ;;  %v1521_v38 = vand.u32 2147483647, %v4982_v19  ;;  %vm1517_vm11 = vweird.f32 %v4982_v19 }
 0x507   :  { %v1505_v43 = vor.u32 1.1754944e-38, %v1504_v34  ;;  %vm1503_vm14 = vcmp.eq.f32.partialorder %v1502_v36, 8.507059e+37  ;;  %v5092_v34 = vld [vmem:[#allocation10 + $0x358] sm:$0xff]  ;;  %v5096_v36 = vld [vmem:[#allocation10 + $0x350] sm:$0xff] }
 0x508   :  { %v1524_v47 = vor.u32 1.1754944e-38, %v1523_v35  ;;  %vm1522_vm15 = vcmp.eq.f32.partialorder %v1521_v38, 8.507059e+37 }
 0x509   :  { %v3502_v8 = vpop.eup %3501 }
 0x50a   :  { %v1531_v17 = vadd.f32 1.0, %v3502_v8  ;;  %v5051_v8 = vld [vmem:[#allocation10 + $0x3d0] sm:$0xff] }
 0x50b   :  { %v3504_v39 = vpop.eup %3503 }
 0x50c   :  { %v3506_v51 = vpop.eup %3505  ;;  %v1494_v30 = vmul.f32 %v3504_v39, %v4980_v12  ;;  %3507 = vrcp.f32 %v1531_v17  ;;  %vm1499_vm8 = vweird.f32 %v3504_v39  ;;  %v1543_v25 = vand.u32 2147483648, %v1531_v17 }
 0x50d   :  { %v1513_v26 = vmul.f32 %v3506_v51, %v4982_v19  ;;  %3509 = vtanh.f32 %v1487_v63  ;;  %vm1518_vm9 = vweird.f32 %v3506_v51  ;;  %vm1500_vm12 = vmor %vm1498_vm10, %vm1499_vm8  ;;  %vm1537_vm1 = vweird.f32 %v1531_v17  ;;  %v6494_v63 = vld [vmem:[#allocation70_spill] sm:$0xff] }
 0x50e   :  { %v1495_v31 = vsub.f32 1.0, %v1494_v30  ;;  %vm1519_vm13 = vmor %vm1517_vm11, %vm1518_vm9  ;;  %v1541_v11 = vand.u32 2147483647, %v1531_v17  ;;  %v1544_v14 = vor.u32 1.1754944e-38, %v1543_v25  ;;  %v6495_v30 = vld [vmem:[#allocation71_spill] sm:$0xff] }
 0x50f   :  { %v1514_v33 = vsub.f32 1.0, %v1513_v26  ;;  %v283_v26 = vadd.f32 %v6495_v30, %v6474_v46  ;;  %v5103_v46 = vld [vmem:[#allocation10 + $0x338] sm:$0xff]  ;;  %v5138_v25 = vld [vmem:[#allocation10 + $0x2a0] sm:$0xff] }
 0x510   :  { %v1496_v60 = vmul.f32 %v3504_v39, %v1495_v31  ;;  %vm1542_vm3 = vcmp.eq.f32.partialorder %v1541_v11, 8.507059e+37  ;;  %v5088_v31 = vld [vmem:[#allocation10 + $0x340] sm:$0xff]  ;;  %6498 = vst [vmem:[#allocation58_spill] sm:$0xff] %v5138_v25  ;;  %v5140_v11 = vld [vmem:[#allocation10 + $0x2a8] sm:$0xff] }
 0x511   :  { %v1515_v37 = vmul.f32 %v3506_v51, %v1514_v33  ;;  %v5090_v33 = vld [vmem:[#allocation10 + $0x348] sm:$0xff]  ;;  %6499 = vst [vmem:[#allocation57_spill] sm:$0xff] %v5140_v11 }
 0x512   :  { %v3508_v40 = vpop.eup %3507  ;;  %v1497_v41 = vadd.f32 %v3504_v39, %v1496_v60 }
 0x513   :  { %v1516_v44 = vadd.f32 %v3506_v51, %v1515_v37  ;;  %v1533_v45 = vmul.f32 %v3508_v40, %v1531_v17  ;;  %v3510_v0 = vpop.eup %3509  ;;  %vm1538_vm0 = vweird.f32 %v3508_v40  ;;  %v5070_v17 = vld [vmem:[#allocation10 + $0x398] sm:$0xff] }
 0x514   :  { %v1501_v58 = vsel %vm1500_vm12, %v3504_v39, %v1497_v41  ;;  %vm1539_vm2 = vmor %vm1537_vm1, %vm1538_vm0  ;;  %v5080_v39 = vld [vmem:[#allocation10 + $0x370] sm:$0xff] }
 0x515   :  { %v1506_v50 = vsel %vm1503_vm14, %v1505_v43, %v1501_v58  ;;  %v1520_v55 = vsel %vm1519_vm13, %v3506_v51, %v1516_v44  ;;  %v1534_v62 = vsub.f32 1.0, %v1533_v45  ;;  %v242_v51 = vadd.f32 %v6494_v63, %v6472_v53  ;;  %v5098_v53 = vld [vmem:[#allocation10 + $0x320] sm:$0xff]  ;;  %v5108_v41 = vld [vmem:[#allocation10 + $0x330] sm:$0xff] }
 0x516   :  { %v1525_v49 = vsel %vm1522_vm15, %v1524_v47, %v1520_v55  ;;  %v1548_v13 = vmul.f32 %v3510_v0, %v1506_v50  ;;  %v5110_v45 = vld [vmem:[#allocation10 + $0x300] sm:$0xff]  ;;  %v5112_v47 = vld [vmem:[#allocation10 + $0x308] sm:$0xff]  ;;  %v5122_v50 = vld [vmem:[#allocation10 + $0x318] sm:$0xff] }
 0x517   :  { %v1547_v21 = vmul.f32 %v1525_v49, %v4965_v54  ;;  %v1535_v48 = vmul.f32 %v3508_v40, %v1534_v62  ;;  %v6484_v54 = vld [vmem:[#allocation79_spill] sm:$0xff]  ;;  %v5120_v0 = vld [vmem:[#allocation10 + $0x2e8] sm:$0xff]  ;;  %v5129_v49 = vld [vmem:[#allocation10 + $0x2f8] sm:$0xff] }
 0x518   :  { %v5118_v58 = vld [vmem:[#allocation10 + $0x2e0] sm:$0xff]  ;;  %v5127_v62 = vld [vmem:[#allocation10 + $0x2c8] sm:$0xff] }
 0x519   :  { %v4997_v59 = vadd.f32 %v1548_v13, %v1547_v21  ;;  %v1536_v57 = vadd.f32 %v3508_v40, %v1535_v48  ;;  %v5125_v55 = vld [vmem:[#allocation10 + $0x2c0] sm:$0xff]  ;;  %v5135_v48 = vld [vmem:[#allocation10 + $0x2d8] sm:$0xff] }
 0x51a   :  { %v6496_v13 = vld [vmem:[#allocation75_spill] sm:$0xff]  ;;  %6497 = vst [vmem:[#allocation56_spill] sm:$0xff] %v5135_v48 }
 0x51b   :  { %3511 = vtanh.f32 %v4997_v59  ;;  %v1540_v12 = vsel %vm1539_vm2, %v3508_v40, %v1536_v57  ;;  %v5100_v40 = vld [vmem:[#allocation10 + $0x328] sm:$0xff]  ;;  %v365_v21 = vadd.f32 %v6496_v13, %v6476_v10  ;;  %v5146_v10 = vld [vmem:[#allocation10 + $0x2b8] sm:$0xff]  ;;  %v5164_v63 = vld [vmem:[#allocation10 + $0x260] sm:$0xff] }
 0x51c   :  { %v1545_v19 = vsel %vm1542_vm3, %v1544_v14, %v1540_v12  ;;  %v5142_v12 = vld [vmem:[#allocation10 + $0x310] sm:$0xff]  ;;  %6500 = vst [vmem:[#allocation59_spill] sm:$0xff] %v5146_v10  ;;  %v5192_v13 = vld [vmem:[#allocation10 + $0x220] sm:$0xff] }
 0x51d   :  { %6505 = vst [vmem:[#allocation30_spill] sm:$0xff] %v5164_v63 }
 0x51e   :  { %6512 = vst [vmem:[#allocation36_spill] sm:$0xff] %v5192_v13 }
 0x521   :  { %v3512_v52 = vpop.eup %3511 }
 0x522   :  { %v1551_v15 = vmul.f32 %v3512_v52, %v1545_v19  ;;  %v5148_v52 = vld [vmem:[#allocation10 + $0x2f0] sm:$0xff]  ;;  %v5152_v19 = vld [vmem:[#allocation10 + $0x280] sm:$0xff] }
 0x523   :  { %6501 = vst [vmem:[#allocation60_spill] sm:$0xff] %v5152_v19 }
 0x524   :  { %1577 = vmatmul.f32.vlgmr.msra.gmra.mxu0 %v1551_v15  ;;  %1597 = vmatmul.f32.vlgmr.msra.gmra.mxu1 %v1551_v15 }
 0x525   :  { %1617 = vmatmul.f32.vlgmr.msra.gmra.mxu2 %v1551_v15  ;;  %1637 = vmatmul.f32.vlgmr.msra.gmra.mxu3 %v1551_v15 }
 0x526   :  { %2058 = vmatpush.msra.mxu0 %v5012_v5  ;;  %2078 = vmatpush.msra.mxu1 %v5014_v3 }
 0x527   :  { %2118 = vmatpush.msra.mxu3 %v5022_v42  ;;  %2098 = vmatpush.msra.mxu2 %v5048_v18 }
 0x528   :  { %2059 = vmatpush.msra.mxu0 %v5016_v24  ;;  %2079 = vmatpush.msra.mxu1 %v5020_v7 }
 0x529   :  { %2119 = vmatpush.msra.mxu3 %v5029_v4  ;;  %2099 = vmatpush.msra.mxu2 %v5051_v8 }
 0x52a   :  { %2060 = vmatpush.msra.mxu0 %v5025_v22  ;;  %2080 = vmatpush.msra.mxu1 %v5027_v1 }
 0x52b   :  { %2100 = vmatpush.msra.mxu2 %v5056_v29 }
 0x52c   :  { %1809 = vmatmul.f32.vlgmr.msrb.gmra.mxu0 %v6484_v54  ;;  %1850 = vmatmul.f32.vlgmr.msrb.gmra.mxu1 %v6484_v54 }
 0x52d   :  { %1891 = vmatmul.f32.vlgmr.msrb.gmra.mxu2 %v6484_v54  ;;  %1932 = vmatmul.f32.vlgmr.msrb.gmra.mxu3 %v6484_v54 }
 0x52e   :  { %2061 = vmatpush.msra.mxu0 %v5058_v32  ;;  %2081 = vmatpush.msra.mxu1 %v5060_v20 }
 0x52f   :  { %2101 = vmatpush.msra.mxu2 %v5072_v27 }
 0x530   :  { %2082 = vmatpush.msra.mxu1 %v5068_v2 }
 0x531   :  { %2102 = vmatpush.msra.mxu2 %v5080_v39 }
 0x532   :  { %2083 = vmatpush.msra.mxu1 %v5090_v33 }
 0x533   :  { %2103 = vmatpush.msra.mxu2 %v5096_v36 }
 0x534   :  { %1812 = vmatmul.f32.gmra.mxu0 %v6485_v16  ;;  %1853 = vmatmul.f32.gmra.mxu1 %v6485_v16 }
 0x535   :  { %1894 = vmatmul.f32.gmra.mxu2 %v6485_v16  ;;  %1935 = vmatmul.f32.gmra.mxu3 %v6485_v16  ;;  %v5158_v16 = vld [vmem:[#allocation10 + $0x298] sm:$0xff] }
 0x536   :  { %2084 = vmatpush.msra.mxu1 %v5100_v40  ;;  %2104 = vmatpush.msra.mxu2 %v5108_v41  ;;  %6503 = vst [vmem:[#allocation64_spill] sm:$0xff] %v5158_v16 }
 0x538   :  { %2085 = vmatpush.msra.mxu1 %v5112_v47  ;;  %2105 = vmatpush.msra.mxu2 %v5142_v12 }
 0x53a   :  { %2086 = vmatpush.msra.mxu1 %v5120_v0  ;;  %2106 = vmatpush.msra.mxu2 %v5148_v52 }
 0x53c   :  { %1815 = vmatmul.f32.gmra.mxu0 %v6486_v6  ;;  %1856 = vmatmul.f32.gmra.mxu1 %v6486_v6 }
 0x53d   :  { %1897 = vmatmul.f32.gmra.mxu2 %v6486_v6  ;;  %1938 = vmatmul.f32.gmra.mxu3 %v6486_v6  ;;  %v5160_v6 = vld [vmem:[#allocation10 + $0x2d0] sm:$0xff] }
 0x53e   :  { %2087 = vmatpush.msra.mxu1 %v5127_v62  ;;  %6504 = vst [vmem:[#allocation28_spill] sm:$0xff] %v5160_v6  ;;  %2107 = vmatpush.msra.mxu2 %v5160_v6 }
 0x540   :  { %2088 = vmatpush.msra.mxu1 %v5140_v11 }
 0x544   :  { %1818 = vmatmul.f32.gmra.mxu0 %v6491_v28  ;;  %1859 = vmatmul.f32.gmra.mxu1 %v6491_v28 }
 0x545   :  { %1900 = vmatmul.f32.gmra.mxu2 %v6491_v28  ;;  %1941 = vmatmul.f32.gmra.mxu3 %v6491_v28 }
 0x54c   :  { %1821 = vmatmul.f32.gmra.mxu0 %v4886_v23  ;;  %1862 = vmatmul.f32.gmra.mxu1 %v4886_v23 }
 0x54d   :  { %1903 = vmatmul.f32.gmra.mxu2 %v4886_v23  ;;  %1944 = vmatmul.f32.gmra.mxu3 %v4886_v23  ;;  %v5054_v23 = vld [vmem:[#allocation10 + $0x3b8] sm:$0xff] }
 0x54e   :  { %6492 = vst [vmem:[#allocation25_spill] sm:$0xff] %v5054_v23  ;;  %2120 = vmatpush.msra.mxu3 %v5054_v23 }
 0x550   :  { %2121 = vmatpush.msra.mxu3 %v5070_v17 }
 0x552   :  { %2122 = vmatpush.msra.mxu3 %v5078_v61 }
 0x554   :  { %1824 = vmatmul.f32.gmra.mxu0 %v4968_v56  ;;  %1865 = vmatmul.f32.gmra.mxu1 %v4968_v56 }
 0x555   :  { %1906 = vmatmul.f32.gmra.mxu2 %v4968_v56  ;;  %1947 = vmatmul.f32.gmra.mxu3 %v4968_v56  ;;  %v5063_v56 = vld [vmem:[#allocation10 + $0x360] sm:$0xff] }
 0x556   :  { %2062 = vmatpush.msra.mxu0 %v5063_v56  ;;  %2123 = vmatpush.msra.mxu3 %v5092_v34 }
 0x558   :  { %2063 = vmatpush.msra.mxu0 %v5088_v31  ;;  %2124 = vmatpush.msra.mxu3 %v5103_v46 }
 0x55a   :  { %2064 = vmatpush.msra.mxu0 %v5098_v53  ;;  %2125 = vmatpush.msra.mxu3 %v5122_v50 }
 0x55c   :  { %1827 = vmatmul.f32.gmra.mxu0 %v1551_v15  ;;  %1868 = vmatmul.f32.gmra.mxu1 %v1551_v15 }
 0x55d   :  { %1909 = vmatmul.f32.gmra.mxu2 %v1551_v15  ;;  %1950 = vmatmul.f32.gmra.mxu3 %v1551_v15  ;;  %v5154_v15 = vld [vmem:[#allocation10 + $0x288] sm:$0xff] }
 0x55e   :  { %2065 = vmatpush.msra.mxu0 %v5110_v45  ;;  %2126 = vmatpush.msra.mxu3 %v5129_v49  ;;  %6502 = vst [vmem:[#allocation61_spill] sm:$0xff] %v5154_v15 }
 0x55f   :  { %2089 = vmatpush.msra.mxu1 %v5154_v15 }
 0x560   :  { %2066 = vmatpush.msra.mxu0 %v5118_v58  ;;  %2127 = vmatpush.msra.mxu3 %v5135_v48 }
 0x562   :  { %2067 = vmatpush.msra.mxu0 %v5125_v55  ;;  %2128 = vmatpush.msra.mxu3 %v5146_v10 }
 0x564   :  { %2068 = vmatpush.msra.mxu0 %v5138_v25  ;;  %2129 = vmatpush.msra.mxu3 %v5158_v16  ;;  %v5216_v16 = vld [vmem:[#allocation10 + $0x218] sm:$0xff] }
 0x565   :  { %6521 = vst [vmem:[#allocation44_spill] sm:$0xff] %v5216_v16 }
 0x566   :  { %2069 = vmatpush.msra.mxu0 %v5152_v19 }
 0x568   :  { %2070 = vmatpush.msra.mxu0 %v5164_v63 }
 0x5a1   :  { %v1578_v35 = vpop.f32.mrf.mxu0  ;;  %v1598_v60 = vpop.f32.mrf.mxu1 }
 0x5a2   :  { %v1641_v37 = vadd.f32 %v1578_v35, %v242_v51  ;;  %v1642_v38 = vadd.f32 %v1598_v60, %v283_v26  ;;  %v5166_v51 = vld [vmem:[#allocation10 + $0x268] sm:$0xff]  ;;  %v5172_v35 = vld [vmem:[#allocation10 + $0x2b0] sm:$0xff]  ;;  %v5174_v60 = vld [vmem:[#allocation10 + $0x278] sm:$0xff] }
 0x5a3   :  { %6506 = vst [vmem:[#allocation29_spill] sm:$0xff] %v5166_v51  ;;  %2090 = vmatpush.msra.mxu1 %v5166_v51  ;;  %2108 = vmatpush.msra.mxu2 %v5172_v35  ;;  %v6518_v51 = vld [vmem:[#allocation77_spill] sm:$0xff] }
 0x5a4   :  { %v3359_v43 = vmul.f32 -1.442695, %v1641_v37  ;;  %v3360_v44 = vmul.f32 -1.442695, %v1642_v38  ;;  %6507 = vst [vmem:[#allocation31_spill] sm:$0xff] %v5172_v35  ;;  %v5180_v38 = vld [vmem:[#allocation10 + $0x240] sm:$0xff]  ;;  %2130 = vmatpush.msra.mxu3 %v5174_v60  ;;  %v324_v63 = vadd.f32 %v6518_v51, %v6478_v9 }
 0x5a5   :  { %6508 = vst [vmem:[#allocation32_spill] sm:$0xff] %v5174_v60  ;;  %2071 = vmatpush.msra.mxu0 %v5180_v38  ;;  %v5224_v9 = vld [vmem:[#allocation10 + $0x230] sm:$0xff] }
 0x5a6   :  { %3513 = vpow2.f32 %v3359_v43  ;;  %6509 = vst [vmem:[#allocation34_spill] sm:$0xff] %v5180_v38  ;;  %v5182_v43 = vld [vmem:[#allocation10 + $0x248] sm:$0xff]  ;;  %v5214_v38 = vld [vmem:[#allocation10 + $0x238] sm:$0xff] }
 0x5a7   :  { %3515 = vpow2.f32 %v3360_v44  ;;  %6510 = vst [vmem:[#allocation33_spill] sm:$0xff] %v5182_v43  ;;  %v5187_v44 = vld [vmem:[#allocation10 + $0x290] sm:$0xff]  ;;  %2091 = vmatpush.msra.mxu1 %v5182_v43  ;;  %2072 = vmatpush.msra.mxu0 %v5192_v13 }
 0x5a8   :  { %v1638_v57 = vpop.f32.mrf.mxu3  ;;  %6511 = vst [vmem:[#allocation35_spill] sm:$0xff] %v5187_v44  ;;  %2109 = vmatpush.msra.mxu2 %v5187_v44  ;;  %v5212_v43 = vld [vmem:[#allocation10 + $0x250] sm:$0xff] }
 0x5a9   :  { %v1644_v14 = vadd.f32 %v1638_v57, %v365_v21  ;;  %v5194_v21 = vld [vmem:[#allocation10 + $0x228] sm:$0xff]  ;;  %v5196_v57 = vld [vmem:[#allocation10 + $0x258] sm:$0xff]  ;;  %6519 = vst [vmem:[#allocation42_spill] sm:$0xff] %v5212_v43 }
 0x5aa   :  { %6513 = vst [vmem:[#allocation38_spill] sm:$0xff] %v5194_v21  ;;  %2131 = vmatpush.msra.mxu3 %v5196_v57  ;;  %2092 = vmatpush.msra.mxu1 %v5194_v21 }
 0x5ab   :  { %v3361_v54 = vmul.f32 -1.442695, %v1644_v14  ;;  %6514 = vst [vmem:[#allocation37_spill] sm:$0xff] %v5196_v57  ;;  %v5200_v14 = vld [vmem:[#allocation10 + $0x270] sm:$0xff] }
 0x5ac   :  { %v3514_v28 = vpop.eup %3513  ;;  %6515 = vst [vmem:[#allocation39_spill] sm:$0xff] %v5200_v14  ;;  %2110 = vmatpush.msra.mxu2 %v5200_v14  ;;  %2132 = vmatpush.msra.mxu3 %v5214_v38 }
 0x5ad   :  { %v3516_v30 = vpop.eup %3515  ;;  %v5168_v26 = vadd.f32 1.0, %v3514_v28  ;;  %3517 = vpow2.f32 %v3361_v54  ;;  %v1618_v54 = vpop.f32.mrf.mxu2  ;;  %v5204_v28 = vld [vmem:[#allocation10 + $0x200] sm:$0xff]  ;;  %6520 = vst [vmem:[#allocation43_spill] sm:$0xff] %v5214_v38  ;;  %v5231_v38 = vld [vmem:[#allocation10 + $0x210] sm:$0xff] }
 0x5ae   :  { %v5176_v37 = vadd.f32 1.0, %v3516_v30  ;;  %6516 = vst [vmem:[#allocation40_spill] sm:$0xff] %v5204_v28  ;;  %v5206_v30 = vld [vmem:[#allocation10 + $0x208] sm:$0xff]  ;;  %v1643_v15 = vadd.f32 %v1618_v54, %v324_v63  ;;  %2073 = vmatpush.msra.mxu0 %v5204_v28  ;;  %2111 = vmatpush.msra.mxu2 %v5212_v43 }
 0x5af   :  { %3519 = vrcp.f32 %v5168_v26  ;;  %6517 = vst [vmem:[#allocation41_spill] sm:$0xff] %v5206_v30  ;;  %2093 = vmatpush.msra.mxu1 %v5206_v30  ;;  %2133 = vmatpush.msra.mxu3 %v5216_v16  ;;  %v1660_v30 = vand.u32 2147483648, %v5168_v26  ;;  %vm1654_vm6 = vweird.f32 %v5168_v26 }
 0x5b0   :  { %3521 = vrcp.f32 %v5176_v37  ;;  %6522 = vst [vmem:[#allocation45_spill] sm:$0xff] %v5224_v9  ;;  %2210 = vmatpush.msrb.mxu0 %v5012_v5  ;;  %2112 = vmatpush.msra.mxu2 %v5224_v9  ;;  %v1679_v16 = vand.u32 2147483648, %v5176_v37  ;;  %v1658_v5 = vand.u32 2147483647, %v5168_v26  ;;  %vm1673_vm7 = vweird.f32 %v5176_v37 }
 0x5b1   :  { %6523 = vst [vmem:[#allocation46_spill] sm:$0xff] %v5231_v38  ;;  %2230 = vmatpush.msrb.mxu1 %v5014_v3  ;;  %2270 = vmatpush.msrb.mxu3 %v5022_v42 }
 0x5b2   :  { %2211 = vmatpush.msrb.mxu0 %v5016_v24  ;;  %2113 = vmatpush.msra.mxu2 %v5231_v38  ;;  %vm1659_vm10 = vcmp.eq.f32.partialorder %v1658_v5, 8.507059e+37 }
 0x5b3   :  { %v3518_v60 = vpop.eup %3517  ;;  %2231 = vmatpush.msrb.mxu1 %v5020_v7  ;;  %2271 = vmatpush.msrb.mxu3 %v5029_v4 }
 0x5b4   :  { %v5218_v44 = vadd.f32 1.0, %v3518_v60  ;;  %2250 = vmatpush.msrb.mxu2 %v5048_v18  ;;  %2212 = vmatpush.msrb.mxu0 %v5025_v22 }
 0x5b5   :  { %v3520_v57 = vpop.eup %3519  ;;  %2232 = vmatpush.msrb.mxu1 %v5027_v1  ;;  %2272 = vmatpush.msrb.mxu3 %v5054_v23 }
 0x5b6   :  { %v3522_v51 = vpop.eup %3521  ;;  %v1650_v21 = vmul.f32 %v3520_v57, %v5168_v26  ;;  %3523 = vrcp.f32 %v5218_v44  ;;  %vm1655_vm4 = vweird.f32 %v3520_v57  ;;  %2251 = vmatpush.msrb.mxu2 %v5051_v8  ;;  %2213 = vmatpush.msrb.mxu0 %v5058_v32  ;;  %v1680_v26 = vor.u32 1.1754944e-38, %v1679_v16 }
 0x5b7   :  { %v1669_v60 = vmul.f32 %v3522_v51, %v5176_v37  ;;  %3525 = vtanh.f32 %v1643_v15  ;;  %vm1674_vm5 = vweird.f32 %v3522_v51  ;;  %vm1656_vm8 = vmor %vm1654_vm6, %vm1655_vm4  ;;  %2233 = vmatpush.msrb.mxu1 %v5060_v20  ;;  %2273 = vmatpush.msrb.mxu3 %v5070_v17  ;;  %vm1693_vm13 = vweird.f32 %v5218_v44 }
 0x5b8   :  { %v1651_v63 = vsub.f32 1.0, %v1650_v21  ;;  %vm1675_vm9 = vmor %vm1673_vm7, %vm1674_vm5  ;;  %2252 = vmatpush.msrb.mxu2 %v5056_v29  ;;  %2214 = vmatpush.msrb.mxu0 %v5063_v56 }
 0x5b9   :  { %v1670_v54 = vsub.f32 1.0, %v1669_v60  ;;  %v1677_v60 = vand.u32 2147483647, %v5176_v37  ;;  %2234 = vmatpush.msrb.mxu1 %v5068_v2  ;;  %2274 = vmatpush.msrb.mxu3 %v5078_v61 }
 0x5ba   :  { %v1652_v28 = vmul.f32 %v3520_v57, %v1651_v63  ;;  %v1661_v63 = vor.u32 1.1754944e-38, %v1660_v30  ;;  %2253 = vmatpush.msrb.mxu2 %v5072_v27  ;;  %2215 = vmatpush.msrb.mxu0 %v5088_v31 }
 0x5bb   :  { %v1671_v21 = vmul.f32 %v3522_v51, %v1670_v54  ;;  %vm1678_vm11 = vcmp.eq.f32.partialorder %v1677_v60, 8.507059e+37  ;;  %2235 = vmatpush.msrb.mxu1 %v5090_v33  ;;  %2275 = vmatpush.msrb.mxu3 %v5092_v34  ;;  %v6524_v60 = vld [vmem:[#allocation61_spill] sm:$0xff] }
 0x5bc   :  { %v5247_v15 = vpop.eup %3523  ;;  %v1653_v7 = vadd.f32 %v3520_v57, %v1652_v28  ;;  %2254 = vmatpush.msrb.mxu2 %v5080_v39  ;;  %2216 = vmatpush.msrb.mxu0 %v5098_v53 }
 0x5bd   :  { %v1672_v54 = vadd.f32 %v3522_v51, %v1671_v21  ;;  %v1689_v4 = vmul.f32 %v5247_v15, %v5218_v44  ;;  %v3526_v37 = vpop.eup %3525  ;;  %vm1694_vm12 = vweird.f32 %v5247_v15  ;;  %2236 = vmatpush.msrb.mxu1 %v5100_v40  ;;  %2276 = vmatpush.msrb.mxu3 %v5103_v46 }
 0x5be   :  { %v1657_v28 = vsel %vm1656_vm8, %v3520_v57, %v1653_v7  ;;  %2255 = vmatpush.msrb.mxu2 %v5096_v36  ;;  %2217 = vmatpush.msrb.mxu0 %v5110_v45  ;;  %vm1695_vm14 = vmor %vm1693_vm13, %vm1694_vm12 }
 0x5bf   :  { %v1662_v23 = vsel %vm1659_vm10, %v1661_v63, %v1657_v28  ;;  %v1676_v30 = vsel %vm1675_vm9, %v3522_v51, %v1672_v54  ;;  %v1690_v21 = vsub.f32 1.0, %v1689_v4  ;;  %2237 = vmatpush.msrb.mxu1 %v5112_v47  ;;  %2277 = vmatpush.msrb.mxu3 %v5122_v50  ;;  %v6526_v63 = vld [vmem:[#allocation35_spill] sm:$0xff]  ;;  %v6527_v54 = vld [vmem:[#allocation30_spill] sm:$0xff]  ;;  %v6529_v28 = vld [vmem:[#allocation32_spill] sm:$0xff] }
 0x5c0   :  { %v1681_v1 = vsel %vm1678_vm11, %v1680_v26, %v1676_v30  ;;  %v1704_v32 = vmul.f32 %v3526_v37, %v1662_v23  ;;  %2256 = vmatpush.msrb.mxu2 %v5108_v41  ;;  %2218 = vmatpush.msrb.mxu0 %v5118_v58  ;;  %v6528_v26 = vld [vmem:[#allocation29_spill] sm:$0xff]  ;;  %v6530_v37 = vld [vmem:[#allocation34_spill] sm:$0xff] }
 0x5c1   :  { %v1703_v5 = vmul.f32 %v1681_v1, %v4997_v59  ;;  %v1691_v7 = vmul.f32 %v5247_v15, %v1690_v21  ;;  %v1699_v59 = vand.u32 2147483648, %v5218_v44  ;;  %v1697_v1 = vand.u32 2147483647, %v5218_v44  ;;  %2238 = vmatpush.msrb.mxu1 %v5120_v0  ;;  %2278 = vmatpush.msrb.mxu3 %v5129_v49  ;;  %v6531_v30 = vld [vmem:[#allocation33_spill] sm:$0xff] }
 0x5c2   :  { %2257 = vmatpush.msrb.mxu2 %v5142_v12  ;;  %2219 = vmatpush.msrb.mxu0 %v5125_v55  ;;  %v6532_v21 = vld [vmem:[#allocation37_spill] sm:$0xff] }
 0x5c3   :  { %v1705_v4 = vadd.f32 %v1704_v32, %v1703_v5  ;;  %v1692_v23 = vadd.f32 %v5247_v15, %v1691_v7  ;;  %v1700_v16 = vor.u32 1.1754944e-38, %v1699_v59  ;;  %vm1698_vm15 = vcmp.eq.f32.partialorder %v1697_v1, 8.507059e+37  ;;  %2239 = vmatpush.msrb.mxu1 %v5127_v62  ;;  %2279 = vmatpush.msrb.mxu3 %v5135_v48  ;;  %v6534_v7 = vld [vmem:[#allocation38_spill] sm:$0xff]  ;;  %v6537_v59 = vld [vmem:[#allocation41_spill] sm:$0xff]  ;;  %v6538_v1 = vld [vmem:[#allocation44_spill] sm:$0xff] }
 0x5c4   :  { %2258 = vmatpush.msrb.mxu2 %v5148_v52  ;;  %2220 = vmatpush.msrb.mxu0 %v5138_v25  ;;  %v6533_v5 = vmov 0.0  }
 0x5c5   :  { %3527 = vtanh.f32 %v1705_v4  ;;  %v1696_v32 = vsel %vm1695_vm14, %v5247_v15, %v1692_v23  ;;  %2240 = vmatpush.msrb.mxu1 %v5140_v11  ;;  %2280 = vmatpush.msrb.mxu3 %v5146_v10  ;;  %v6525_v15 = vld [vmem:[#allocation64_spill] sm:$0xff]  ;;  %v6535_v4 = vld [vmem:[#allocation43_spill] sm:$0xff] }
 0x5c6   :  { %v1701_v57 = vsel %vm1698_vm15, %v1700_v16, %v1696_v32  ;;  %2259 = vmatpush.msrb.mxu2 %v5160_v6  ;;  %2221 = vmatpush.msrb.mxu0 %v5152_v19  ;;  %v6536_v23 = vld [vmem:[#allocation40_spill] sm:$0xff]  ;;  %v6539_v32 = vld [vmem:[#allocation21_spill] sm:$0xff]  ;;  %v6540_v16 = vld [vmem:[#allocation23_spill] sm:$0xff] }
 0x5c7   :  { %2241 = vmatpush.msrb.mxu1 %v6524_v60  ;;  %2281 = vmatpush.msrb.mxu3 %v6525_v15 }
 0x5c8   :  { %2260 = vmatpush.msrb.mxu2 %v5172_v35  ;;  %2222 = vmatpush.msrb.mxu0 %v6527_v54 }
 0x5c9   :  { %2242 = vmatpush.msrb.mxu1 %v6528_v26  ;;  %2282 = vmatpush.msrb.mxu3 %v6529_v28 }
 0x5ca   :  { %2261 = vmatpush.msrb.mxu2 %v6526_v63  ;;  %2223 = vmatpush.msrb.mxu0 %v6530_v37 }
 0x5cb   :  { %v3528_v44 = vpop.eup %3527  ;;  %2243 = vmatpush.msrb.mxu1 %v6531_v30  ;;  %2283 = vmatpush.msrb.mxu3 %v6532_v21 }
 0x5cc   :  { %v1707_v51 = vmul.f32 %v3528_v44, %v1701_v57  ;;  %2262 = vmatpush.msrb.mxu2 %v5200_v14  ;;  %2224 = vmatpush.msrb.mxu0 %v5192_v13  ;;  %v6541_v44 = vld [vmem:[#allocation26_spill] sm:$0xff]  ;;  %v6542_v57 = vld [vmem:[#allocation24_spill] sm:$0xff] }
 0x5cd   :  { %2244 = vmatpush.msrb.mxu1 %v6534_v7  ;;  %2284 = vmatpush.msrb.mxu3 %v6535_v4 }
 0x5ce   :  { %1830 = vmatmul.f32.gmra.mxu0 %v1707_v51  ;;  %1871 = vmatmul.f32.gmra.mxu1 %v1707_v51 }
 0x5cf   :  { %1912 = vmatmul.f32.gmra.mxu2 %v1707_v51  ;;  %1953 = vmatmul.f32.gmra.mxu3 %v1707_v51  ;;  %v6543_v51 = vld [vmem:[#allocation25_spill] sm:$0xff] }
 0x5d0   :  { %2263 = vmatpush.msrb.mxu2 %v5212_v43  ;;  %2225 = vmatpush.msrb.mxu0 %v6536_v23 }
 0x5d1   :  { %2245 = vmatpush.msrb.mxu1 %v6537_v59  ;;  %2285 = vmatpush.msrb.mxu3 %v6538_v1 }
 0x5d2   :  { %2264 = vmatpush.msrb.mxu2 %v5224_v9 }
 0x5d4   :  { %2265 = vmatpush.msrb.mxu2 %v5231_v38 }
 0x5d6   :  { %2074 = vmatmul.f32.vlgmr.msra.gmra.mxu0 %v6533_v5  ;;  %2094 = vmatmul.f32.vlgmr.msra.gmra.mxu1 %v6533_v5 }
 0x5d7   :  { %2114 = vmatmul.f32.vlgmr.msra.gmra.mxu2 %v6533_v5  ;;  %2134 = vmatmul.f32.vlgmr.msra.gmra.mxu3 %v6533_v5  ;;  %v6544_v5 = vld [vmem:[#allocation55_spill] sm:$0xff] }
 0x5d8   :  { %2362 = vmatpush.msra.mxu0 %v6539_v32  ;;  %2382 = vmatpush.msra.mxu1 %v5014_v3 }
 0x5d9   :  { %2402 = vmatpush.msra.mxu2 %v5048_v18  ;;  %2422 = vmatpush.msra.mxu3 %v5022_v42 }
 0x5da   :  { %2363 = vmatpush.msra.mxu0 %v5016_v24  ;;  %2383 = vmatpush.msra.mxu1 %v6540_v16 }
 0x5db   :  { %2403 = vmatpush.msra.mxu2 %v5051_v8  ;;  %2423 = vmatpush.msra.mxu3 %v6541_v44 }
 0x5dc   :  { %2364 = vmatpush.msra.mxu0 %v5025_v22  ;;  %2384 = vmatpush.msra.mxu1 %v6542_v57 }
 0x5dd   :  { %2404 = vmatpush.msra.mxu2 %v5056_v29  ;;  %2424 = vmatpush.msra.mxu3 %v6543_v51 }
 0x5de   :  { %2365 = vmatpush.msra.mxu0 %v6544_v5  ;;  %2385 = vmatpush.msra.mxu1 %v5060_v20 }
 0x5df   :  { %2405 = vmatpush.msra.mxu2 %v5072_v27  ;;  %2425 = vmatpush.msra.mxu3 %v5070_v17 }
 0x5e0   :  { %2366 = vmatpush.msra.mxu0 %v5063_v56  ;;  %2386 = vmatpush.msra.mxu1 %v5068_v2 }
 0x5e1   :  { %2406 = vmatpush.msra.mxu2 %v5080_v39  ;;  %2426 = vmatpush.msra.mxu3 %v5078_v61 }
 0x5e2   :  { %2367 = vmatpush.msra.mxu0 %v5088_v31  ;;  %2387 = vmatpush.msra.mxu1 %v5090_v33 }
 0x5e3   :  { %2407 = vmatpush.msra.mxu2 %v5096_v36  ;;  %2427 = vmatpush.msra.mxu3 %v5092_v34 }
 0x5e4   :  { %2368 = vmatpush.msra.mxu0 %v5098_v53  ;;  %2388 = vmatpush.msra.mxu1 %v5100_v40 }
 0x5e5   :  { %2408 = vmatpush.msra.mxu2 %v5108_v41  ;;  %2428 = vmatpush.msra.mxu3 %v5103_v46 }
 0x5e6   :  { %2369 = vmatpush.msra.mxu0 %v5110_v45  ;;  %2389 = vmatpush.msra.mxu1 %v5112_v47 }
 0x5e7   :  { %2409 = vmatpush.msra.mxu2 %v5142_v12  ;;  %2429 = vmatpush.msra.mxu3 %v5122_v50 }
 0x5e8   :  { %2370 = vmatpush.msra.mxu0 %v5118_v58  ;;  %2390 = vmatpush.msra.mxu1 %v5120_v0 }
 0x5e9   :  { %2410 = vmatpush.msra.mxu2 %v5148_v52  ;;  %2430 = vmatpush.msra.mxu3 %v5129_v49 }
 0x5ea   :  { %2371 = vmatpush.msra.mxu0 %v5125_v55  ;;  %2391 = vmatpush.msra.mxu1 %v5127_v62 }
 0x5eb   :  { %2411 = vmatpush.msra.mxu2 %v5160_v6  ;;  %2431 = vmatpush.msra.mxu3 %v5135_v48 }
 0x5ec   :  { %2372 = vmatpush.msra.mxu0 %v5138_v25  ;;  %2392 = vmatpush.msra.mxu1 %v5140_v11 }
 0x5ed   :  { %2412 = vmatpush.msra.mxu2 %v5172_v35  ;;  %2432 = vmatpush.msra.mxu3 %v5146_v10 }
 0x5ee   :  { %2373 = vmatpush.msra.mxu0 %v5152_v19  ;;  %2393 = vmatpush.msra.mxu1 %v6524_v60 }
 0x5ef   :  { %2413 = vmatpush.msra.mxu2 %v6526_v63  ;;  %2433 = vmatpush.msra.mxu3 %v6525_v15 }
 0x5f0   :  { %2374 = vmatpush.msra.mxu0 %v6527_v54  ;;  %2394 = vmatpush.msra.mxu1 %v6528_v26 }
 0x5f1   :  { %2414 = vmatpush.msra.mxu2 %v5200_v14  ;;  %2434 = vmatpush.msra.mxu3 %v6529_v28 }
 0x5f2   :  { %2375 = vmatpush.msra.mxu0 %v6530_v37  ;;  %2395 = vmatpush.msra.mxu1 %v6531_v30  ;;  %v1810_v30 = vpop.f32.mrf.mxu0  ;;  %v1933_v37 = vpop.f32.mrf.mxu3 }
 0x5f3   :  { %2415 = vmatpush.msra.mxu2 %v5212_v43  ;;  %2435 = vmatpush.msra.mxu3 %v6532_v21  ;;  %v1851_v43 = vpop.f32.mrf.mxu1 }
 0x5f4   :  { %2376 = vmatpush.msra.mxu0 %v5192_v13  ;;  %2396 = vmatpush.msra.mxu1 %v6534_v7  ;;  %v1892_v7 = vpop.f32.mrf.mxu2 }
 0x5f5   :  { %2416 = vmatpush.msra.mxu2 %v5224_v9  ;;  %2436 = vmatpush.msra.mxu3 %v6535_v4 }
 0x5f6   :  { %2377 = vmatpush.msra.mxu0 %v6536_v23  ;;  %2397 = vmatpush.msra.mxu1 %v6537_v59 }
 0x5f7   :  { %2417 = vmatpush.msra.mxu2 %v5231_v38  ;;  %2437 = vmatpush.msra.mxu3 %v6538_v1 }
 0x5fa   :  { %v5387_v21 = vpop.f32.mrf.mxu0  ;;  %v5391_v28 = vpop.f32.mrf.mxu3 }
 0x5fb   :  { %6545 = vst [vmem:[#allocation47_spill] sm:$0xff] %v5387_v21  ;;  %v5389_v13 = vpop.f32.mrf.mxu1 }
 0x5fc   :  { %6546 = vst [vmem:[#allocation48_spill] sm:$0xff] %v5389_v13  ;;  %v5397_v23 = vpop.f32.mrf.mxu2 }
 0x5fd   :  { %6547 = vst [vmem:[#allocation50_spill] sm:$0xff] %v5391_v28 }
 0x5fe   :  { %6550 = vst [vmem:[#allocation52_spill] sm:$0xff] %v5397_v23 }
 0x602   :  { %v5393_v9 = vpop.f32.mrf.mxu0  ;;  %v5399_v59 = vpop.f32.mrf.mxu3 }
 0x603   :  { %6548 = vst [vmem:[#allocation49_spill] sm:$0xff] %v5393_v9  ;;  %v5395_v4 = vpop.f32.mrf.mxu1 }
 0x604   :  { %6549 = vst [vmem:[#allocation51_spill] sm:$0xff] %v5395_v4  ;;  %v5405_v14 = vpop.f32.mrf.mxu2 }
 0x605   :  { %6551 = vst [vmem:[#allocation54_spill] sm:$0xff] %v5399_v59 }
 0x606   :  { %6554 = vst [vmem:[#allocation73_spill] sm:$0xff] %v5405_v14 }
 0x60a   :  { %v5401_v38 = vpop.f32.mrf.mxu0  ;;  %v5407_v21 = vpop.f32.mrf.mxu3 }
 0x60b   :  { %6552 = vst [vmem:[#allocation72_spill] sm:$0xff] %v5401_v38  ;;  %v5403_v1 = vpop.f32.mrf.mxu1 }
 0x60c   :  { %6553 = vst [vmem:[#allocation62_spill] sm:$0xff] %v5403_v1  ;;  %v5413_v28 = vpop.f32.mrf.mxu2 }
 0x60d   :  { %6555 = vst [vmem:[#allocation63_spill] sm:$0xff] %v5407_v21 }
 0x60e   :  { %6558 = vst [vmem:[#allocation78_spill] sm:$0xff] %v5413_v28 }
 0x612   :  { %v5409_v13 = vpop.f32.mrf.mxu0  ;;  %v5415_v9 = vpop.f32.mrf.mxu3 }
 0x613   :  { %6556 = vst [vmem:[#allocation76_spill] sm:$0xff] %v5409_v13  ;;  %v5411_v26 = vpop.f32.mrf.mxu1 }
 0x614   :  { %6557 = vst [vmem:[#allocation65_spill] sm:$0xff] %v5411_v26  ;;  %v5421_v59 = vpop.f32.mrf.mxu2  ;;  %v1783_v26 = vld [vmem:[#allocation12 + $0x4] sm:$0xf] }
 0x615   :  { %6559 = vst [vmem:[#allocation68_spill] sm:$0xff] %v5415_v9  ;;  %v5447_v63 = vperm.slane %v1783_v26, 3 }
 0x616   :  { %6562 = vst [vmem:[#allocation69_spill] sm:$0xff] %v5421_v59 }
 0x617   :  { %6574 = vst [vmem:[#allocation26_spill] sm:$0xff] %v5447_v63  ;;  %v1934_v60 = vadd.f32 %v1933_v37, %v5447_v63 }
 0x61a   :  { %v5417_v4 = vpop.f32.mrf.mxu0  ;;  %v5423_v38 = vpop.f32.mrf.mxu3 }
 0x61b   :  { %6560 = vst [vmem:[#allocation66_spill] sm:$0xff] %v5417_v4  ;;  %v5419_v23 = vpop.f32.mrf.mxu1  ;;  %v5437_v4 = vperm.slane %v1783_v26, 0 }
 0x61c   :  { %6561 = vst [vmem:[#allocation67_spill] sm:$0xff] %v5419_v23  ;;  %v5429_v21 = vpop.f32.mrf.mxu2  ;;  %v5439_v23 = vperm.slane %v1783_v26, 1 }
 0x61d   :  { %6563 = vst [vmem:[#allocation74_spill] sm:$0xff] %v5423_v38  ;;  %v1811_v59 = vadd.f32 %v1810_v30, %v5437_v4 }
 0x61e   :  { %6566 = vst [vmem:[#allocation27_spill] sm:$0xff] %v5429_v21  ;;  %v1852_v38 = vadd.f32 %v1851_v43, %v5439_v23 }
 0x61f   :  { %6570 = vst [vmem:[#allocation75_spill] sm:$0xff] %v5437_v4 }
 0x620   :  { %6571 = vst [vmem:[#allocation77_spill] sm:$0xff] %v5439_v23 }
 0x622   :  { %v5425_v1 = vpop.f32.mrf.mxu0  ;;  %v5431_v13 = vpop.f32.mrf.mxu3 }
 0x623   :  { %6564 = vst [vmem:[#allocation79_spill] sm:$0xff] %v5425_v1  ;;  %v5427_v14 = vpop.f32.mrf.mxu1 }
 0x624   :  { %6565 = vst [vmem:[#allocation22_spill] sm:$0xff] %v5427_v14  ;;  %v5443_v1 = vpop.f32.mrf.mxu2 }
 0x625   :  { %6567 = vst [vmem:[#allocation53_spill] sm:$0xff] %v5431_v13 }
 0x626   :  { %6572 = vst [vmem:[#allocation21_spill] sm:$0xff] %v5443_v1 }
 0x64b   :  { %v5433_v28 = vpop.f32.mrf.mxu0  ;;  %v5435_v9 = vpop.f32.mrf.mxu1 }
 0x64c   :  { %6568 = vst [vmem:[#allocation70_spill] sm:$0xff] %v5433_v28 }
 0x64d   :  { %6569 = vst [vmem:[#allocation71_spill] sm:$0xff] %v5435_v9 }
 0x652   :  { %v5445_v14 = vpop.f32.mrf.mxu3  ;;  %v5450_v19 = vpop.f32.mrf.mxu2 }
 0x653   :  { %6573 = vst [vmem:[#allocation23_spill] sm:$0xff] %v5445_v14  ;;  %v2075_v21 = vpop.f32.mrf.mxu0  ;;  %v2095_v54 = vpop.f32.mrf.mxu1 }
 0x654   :  { %v2138_v13 = vadd.f32 %v2075_v21, %v1811_v59  ;;  %v2139_v15 = vadd.f32 %v2095_v54, %v1852_v38  ;;  %6575 = vst [vmem:[#allocation24_spill] sm:$0xff] %v5450_v19  ;;  %v5452_v21 = vperm.slane %v1783_v26, 2 }
 0x656   :  { %v3362_v28 = vmul.f32 -1.442695, %v2138_v13  ;;  %v3363_v9 = vmul.f32 -1.442695, %v2139_v15  ;;  %6576 = vst [vmem:[#allocation25_spill] sm:$0xff] %v5452_v21  ;;  %v1893_v15 = vadd.f32 %v1892_v7, %v5452_v21 }
 0x658   :  { %3529 = vpow2.f32 %v3362_v28 }
 0x659   :  { %3531 = vpow2.f32 %v3363_v9 }
 0x65a   :  { %v2135_v30 = vpop.f32.mrf.mxu3  ;;  %v2115_v38 = vpop.f32.mrf.mxu2 }
 0x65b   :  { %v2141_v43 = vadd.f32 %v2135_v30, %v1934_v60  ;;  %v2140_v28 = vadd.f32 %v2115_v38, %v1893_v15 }
 0x65d   :  { %v3364_v23 = vmul.f32 -1.442695, %v2141_v43 }
 0x65e   :  { %v3530_v1 = vpop.eup %3529 }
 0x65f   :  { %v3532_v4 = vpop.eup %3531  ;;  %v2145_v14 = vadd.f32 1.0, %v3530_v1  ;;  %3533 = vpow2.f32 %v3364_v23 }
 0x660   :  { %v2164_v10 = vadd.f32 1.0, %v3532_v4 }
 0x661   :  { %3535 = vrcp.f32 %v2145_v14  ;;  %v2157_v1 = vand.u32 2147483648, %v2145_v14  ;;  %v2155_v23 = vand.u32 2147483647, %v2145_v14  ;;  %vm2151_vm2 = vweird.f32 %v2145_v14 }
 0x662   :  { %3537 = vrcp.f32 %v2164_v10  ;;  %v2176_v4 = vand.u32 2147483648, %v2164_v10  ;;  %v2174_v63 = vand.u32 2147483647, %v2164_v10  ;;  %vm2170_vm3 = vweird.f32 %v2164_v10 }
 0x663   :  { %v2158_v38 = vor.u32 1.1754944e-38, %v2157_v1  ;;  %vm2156_vm5 = vcmp.eq.f32.partialorder %v2155_v23, 8.507059e+37 }
 0x664   :  { %v2177_v21 = vor.u32 1.1754944e-38, %v2176_v4  ;;  %vm2175_vm7 = vcmp.eq.f32.partialorder %v2174_v63, 8.507059e+37 }
 0x665   :  { %v3534_v13 = vpop.eup %3533 }
 0x666   :  { %v2184_v54 = vadd.f32 1.0, %v3534_v13 }
 0x667   :  { %v3536_v9 = vpop.eup %3535 }
 0x668   :  { %v3538_v37 = vpop.eup %3537  ;;  %v2147_v59 = vmul.f32 %v3536_v9, %v2145_v14  ;;  %3539 = vrcp.f32 %v2184_v54  ;;  %vm2152_vm0 = vweird.f32 %v3536_v9  ;;  %vm2190_vm9 = vweird.f32 %v2184_v54 }
 0x669   :  { %v2166_v60 = vmul.f32 %v3538_v37, %v2164_v10  ;;  %3541 = vtanh.f32 %v2140_v28  ;;  %vm2171_vm1 = vweird.f32 %v3538_v37  ;;  %vm2153_vm4 = vmor %vm2151_vm2, %vm2152_vm0  ;;  %v2194_v14 = vand.u32 2147483647, %v2184_v54 }
 0x66a   :  { %v2148_v30 = vsub.f32 1.0, %v2147_v59  ;;  %vm2172_vm6 = vmor %vm2170_vm3, %vm2171_vm1 }
 0x66b   :  { %v2167_v43 = vsub.f32 1.0, %v2166_v60  ;;  %vm2195_vm11 = vcmp.eq.f32.partialorder %v2194_v14, 8.507059e+37 }
 0x66c   :  { %v2149_v26 = vmul.f32 %v3536_v9, %v2148_v30 }
 0x66d   :  { %v2168_v19 = vmul.f32 %v3538_v37, %v2167_v43 }
 0x66e   :  { %v3540_v35 = vpop.eup %3539  ;;  %v2150_v7 = vadd.f32 %v3536_v9, %v2149_v26 }
 0x66f   :  { %v2169_v13 = vadd.f32 %v3538_v37, %v2168_v19  ;;  %v2186_v15 = vmul.f32 %v3540_v35, %v2184_v54  ;;  %v3542_v28 = vpop.eup %3541  ;;  %vm2191_vm8 = vweird.f32 %v3540_v35  ;;  %v2196_v19 = vand.u32 2147483648, %v2184_v54 }
 0x670   :  { %v2154_v59 = vsel %vm2153_vm4, %v3536_v9, %v2150_v7  ;;  %vm2192_vm10 = vmor %vm2190_vm9, %vm2191_vm8 }
 0x671   :  { %v2159_v60 = vsel %vm2156_vm5, %v2158_v38, %v2154_v59  ;;  %v2173_v30 = vsel %vm2172_vm6, %v3538_v37, %v2169_v13  ;;  %v2187_v11 = vsub.f32 1.0, %v2186_v15  ;;  %v2197_v1 = vor.u32 1.1754944e-38, %v2196_v19  ;;  %v6609_v59 = vld [vmem:[#allocation25_spill] sm:$0xff] }
 0x672   :  { %v2178_v43 = vsel %vm2175_vm7, %v2177_v21, %v2173_v30  ;;  %v2201_v25 = vmul.f32 %v3542_v28, %v2159_v60  ;;  %v6610_v28 = vld [vmem:[#allocation52_spill] sm:$0xff] }
 0x673   :  { %v2200_v48 = vmul.f32 0.0, %v2178_v43  ;;  %v2188_v6 = vmul.f32 %v3540_v35, %v2187_v11  ;;  %v1896_v60 = vadd.f32 %v6610_v28, %v6609_v59  ;;  %v5591_v28 = vld [vmem:[#allocation10 + $0x378] sm:$0xff] }
 0x675   :  { %v5455_v26 = vadd.f32 %v2201_v25, %v2200_v48  ;;  %v2189_v10 = vadd.f32 %v3540_v35, %v2188_v6  ;;  %v6606_v48 = vld [vmem:[#allocation48_spill] sm:$0xff] }
 0x677   :  { %3543 = vtanh.f32 %v5455_v26  ;;  %v2193_v9 = vsel %vm2192_vm10, %v3540_v35, %v2189_v10 }
 0x678   :  { %v2198_v63 = vsel %vm2195_vm11, %v2197_v1, %v2193_v9 }
 0x67d   :  { %v3544_v37 = vpop.eup %3543 }
 0x67e   :  { %v2204_v4 = vmul.f32 %v3544_v37, %v2198_v63 }
 0x680   :  { %2226 = vmatmul.f32.vlgmr.msrb.gmra.mxu0 %v2204_v4  ;;  %2246 = vmatmul.f32.vlgmr.msrb.gmra.mxu1 %v2204_v4 }
 0x681   :  { %2266 = vmatmul.f32.vlgmr.msrb.gmra.mxu2 %v2204_v4  ;;  %2286 = vmatmul.f32.vlgmr.msrb.gmra.mxu3 %v2204_v4 }
 0x682   :  { %2514 = vmatpush.msrb.mxu0 %v6539_v32  ;;  %2534 = vmatpush.msrb.mxu1 %v5014_v3  ;;  %v6577_v3 = vld [vmem:[#allocation28_spill] sm:$0xff] }
 0x683   :  { %2554 = vmatpush.msrb.mxu2 %v5048_v18  ;;  %2574 = vmatpush.msrb.mxu3 %v5022_v42  ;;  %v6579_v42 = vld [vmem:[#allocation58_spill] sm:$0xff]  ;;  %v6581_v18 = vld [vmem:[#allocation31_spill] sm:$0xff] }
 0x684   :  { %2515 = vmatpush.msrb.mxu0 %v5016_v24  ;;  %2535 = vmatpush.msrb.mxu1 %v6540_v16  ;;  %v6578_v24 = vld [vmem:[#allocation56_spill] sm:$0xff]  ;;  %v6607_v16 = vld [vmem:[#allocation26_spill] sm:$0xff] }
 0x685   :  { %2555 = vmatpush.msrb.mxu2 %v5051_v8  ;;  %2575 = vmatpush.msrb.mxu3 %v6541_v44  ;;  %v6582_v8 = vld [vmem:[#allocation59_spill] sm:$0xff]  ;;  %v6608_v44 = vld [vmem:[#allocation50_spill] sm:$0xff] }
 0x686   :  { %2516 = vmatpush.msrb.mxu0 %v5025_v22  ;;  %2536 = vmatpush.msrb.mxu1 %v6542_v57  ;;  %v6580_v22 = vld [vmem:[#allocation57_spill] sm:$0xff]  ;;  %v1937_v57 = vadd.f32 %v6608_v44, %v6607_v16  ;;  %v5558_v44 = vld [vmem:[#allocation10 + $0x3a0] sm:$0xff] }
 0x687   :  { %2556 = vmatpush.msrb.mxu2 %v5056_v29  ;;  %2576 = vmatpush.msrb.mxu3 %v6543_v51  ;;  %v6583_v29 = vld [vmem:[#allocation60_spill] sm:$0xff] }
 0x688   :  { %2517 = vmatpush.msrb.mxu0 %v6544_v5  ;;  %2537 = vmatpush.msrb.mxu1 %v5060_v20  ;;  %v6584_v20 = vld [vmem:[#allocation61_spill] sm:$0xff] }
 0x689   :  { %2557 = vmatpush.msrb.mxu2 %v5072_v27  ;;  %2577 = vmatpush.msrb.mxu3 %v5070_v17  ;;  %v6587_v17 = vld [vmem:[#allocation30_spill] sm:$0xff]  ;;  %v6588_v27 = vld [vmem:[#allocation29_spill] sm:$0xff] }
 0x68a   :  { %2518 = vmatpush.msrb.mxu0 %v5063_v56  ;;  %2538 = vmatpush.msrb.mxu1 %v5068_v2  ;;  %v6585_v56 = vld [vmem:[#allocation35_spill] sm:$0xff]  ;;  %v6586_v2 = vld [vmem:[#allocation64_spill] sm:$0xff] }
 0x68b   :  { %2558 = vmatpush.msrb.mxu2 %v5080_v39  ;;  %2578 = vmatpush.msrb.mxu3 %v5078_v61  ;;  %v6589_v61 = vld [vmem:[#allocation39_spill] sm:$0xff]  ;;  %v6590_v39 = vld [vmem:[#allocation32_spill] sm:$0xff] }
 0x68c   :  { %2519 = vmatpush.msrb.mxu0 %v5088_v31  ;;  %2539 = vmatpush.msrb.mxu1 %v5090_v33  ;;  %v6591_v31 = vld [vmem:[#allocation34_spill] sm:$0xff]  ;;  %v6592_v33 = vld [vmem:[#allocation33_spill] sm:$0xff] }
 0x68d   :  { %2559 = vmatpush.msrb.mxu2 %v5096_v36  ;;  %2579 = vmatpush.msrb.mxu3 %v5092_v34  ;;  %v6593_v34 = vld [vmem:[#allocation42_spill] sm:$0xff]  ;;  %v6594_v36 = vld [vmem:[#allocation37_spill] sm:$0xff] }
 0x68e   :  { %2520 = vmatpush.msrb.mxu0 %v5098_v53  ;;  %2540 = vmatpush.msrb.mxu1 %v5100_v40  ;;  %v6595_v53 = vld [vmem:[#allocation36_spill] sm:$0xff]  ;;  %v6596_v40 = vld [vmem:[#allocation38_spill] sm:$0xff] }
 0x68f   :  { %2560 = vmatpush.msrb.mxu2 %v5108_v41  ;;  %2580 = vmatpush.msrb.mxu3 %v5103_v46  ;;  %v6597_v46 = vld [vmem:[#allocation45_spill] sm:$0xff]  ;;  %v6598_v41 = vld [vmem:[#allocation43_spill] sm:$0xff] }
 0x690   :  { %2521 = vmatpush.msrb.mxu0 %v5110_v45  ;;  %2541 = vmatpush.msrb.mxu1 %v5112_v47  ;;  %v6599_v45 = vld [vmem:[#allocation40_spill] sm:$0xff]  ;;  %v6600_v47 = vld [vmem:[#allocation41_spill] sm:$0xff] }
 0x691   :  { %2561 = vmatpush.msrb.mxu2 %v5142_v12  ;;  %2581 = vmatpush.msrb.mxu3 %v5122_v50  ;;  %v6603_v50 = vld [vmem:[#allocation75_spill] sm:$0xff] }
 0x692   :  { %2522 = vmatpush.msrb.mxu0 %v5118_v58  ;;  %2542 = vmatpush.msrb.mxu1 %v5120_v0  ;;  %v6601_v58 = vld [vmem:[#allocation46_spill] sm:$0xff]  ;;  %v6602_v0 = vld [vmem:[#allocation44_spill] sm:$0xff] }
 0x693   :  { %2562 = vmatpush.msrb.mxu2 %v5148_v52  ;;  %2582 = vmatpush.msrb.mxu3 %v5129_v49  ;;  %v6605_v49 = vld [vmem:[#allocation77_spill] sm:$0xff] }
 0x694   :  { %2523 = vmatpush.msrb.mxu0 %v5125_v55  ;;  %2543 = vmatpush.msrb.mxu1 %v5127_v62  ;;  %v6604_v55 = vld [vmem:[#allocation47_spill] sm:$0xff]  ;;  %v1855_v25 = vadd.f32 %v6606_v48, %v6605_v49 }
 0x695   :  { %2563 = vmatpush.msrb.mxu2 %v6577_v3  ;;  %2583 = vmatpush.msrb.mxu3 %v6578_v24  ;;  %v1814_v62 = vadd.f32 %v6604_v55, %v6603_v50 }
 0x696   :  { %2524 = vmatpush.msrb.mxu0 %v6579_v42  ;;  %2544 = vmatpush.msrb.mxu1 %v6580_v22 }
 0x697   :  { %2564 = vmatpush.msrb.mxu2 %v6581_v18  ;;  %2584 = vmatpush.msrb.mxu3 %v6582_v8 }
 0x698   :  { %2525 = vmatpush.msrb.mxu0 %v6583_v29  ;;  %2545 = vmatpush.msrb.mxu1 %v6584_v20 }
 0x699   :  { %2565 = vmatpush.msrb.mxu2 %v6585_v56  ;;  %2585 = vmatpush.msrb.mxu3 %v6586_v2 }
 0x69a   :  { %2526 = vmatpush.msrb.mxu0 %v6587_v17  ;;  %2546 = vmatpush.msrb.mxu1 %v6588_v27 }
 0x69b   :  { %2566 = vmatpush.msrb.mxu2 %v6589_v61  ;;  %2586 = vmatpush.msrb.mxu3 %v6590_v39 }
 0x69c   :  { %2527 = vmatpush.msrb.mxu0 %v6591_v31  ;;  %2547 = vmatpush.msrb.mxu1 %v6592_v33 }
 0x69d   :  { %2567 = vmatpush.msrb.mxu2 %v6593_v34  ;;  %2587 = vmatpush.msrb.mxu3 %v6594_v36 }
 0x69e   :  { %2528 = vmatpush.msrb.mxu0 %v6595_v53  ;;  %2548 = vmatpush.msrb.mxu1 %v6596_v40 }
 0x69f   :  { %2568 = vmatpush.msrb.mxu2 %v6597_v46  ;;  %2588 = vmatpush.msrb.mxu3 %v6598_v41 }
 0x6a0   :  { %2529 = vmatpush.msrb.mxu0 %v6599_v45  ;;  %2549 = vmatpush.msrb.mxu1 %v6600_v47 }
 0x6a1   :  { %2569 = vmatpush.msrb.mxu2 %v6601_v58  ;;  %2589 = vmatpush.msrb.mxu3 %v6602_v0 }
 0x6fd   :  { %v2227_v11 = vpop.f32.mrf.mxu0  ;;  %v2247_v12 = vpop.f32.mrf.mxu1 }
 0x6fe   :  { %v2290_v52 = vadd.f32 %v2227_v11, %v1814_v62  ;;  %v2291_v6 = vadd.f32 %v2247_v12, %v1855_v25  ;;  %v5537_v25 = vld [vmem:[#allocation10 + $0x3e8] sm:$0xff]  ;;  %v5540_v11 = vld [vmem:[#allocation10 + $0x3f0] sm:$0xff]  ;;  %v5543_v12 = vld [vmem:[#allocation10 + $0x3f8] sm:$0xff] }
 0x700   :  { %v3365_v35 = vmul.f32 -1.442695, %v2290_v52  ;;  %v3366_v32 = vmul.f32 -1.442695, %v2291_v6  ;;  %v5546_v52 = vld [vmem:[#allocation10 + $0x3c0] sm:$0xff]  ;;  %v5549_v6 = vld [vmem:[#allocation10 + $0x3c8] sm:$0xff] }
 0x702   :  { %3545 = vpow2.f32 %v3365_v35  ;;  %v5552_v35 = vld [vmem:[#allocation10 + $0x3d0] sm:$0xff] }
 0x703   :  { %3547 = vpow2.f32 %v3366_v32  ;;  %v5555_v32 = vld [vmem:[#allocation10 + $0x3d8] sm:$0xff] }
 0x704   :  { %v2287_v51 = vpop.f32.mrf.mxu3  ;;  %v2267_v13 = vpop.f32.mrf.mxu2 }
 0x705   :  { %v2293_v5 = vadd.f32 %v2287_v51, %v1937_v57  ;;  %v2292_v10 = vadd.f32 %v2267_v13, %v1896_v60  ;;  %v5561_v57 = vld [vmem:[#allocation10 + $0x3a8] sm:$0xff]  ;;  %v5564_v51 = vld [vmem:[#allocation10 + $0x3b0] sm:$0xff]  ;;  %v5594_v60 = vld [vmem:[#allocation10 + $0x340] sm:$0xff] }
 0x706   :  { %v5585_v13 = vld [vmem:[#allocation10 + $0x368] sm:$0xff] }
 0x707   :  { %v3367_v21 = vmul.f32 -1.442695, %v2293_v5  ;;  %v5567_v5 = vld [vmem:[#allocation10 + $0x3b8] sm:$0xff] }
 0x708   :  { %v3546_v54 = vpop.eup %3545 }
 0x709   :  { %v3548_v23 = vpop.eup %3547  ;;  %v2297_v7 = vadd.f32 1.0, %v3546_v54  ;;  %3549 = vpow2.f32 %v3367_v21  ;;  %v5570_v21 = vld [vmem:[#allocation10 + $0x380] sm:$0xff]  ;;  %v5573_v54 = vld [vmem:[#allocation10 + $0x388] sm:$0xff] }
 0x70a   :  { %v2316_v38 = vadd.f32 1.0, %v3548_v23  ;;  %v5576_v23 = vld [vmem:[#allocation10 + $0x390] sm:$0xff] }
 0x70b   :  { %3551 = vrcp.f32 %v2297_v7  ;;  %v2309_v63 = vand.u32 2147483648, %v2297_v7  ;;  %v2307_v24 = vand.u32 2147483647, %v2297_v7  ;;  %vm2303_vm14 = vweird.f32 %v2297_v7 }
 0x70c   :  { %3553 = vrcp.f32 %v2316_v38  ;;  %v2328_v4 = vand.u32 2147483648, %v2316_v38  ;;  %v2326_v22 = vand.u32 2147483647, %v2316_v38  ;;  %vm2322_vm15 = vweird.f32 %v2316_v38 }
 0x70d   :  { %v2310_v29 = vor.u32 1.1754944e-38, %v2309_v63  ;;  %vm2308_vm2 = vcmp.eq.f32.partialorder %v2307_v24, 8.507059e+37  ;;  %v5621_v63 = vld [vmem:[#allocation10 + $0x308] sm:$0xff]  ;;  %v5630_v24 = vld [vmem:[#allocation10 + $0x2e0] sm:$0xff] }
 0x70e   :  { %v2329_v2 = vor.u32 1.1754944e-38, %v2328_v4  ;;  %vm2327_vm3 = vcmp.eq.f32.partialorder %v2326_v22, 8.507059e+37  ;;  %v5624_v4 = vld [vmem:[#allocation10 + $0x310] sm:$0xff] }
 0x70f   :  { %v3550_v15 = vpop.eup %3549  ;;  %v5636_v22 = vld [vmem:[#allocation10 + $0x2f0] sm:$0xff] }
 0x710   :  { %v2336_v30 = vadd.f32 1.0, %v3550_v15  ;;  %v5588_v15 = vld [vmem:[#allocation10 + $0x370] sm:$0xff] }
 0x711   :  { %v3552_v43 = vpop.eup %3551 }
 0x712   :  { %v3554_v19 = vpop.eup %3553  ;;  %v2299_v14 = vmul.f32 %v3552_v43, %v2297_v7  ;;  %3555 = vrcp.f32 %v2336_v30  ;;  %vm2304_vm12 = vweird.f32 %v3552_v43  ;;  %v2348_v41 = vand.u32 2147483648, %v2336_v30  ;;  %v5579_v7 = vld [vmem:[#allocation10 + $0x398] sm:$0xff] }
 0x713   :  { %v2318_v9 = vmul.f32 %v3554_v19, %v2316_v38  ;;  %3557 = vtanh.f32 %v2292_v10  ;;  %vm2323_vm13 = vweird.f32 %v3554_v19  ;;  %vm2305_vm0 = vmor %vm2303_vm14, %vm2304_vm12  ;;  %vm2342_vm5 = vweird.f32 %v2336_v30  ;;  %v5582_v38 = vld [vmem:[#allocation10 + $0x360] sm:$0xff]  ;;  %v5603_v10 = vld [vmem:[#allocation10 + $0x358] sm:$0xff] }
 0x714   :  { %v2300_v1 = vsub.f32 1.0, %v2299_v14  ;;  %vm2324_vm1 = vmor %vm2322_vm15, %vm2323_vm13  ;;  %v2346_v45 = vand.u32 2147483647, %v2336_v30  ;;  %v2349_v0 = vor.u32 1.1754944e-38, %v2348_v41  ;;  %v5609_v14 = vld [vmem:[#allocation10 + $0x328] sm:$0xff]  ;;  %v5687_v41 = vld [vmem:[#allocation10 + $0x278] sm:$0xff] }
 0x715   :  { %v2319_v37 = vsub.f32 1.0, %v2318_v9  ;;  %v5612_v9 = vld [vmem:[#allocation10 + $0x330] sm:$0xff]  ;;  %6624 = vst [vmem:[#allocation39_spill] sm:$0xff] %v5687_v41 }
 0x716   :  { %v2301_v3 = vmul.f32 %v3552_v43, %v2300_v1  ;;  %vm2347_vm7 = vcmp.eq.f32.partialorder %v2346_v45, 8.507059e+37  ;;  %v5615_v1 = vld [vmem:[#allocation10 + $0x338] sm:$0xff]  ;;  %v5690_v45 = vld [vmem:[#allocation10 + $0x240] sm:$0xff] }
 0x717   :  { %v2320_v42 = vmul.f32 %v3554_v19, %v2319_v37  ;;  %v5618_v37 = vld [vmem:[#allocation10 + $0x300] sm:$0xff]  ;;  %6625 = vst [vmem:[#allocation32_spill] sm:$0xff] %v5690_v45 }
 0x718   :  { %v3556_v18 = vpop.eup %3555  ;;  %v2302_v8 = vadd.f32 %v3552_v43, %v2301_v3  ;;  %v5627_v3 = vld [vmem:[#allocation10 + $0x318] sm:$0xff] }
 0x719   :  { %v2321_v20 = vadd.f32 %v3554_v19, %v2320_v42  ;;  %v2338_v56 = vmul.f32 %v3556_v18, %v2336_v30  ;;  %v3558_v27 = vpop.eup %3557  ;;  %vm2343_vm4 = vweird.f32 %v3556_v18  ;;  %v5597_v30 = vld [vmem:[#allocation10 + $0x348] sm:$0xff] }
 0x71a   :  { %v2306_v17 = vsel %vm2305_vm0, %v3552_v43, %v2302_v8  ;;  %vm2344_vm6 = vmor %vm2342_vm5, %vm2343_vm4  ;;  %v5600_v43 = vld [vmem:[#allocation10 + $0x350] sm:$0xff]  ;;  %v5633_v42 = vld [vmem:[#allocation10 + $0x2e8] sm:$0xff] }
 0x71b   :  { %v2311_v61 = vsel %vm2308_vm2, %v2310_v29, %v2306_v17  ;;  %v2325_v39 = vsel %vm2324_vm1, %v3554_v19, %v2321_v20  ;;  %v2339_v31 = vsub.f32 1.0, %v2338_v56  ;;  %v5606_v19 = vld [vmem:[#allocation10 + $0x320] sm:$0xff]  ;;  %v5645_v29 = vld [vmem:[#allocation10 + $0x2c8] sm:$0xff]  ;;  %v5648_v20 = vld [vmem:[#allocation10 + $0x2d0] sm:$0xff] }
 0x71c   :  { %v2330_v33 = vsel %vm2327_vm3, %v2329_v2, %v2325_v39  ;;  %v2353_v34 = vmul.f32 %v3558_v27, %v2311_v61  ;;  %v5642_v8 = vld [vmem:[#allocation10 + $0x2c0] sm:$0xff]  ;;  %6611 = vst [vmem:[#allocation55_spill] sm:$0xff] %v5648_v20  ;;  %v5651_v56 = vld [vmem:[#allocation10 + $0x2d8] sm:$0xff]  ;;  %v5657_v17 = vld [vmem:[#allocation10 + $0x2a8] sm:$0xff] }
 0x71d   :  { %v2352_v36 = vmul.f32 %v2330_v33, %v5455_v26  ;;  %v2340_v53 = vmul.f32 %v3556_v18, %v2339_v31  ;;  %v5534_v26 = vld [vmem:[#allocation10 + $0x3e0] sm:$0xff]  ;;  %6612 = vst [vmem:[#allocation28_spill] sm:$0xff] %v5651_v56  ;;  %v5660_v27 = vld [vmem:[#allocation10 + $0x2b0] sm:$0xff]  ;;  %v5663_v61 = vld [vmem:[#allocation10 + $0x2b8] sm:$0xff] }
 0x71e   :  { %v5654_v2 = vld [vmem:[#allocation10 + $0x2a0] sm:$0xff]  ;;  %6614 = vst [vmem:[#allocation58_spill] sm:$0xff] %v5657_v17  ;;  %v5669_v31 = vld [vmem:[#allocation10 + $0x288] sm:$0xff]  ;;  %v5672_v33 = vld [vmem:[#allocation10 + $0x290] sm:$0xff] }
 0x71f   :  { %v5531_v40 = vadd.f32 %v2353_v34, %v2352_v36  ;;  %v2341_v46 = vadd.f32 %v3556_v18, %v2340_v53  ;;  %6613 = vst [vmem:[#allocation56_spill] sm:$0xff] %v5654_v2  ;;  %v5666_v39 = vld [vmem:[#allocation10 + $0x280] sm:$0xff]  ;;  %v5675_v34 = vld [vmem:[#allocation10 + $0x298] sm:$0xff]  ;;  %v5681_v53 = vld [vmem:[#allocation10 + $0x268] sm:$0xff] }
 0x720   :  { %6615 = vst [vmem:[#allocation57_spill] sm:$0xff] %v5660_v27  ;;  %v5678_v36 = vld [vmem:[#allocation10 + $0x260] sm:$0xff] }
 0x721   :  { %3559 = vtanh.f32 %v5531_v40  ;;  %v2345_v47 = vsel %vm2344_vm6, %v3556_v18, %v2341_v46  ;;  %v5639_v18 = vld [vmem:[#allocation10 + $0x2f8] sm:$0xff]  ;;  %6616 = vst [vmem:[#allocation31_spill] sm:$0xff] %v5663_v61  ;;  %v5684_v46 = vld [vmem:[#allocation10 + $0x270] sm:$0xff] }
 0x722   :  { %v2350_v62 = vsel %vm2347_vm7, %v2349_v0, %v2345_v47  ;;  %6617 = vst [vmem:[#allocation59_spill] sm:$0xff] %v5666_v39  ;;  %v5693_v47 = vld [vmem:[#allocation10 + $0x248] sm:$0xff]  ;;  %v5696_v0 = vld [vmem:[#allocation10 + $0x250] sm:$0xff] }
 0x723   :  { %6618 = vst [vmem:[#allocation60_spill] sm:$0xff] %v5669_v31 }
 0x724   :  { %6619 = vst [vmem:[#allocation61_spill] sm:$0xff] %v5672_v33 }
 0x725   :  { %6620 = vst [vmem:[#allocation35_spill] sm:$0xff] %v5675_v34 }
 0x726   :  { %6621 = vst [vmem:[#allocation64_spill] sm:$0xff] %v5678_v36 }
 0x727   :  { %v3560_v55 = vpop.eup %3559  ;;  %6622 = vst [vmem:[#allocation30_spill] sm:$0xff] %v5681_v53 }
 0x728   :  { %v2356_v48 = vmul.f32 %v3560_v55, %v2350_v62  ;;  %6623 = vst [vmem:[#allocation29_spill] sm:$0xff] %v5684_v46  ;;  %v5699_v55 = vld [vmem:[#allocation10 + $0x258] sm:$0xff]  ;;  %v5702_v62 = vld [vmem:[#allocation10 + $0x220] sm:$0xff] }
 0x729   :  { %6626 = vst [vmem:[#allocation34_spill] sm:$0xff] %v5693_v47 }
 0x72a   :  { %2378 = vmatmul.f32.vlgmr.msra.gmra.mxu0 %v2356_v48  ;;  %2398 = vmatmul.f32.vlgmr.msra.gmra.mxu1 %v2356_v48  ;;  %6627 = vst [vmem:[#allocation33_spill] sm:$0xff] %v5696_v0 }
 0x72b   :  { %2418 = vmatmul.f32.vlgmr.msra.gmra.mxu2 %v2356_v48  ;;  %2438 = vmatmul.f32.vlgmr.msra.gmra.mxu3 %v2356_v48  ;;  %6628 = vst [vmem:[#allocation42_spill] sm:$0xff] %v5699_v55  ;;  %v5705_v48 = vld [vmem:[#allocation10 + $0x228] sm:$0xff] }
 0x72c   :  { %2666 = vmatpush.msra.mxu0 %v5534_v26  ;;  %2686 = vmatpush.msra.mxu1 %v5537_v25  ;;  %6629 = vst [vmem:[#allocation37_spill] sm:$0xff] %v5702_v62 }
 0x72d   :  { %2706 = vmatpush.msra.mxu2 %v5540_v11  ;;  %2726 = vmatpush.msra.mxu3 %v5543_v12  ;;  %6630 = vst [vmem:[#allocation36_spill] sm:$0xff] %v5705_v48 }
 0x72e   :  { %2667 = vmatpush.msra.mxu0 %v5546_v52  ;;  %2687 = vmatpush.msra.mxu1 %v5549_v6 }
 0x72f   :  { %2707 = vmatpush.msra.mxu2 %v5552_v35  ;;  %2727 = vmatpush.msra.mxu3 %v5555_v32 }
 0x730   :  { %2668 = vmatpush.msra.mxu0 %v5558_v44  ;;  %2688 = vmatpush.msra.mxu1 %v5561_v57 }
 0x731   :  { %2708 = vmatpush.msra.mxu2 %v5564_v51  ;;  %2728 = vmatpush.msra.mxu3 %v5567_v5 }
 0x732   :  { %2669 = vmatpush.msra.mxu0 %v5570_v21  ;;  %2689 = vmatpush.msra.mxu1 %v5573_v54 }
 0x733   :  { %2709 = vmatpush.msra.mxu2 %v5576_v23  ;;  %2729 = vmatpush.msra.mxu3 %v5579_v7 }
 0x734   :  { %2670 = vmatpush.msra.mxu0 %v5582_v38  ;;  %2690 = vmatpush.msra.mxu1 %v5585_v13 }
 0x735   :  { %2710 = vmatpush.msra.mxu2 %v5588_v15  ;;  %2730 = vmatpush.msra.mxu3 %v5591_v28 }
 0x736   :  { %2671 = vmatpush.msra.mxu0 %v5594_v60  ;;  %2691 = vmatpush.msra.mxu1 %v5597_v30 }
 0x737   :  { %2711 = vmatpush.msra.mxu2 %v5600_v43  ;;  %2731 = vmatpush.msra.mxu3 %v5603_v10 }
 0x738   :  { %2672 = vmatpush.msra.mxu0 %v5606_v19  ;;  %2692 = vmatpush.msra.mxu1 %v5609_v14 }
 0x739   :  { %2712 = vmatpush.msra.mxu2 %v5612_v9  ;;  %2732 = vmatpush.msra.mxu3 %v5615_v1 }
 0x73a   :  { %2673 = vmatpush.msra.mxu0 %v5618_v37  ;;  %2693 = vmatpush.msra.mxu1 %v5621_v63 }
 0x73b   :  { %2713 = vmatpush.msra.mxu2 %v5624_v4  ;;  %2733 = vmatpush.msra.mxu3 %v5627_v3 }
 0x73c   :  { %2674 = vmatpush.msra.mxu0 %v5630_v24  ;;  %2694 = vmatpush.msra.mxu1 %v5633_v42 }
 0x73d   :  { %2714 = vmatpush.msra.mxu2 %v5636_v22  ;;  %2734 = vmatpush.msra.mxu3 %v5639_v18 }
 0x73e   :  { %2675 = vmatpush.msra.mxu0 %v5642_v8  ;;  %2695 = vmatpush.msra.mxu1 %v5645_v29 }
 0x73f   :  { %2715 = vmatpush.msra.mxu2 %v5648_v20  ;;  %2735 = vmatpush.msra.mxu3 %v5651_v56 }
 0x740   :  { %2676 = vmatpush.msra.mxu0 %v5654_v2  ;;  %2696 = vmatpush.msra.mxu1 %v5657_v17 }
 0x741   :  { %2716 = vmatpush.msra.mxu2 %v5660_v27  ;;  %2736 = vmatpush.msra.mxu3 %v5663_v61 }
 0x742   :  { %2677 = vmatpush.msra.mxu0 %v5666_v39  ;;  %2697 = vmatpush.msra.mxu1 %v5669_v31 }
 0x743   :  { %2717 = vmatpush.msra.mxu2 %v5672_v33  ;;  %2737 = vmatpush.msra.mxu3 %v5675_v34 }
 0x744   :  { %2678 = vmatpush.msra.mxu0 %v5678_v36  ;;  %2698 = vmatpush.msra.mxu1 %v5681_v53 }
 0x745   :  { %2718 = vmatpush.msra.mxu2 %v5684_v46  ;;  %2738 = vmatpush.msra.mxu3 %v5687_v41  ;;  %v6637_v41 = vld [vmem:[#allocation51_spill] sm:$0xff] }
 0x746   :  { %2679 = vmatpush.msra.mxu0 %v5690_v45  ;;  %2699 = vmatpush.msra.mxu1 %v5693_v47  ;;  %v5708_v45 = vld [vmem:[#allocation10 + $0x230] sm:$0xff]  ;;  %v5711_v47 = vld [vmem:[#allocation10 + $0x238] sm:$0xff] }
 0x747   :  { %2719 = vmatpush.msra.mxu2 %v5696_v0  ;;  %2739 = vmatpush.msra.mxu3 %v5699_v55  ;;  %6631 = vst [vmem:[#allocation38_spill] sm:$0xff] %v5708_v45  ;;  %v5714_v0 = vld [vmem:[#allocation10 + $0x200] sm:$0xff]  ;;  %v5717_v55 = vld [vmem:[#allocation10 + $0x208] sm:$0xff] }
 0x748   :  { %2680 = vmatpush.msra.mxu0 %v5702_v62  ;;  %2700 = vmatpush.msra.mxu1 %v5705_v48  ;;  %6632 = vst [vmem:[#allocation45_spill] sm:$0xff] %v5711_v47  ;;  %v5721_v62 = vld [vmem:[#allocation10 + $0x218] sm:$0xff] }
 0x749   :  { %2720 = vmatpush.msra.mxu2 %v5708_v45  ;;  %2740 = vmatpush.msra.mxu3 %v5711_v47  ;;  %6633 = vst [vmem:[#allocation43_spill] sm:$0xff] %v5714_v0  ;;  %v6636_v45 = vld [vmem:[#allocation49_spill] sm:$0xff]  ;;  %v1858_v47 = vadd.f32 %v6637_v41, %v6605_v49 }
 0x74a   :  { %2681 = vmatpush.msra.mxu0 %v5714_v0  ;;  %6634 = vst [vmem:[#allocation40_spill] sm:$0xff] %v5717_v55  ;;  %2701 = vmatpush.msra.mxu1 %v5717_v55  ;;  %v1817_v48 = vadd.f32 %v6636_v45, %v6603_v50  ;;  %v6638_v55 = vld [vmem:[#allocation54_spill] sm:$0xff] }
 0x74b   :  { %2721 = vmatpush.msra.mxu2 %v6601_v58  ;;  %6635 = vst [vmem:[#allocation41_spill] sm:$0xff] %v5721_v62  ;;  %2741 = vmatpush.msra.mxu3 %v5721_v62  ;;  %v1940_v58 = vadd.f32 %v6638_v55, %v6607_v16 }
 0x7a7   :  { %v2379_v46 = vpop.f32.mrf.mxu0  ;;  %v2399_v53 = vpop.f32.mrf.mxu1 }
 0x7a8   :  { %v2442_v36 = vadd.f32 %v2379_v46, %v1817_v48  ;;  %v2443_v0 = vadd.f32 %v2399_v53, %v1858_v47 }
 0x7aa   :  { %v3368_v34 = vmul.f32 -1.442695, %v2442_v36  ;;  %v3369_v33 = vmul.f32 -1.442695, %v2443_v0  ;;  %v6639_v36 = vld [vmem:[#allocation73_spill] sm:$0xff] }
 0x7ab   :  { %v1899_v53 = vadd.f32 %v6639_v36, %v6609_v59 }
 0x7ac   :  { %3561 = vpow2.f32 %v3368_v34 }
 0x7ad   :  { %3563 = vpow2.f32 %v3369_v33 }
 0x7ae   :  { %v2439_v31 = vpop.f32.mrf.mxu3  ;;  %v2419_v41 = vpop.f32.mrf.mxu2 }
 0x7af   :  { %v2445_v39 = vadd.f32 %v2439_v31, %v1940_v58  ;;  %v2444_v0 = vadd.f32 %v2419_v41, %v1899_v53 }
 0x7b1   :  { %v3370_v62 = vmul.f32 -1.442695, %v2445_v39 }
 0x7b2   :  { %v3562_v61 = vpop.eup %3561 }
 0x7b3   :  { %v3564_v27 = vpop.eup %3563  ;;  %v2449_v45 = vadd.f32 1.0, %v3562_v61  ;;  %3565 = vpow2.f32 %v3370_v62 }
 0x7b4   :  { %v2468_v50 = vadd.f32 1.0, %v3564_v27 }
 0x7b5   :  { %3567 = vrcp.f32 %v2449_v45  ;;  %v2461_v58 = vand.u32 2147483648, %v2449_v45  ;;  %v2459_v62 = vand.u32 2147483647, %v2449_v45  ;;  %vm2455_vm10 = vweird.f32 %v2449_v45 }
 0x7b6   :  { %3569 = vrcp.f32 %v2468_v50  ;;  %v2480_v61 = vand.u32 2147483648, %v2468_v50  ;;  %v2478_v49 = vand.u32 2147483647, %v2468_v50  ;;  %vm2474_vm11 = vweird.f32 %v2468_v50 }
 0x7b7   :  { %v2462_v41 = vor.u32 1.1754944e-38, %v2461_v58  ;;  %vm2460_vm14 = vcmp.eq.f32.partialorder %v2459_v62, 8.507059e+37 }
 0x7b8   :  { %vm2479_vm15 = vcmp.eq.f32.partialorder %v2478_v49, 8.507059e+37 }
 0x7b9   :  { %v3566_v46 = vpop.eup %3565 }
 0x7ba   :  { %v2488_v34 = vadd.f32 1.0, %v3566_v46 }
 0x7bb   :  { %v3568_v47 = vpop.eup %3567 }
 0x7bc   :  { %v3570_v55 = vpop.eup %3569  ;;  %v2451_v33 = vmul.f32 %v3568_v47, %v2449_v45  ;;  %3571 = vrcp.f32 %v2488_v34  ;;  %vm2456_vm8 = vweird.f32 %v3568_v47  ;;  %vm2494_vm1 = vweird.f32 %v2488_v34 }
 0x7bd   :  { %v2470_v31 = vmul.f32 %v3570_v55, %v2468_v50  ;;  %3573 = vtanh.f32 %v2444_v0  ;;  %vm2475_vm9 = vweird.f32 %v3570_v55  ;;  %vm2457_vm12 = vmor %vm2455_vm10, %vm2456_vm8 }
 0x7be   :  { %v2452_v39 = vsub.f32 1.0, %v2451_v33  ;;  %vm2476_vm13 = vmor %vm2474_vm11, %vm2475_vm9  ;;  %v2481_v33 = vor.u32 1.1754944e-38, %v2480_v61 }
 0x7bf   :  { %v2471_v48 = vsub.f32 1.0, %v2470_v31 }
 0x7c0   :  { %v2453_v27 = vmul.f32 %v3568_v47, %v2452_v39 }
 0x7c1   :  { %v2472_v16 = vmul.f32 %v3570_v55, %v2471_v48 }
 0x7c2   :  { %v3572_v17 = vpop.eup %3571  ;;  %v2454_v36 = vadd.f32 %v3568_v47, %v2453_v27 }
 0x7c3   :  { %v2473_v46 = vadd.f32 %v3570_v55, %v2472_v16  ;;  %v2490_v53 = vmul.f32 %v3572_v17, %v2488_v34  ;;  %v3574_v0 = vpop.eup %3573  ;;  %vm2495_vm0 = vweird.f32 %v3572_v17  ;;  %v2500_v16 = vand.u32 2147483648, %v2488_v34 }
 0x7c4   :  { %v2458_v31 = vsel %vm2457_vm12, %v3568_v47, %v2454_v36  ;;  %v2498_v47 = vand.u32 2147483647, %v2488_v34  ;;  %vm2496_vm2 = vmor %vm2494_vm1, %vm2495_vm0  ;;  %v6646_v34 = vld [vmem:[#allocation59_spill] sm:$0xff]  ;;  %v6647_v36 = vld [vmem:[#allocation60_spill] sm:$0xff] }
 0x7c5   :  { %v2463_v59 = vsel %vm2460_vm14, %v2462_v41, %v2458_v31  ;;  %v2477_v39 = vsel %vm2476_vm13, %v3570_v55, %v2473_v46  ;;  %v2491_v2 = vsub.f32 1.0, %v2490_v53  ;;  %v2501_v61 = vor.u32 1.1754944e-38, %v2500_v16  ;;  %v6648_v41 = vld [vmem:[#allocation61_spill] sm:$0xff]  ;;  %v6649_v46 = vld [vmem:[#allocation35_spill] sm:$0xff]  ;;  %v6650_v53 = vld [vmem:[#allocation64_spill] sm:$0xff] }
 0x7c6   :  { %v2482_v48 = vsel %vm2479_vm15, %v2481_v33, %v2477_v39  ;;  %v2505_v56 = vmul.f32 %v3574_v0, %v2463_v59  ;;  %vm2499_vm3 = vcmp.eq.f32.partialorder %v2498_v47, 8.507059e+37  ;;  %v6640_v59 = vld [vmem:[#allocation55_spill] sm:$0xff]  ;;  %v6651_v33 = vld [vmem:[#allocation30_spill] sm:$0xff]  ;;  %v6652_v31 = vld [vmem:[#allocation29_spill] sm:$0xff] }
 0x7c7   :  { %v2504_v20 = vmul.f32 %v2482_v48, %v5531_v40  ;;  %v2492_v27 = vmul.f32 %v3572_v17, %v2491_v2  ;;  %v6641_v40 = vld [vmem:[#allocation28_spill] sm:$0xff]  ;;  %v6644_v2 = vld [vmem:[#allocation57_spill] sm:$0xff]  ;;  %v6653_v0 = vld [vmem:[#allocation39_spill] sm:$0xff] }
 0x7c8   :  { %v6654_v39 = vld [vmem:[#allocation32_spill] sm:$0xff]  ;;  %v6655_v48 = vld [vmem:[#allocation34_spill] sm:$0xff]  ;;  %v6658_v16 = vld [vmem:[#allocation37_spill] sm:$0xff] }
 0x7c9   :  { %v5733_v45 = vadd.f32 %v2505_v56, %v2504_v20  ;;  %v2493_v50 = vadd.f32 %v3572_v17, %v2492_v27  ;;  %v6642_v20 = vld [vmem:[#allocation56_spill] sm:$0xff]  ;;  %v6643_v56 = vld [vmem:[#allocation58_spill] sm:$0xff]  ;;  %v6656_v27 = vld [vmem:[#allocation33_spill] sm:$0xff] }
 0x7ca   :  { %v6659_v47 = vld [vmem:[#allocation36_spill] sm:$0xff] }
 0x7cb   :  { %3575 = vtanh.f32 %v5733_v45  ;;  %v2497_v58 = vsel %vm2496_vm2, %v3572_v17, %v2493_v50  ;;  %v6645_v17 = vld [vmem:[#allocation31_spill] sm:$0xff]  ;;  %v6657_v50 = vld [vmem:[#allocation42_spill] sm:$0xff] }
 0x7cc   :  { %v2502_v55 = vsel %vm2499_vm3, %v2501_v61, %v2497_v58  ;;  %v6660_v58 = vld [vmem:[#allocation38_spill] sm:$0xff]  ;;  %v6661_v61 = vld [vmem:[#allocation45_spill] sm:$0xff] }
 0x7d1   :  { %v3576_v49 = vpop.eup %3575 }
 0x7d2   :  { %v2508_v62 = vmul.f32 %v3576_v49, %v2502_v55  ;;  %v6662_v49 = vld [vmem:[#allocation43_spill] sm:$0xff]  ;;  %v6663_v55 = vld [vmem:[#allocation40_spill] sm:$0xff] }
 0x7d4   :  { %2530 = vmatmul.f32.vlgmr.msrb.gmra.mxu0 %v2508_v62  ;;  %2550 = vmatmul.f32.vlgmr.msrb.gmra.mxu1 %v2508_v62 }
 0x7d5   :  { %2570 = vmatmul.f32.vlgmr.msrb.gmra.mxu2 %v2508_v62  ;;  %2590 = vmatmul.f32.vlgmr.msrb.gmra.mxu3 %v2508_v62  ;;  %v5798_v62 = vld [vmem:[#allocation10 + $0x210] sm:$0xff] }
 0x7d6   :  { %2818 = vmatpush.msrb.mxu0 %v5534_v26  ;;  %2838 = vmatpush.msrb.mxu1 %v5537_v25  ;;  %6664 = vst [vmem:[#allocation46_spill] sm:$0xff] %v5798_v62 }
 0x7d7   :  { %2858 = vmatpush.msrb.mxu2 %v5540_v11  ;;  %2878 = vmatpush.msrb.mxu3 %v5543_v12 }
 0x7d8   :  { %2819 = vmatpush.msrb.mxu0 %v5546_v52  ;;  %2839 = vmatpush.msrb.mxu1 %v5549_v6 }
 0x7d9   :  { %2859 = vmatpush.msrb.mxu2 %v5552_v35  ;;  %2879 = vmatpush.msrb.mxu3 %v5555_v32 }
 0x7da   :  { %2820 = vmatpush.msrb.mxu0 %v5558_v44  ;;  %2840 = vmatpush.msrb.mxu1 %v5561_v57 }
 0x7db   :  { %2860 = vmatpush.msrb.mxu2 %v5564_v51  ;;  %2880 = vmatpush.msrb.mxu3 %v5567_v5 }
 0x7dc   :  { %2821 = vmatpush.msrb.mxu0 %v5570_v21  ;;  %2841 = vmatpush.msrb.mxu1 %v5573_v54 }
 0x7dd   :  { %2861 = vmatpush.msrb.mxu2 %v5576_v23  ;;  %2881 = vmatpush.msrb.mxu3 %v5579_v7 }
 0x7de   :  { %2822 = vmatpush.msrb.mxu0 %v5582_v38  ;;  %2842 = vmatpush.msrb.mxu1 %v5585_v13 }
 0x7df   :  { %2862 = vmatpush.msrb.mxu2 %v5588_v15  ;;  %2882 = vmatpush.msrb.mxu3 %v5591_v28 }
 0x7e0   :  { %2823 = vmatpush.msrb.mxu0 %v5594_v60  ;;  %2843 = vmatpush.msrb.mxu1 %v5597_v30 }
 0x7e1   :  { %2863 = vmatpush.msrb.mxu2 %v5600_v43  ;;  %2883 = vmatpush.msrb.mxu3 %v5603_v10 }
 0x7e2   :  { %2824 = vmatpush.msrb.mxu0 %v5606_v19  ;;  %2844 = vmatpush.msrb.mxu1 %v5609_v14 }
 0x7e3   :  { %2864 = vmatpush.msrb.mxu2 %v5612_v9  ;;  %2884 = vmatpush.msrb.mxu3 %v5615_v1 }
 0x7e4   :  { %2825 = vmatpush.msrb.mxu0 %v5618_v37  ;;  %2845 = vmatpush.msrb.mxu1 %v5621_v63 }
 0x7e5   :  { %2865 = vmatpush.msrb.mxu2 %v5624_v4  ;;  %2885 = vmatpush.msrb.mxu3 %v5627_v3 }
 0x7e6   :  { %2826 = vmatpush.msrb.mxu0 %v5630_v24  ;;  %2846 = vmatpush.msrb.mxu1 %v5633_v42 }
 0x7e7   :  { %2866 = vmatpush.msrb.mxu2 %v5636_v22  ;;  %2886 = vmatpush.msrb.mxu3 %v5639_v18 }
 0x7e8   :  { %2827 = vmatpush.msrb.mxu0 %v5642_v8  ;;  %2847 = vmatpush.msrb.mxu1 %v5645_v29 }
 0x7e9   :  { %2867 = vmatpush.msrb.mxu2 %v6640_v59  ;;  %2887 = vmatpush.msrb.mxu3 %v6641_v40 }
 0x7ea   :  { %2828 = vmatpush.msrb.mxu0 %v6642_v20  ;;  %2848 = vmatpush.msrb.mxu1 %v6643_v56 }
 0x7eb   :  { %2868 = vmatpush.msrb.mxu2 %v6644_v2  ;;  %2888 = vmatpush.msrb.mxu3 %v6645_v17 }
 0x7ec   :  { %2829 = vmatpush.msrb.mxu0 %v6646_v34  ;;  %2849 = vmatpush.msrb.mxu1 %v6647_v36 }
 0x7ed   :  { %2869 = vmatpush.msrb.mxu2 %v6648_v41  ;;  %2889 = vmatpush.msrb.mxu3 %v6649_v46  ;;  %v6671_v46 = vld [vmem:[#allocation63_spill] sm:$0xff] }
 0x7ee   :  { %2830 = vmatpush.msrb.mxu0 %v6650_v53  ;;  %2850 = vmatpush.msrb.mxu1 %v6651_v33 }
 0x7ef   :  { %2870 = vmatpush.msrb.mxu2 %v6652_v31  ;;  %2890 = vmatpush.msrb.mxu3 %v6653_v0  ;;  %v6669_v0 = vld [vmem:[#allocation62_spill] sm:$0xff] }
 0x7f0   :  { %2831 = vmatpush.msrb.mxu0 %v6654_v39  ;;  %2851 = vmatpush.msrb.mxu1 %v6655_v48  ;;  %v6665_v48 = vld [vmem:[#allocation41_spill] sm:$0xff] }
 0x7f1   :  { %2871 = vmatpush.msrb.mxu2 %v6656_v27  ;;  %2891 = vmatpush.msrb.mxu3 %v6657_v50  ;;  %v6666_v27 = vld [vmem:[#allocation75_spill] sm:$0xff]  ;;  %v6667_v50 = vld [vmem:[#allocation72_spill] sm:$0xff] }
 0x7f2   :  { %2832 = vmatpush.msrb.mxu0 %v6658_v16  ;;  %2852 = vmatpush.msrb.mxu1 %v6659_v47  ;;  %v1820_v39 = vadd.f32 %v6667_v50, %v6666_v27  ;;  %v6668_v16 = vld [vmem:[#allocation77_spill] sm:$0xff] }
 0x7f3   :  { %2872 = vmatpush.msrb.mxu2 %v6660_v58  ;;  %2892 = vmatpush.msrb.mxu3 %v6661_v61  ;;  %v1861_v47 = vadd.f32 %v6669_v0, %v6668_v16 }
 0x7f4   :  { %2833 = vmatpush.msrb.mxu0 %v6662_v49  ;;  %2853 = vmatpush.msrb.mxu1 %v6663_v55  ;;  %v6670_v55 = vld [vmem:[#allocation26_spill] sm:$0xff] }
 0x7f5   :  { %2873 = vmatpush.msrb.mxu2 %v5798_v62  ;;  %2893 = vmatpush.msrb.mxu3 %v6665_v48  ;;  %v1943_v41 = vadd.f32 %v6671_v46, %v6670_v55 }
 0x851   :  { %v2531_v31 = vpop.f32.mrf.mxu0  ;;  %v2551_v58 = vpop.f32.mrf.mxu1 }
 0x852   :  { %v2594_v33 = vadd.f32 %v2531_v31, %v1820_v39  ;;  %v2595_v61 = vadd.f32 %v2551_v58, %v1861_v47  ;;  %v6672_v39 = vld [vmem:[#allocation25_spill] sm:$0xff] }
 0x854   :  { %v3371_v53 = vmul.f32 -1.442695, %v2594_v33  ;;  %v3372_v49 = vmul.f32 -1.442695, %v2595_v61  ;;  %v6673_v33 = vld [vmem:[#allocation78_spill] sm:$0xff] }
 0x855   :  { %v1902_v47 = vadd.f32 %v6673_v33, %v6672_v39 }
 0x856   :  { %3577 = vpow2.f32 %v3371_v53 }
 0x857   :  { %3579 = vpow2.f32 %v3372_v49 }
 0x858   :  { %v2591_v62 = vpop.f32.mrf.mxu3  ;;  %v2571_v0 = vpop.f32.mrf.mxu2 }
 0x859   :  { %v2597_v36 = vadd.f32 %v2591_v62, %v1943_v41  ;;  %v2596_v61 = vadd.f32 %v2571_v0, %v1902_v47 }
 0x85b   :  { %v3373_v48 = vmul.f32 -1.442695, %v2597_v36 }
 0x85c   :  { %v3578_v34 = vpop.eup %3577 }
 0x85d   :  { %v3580_v17 = vpop.eup %3579  ;;  %v2601_v50 = vadd.f32 1.0, %v3578_v34  ;;  %3581 = vpow2.f32 %v3373_v48 }
 0x85e   :  { %v2620_v27 = vadd.f32 1.0, %v3580_v17 }
 0x85f   :  { %3583 = vrcp.f32 %v2601_v50  ;;  %v2613_v55 = vand.u32 2147483648, %v2601_v50  ;;  %v2611_v48 = vand.u32 2147483647, %v2601_v50  ;;  %vm2607_vm6 = vweird.f32 %v2601_v50 }
 0x860   :  { %3585 = vrcp.f32 %v2620_v27  ;;  %v2632_v34 = vand.u32 2147483648, %v2620_v27  ;;  %v2630_v2 = vand.u32 2147483647, %v2620_v27  ;;  %vm2626_vm7 = vweird.f32 %v2620_v27 }
 0x861   :  { %v2614_v0 = vor.u32 1.1754944e-38, %v2613_v55  ;;  %vm2612_vm10 = vcmp.eq.f32.partialorder %v2611_v48, 8.507059e+37 }
 0x862   :  { %vm2631_vm11 = vcmp.eq.f32.partialorder %v2630_v2, 8.507059e+37 }
 0x863   :  { %v3582_v31 = vpop.eup %3581 }
 0x864   :  { %v2640_v53 = vadd.f32 1.0, %v3582_v31 }
 0x865   :  { %v3584_v58 = vpop.eup %3583 }
 0x866   :  { %v3586_v46 = vpop.eup %3585  ;;  %v2603_v49 = vmul.f32 %v3584_v58, %v2601_v50  ;;  %3587 = vrcp.f32 %v2640_v53  ;;  %vm2608_vm4 = vweird.f32 %v3584_v58  ;;  %vm2646_vm13 = vweird.f32 %v2640_v53 }
 0x867   :  { %v2622_v41 = vmul.f32 %v3586_v46, %v2620_v27  ;;  %3589 = vtanh.f32 %v2596_v61  ;;  %vm2627_vm5 = vweird.f32 %v3586_v46  ;;  %vm2609_vm8 = vmor %vm2607_vm6, %vm2608_vm4  ;;  %v2650_v55 = vand.u32 2147483647, %v2640_v53 }
 0x868   :  { %v2604_v36 = vsub.f32 1.0, %v2603_v49  ;;  %vm2628_vm9 = vmor %vm2626_vm7, %vm2627_vm5  ;;  %v2633_v49 = vor.u32 1.1754944e-38, %v2632_v34 }
 0x869   :  { %v2623_v62 = vsub.f32 1.0, %v2622_v41  ;;  %vm2651_vm15 = vcmp.eq.f32.partialorder %v2650_v55, 8.507059e+37  ;;  %v6693_v55 = vld [vmem:[#allocation36_spill] sm:$0xff] }
 0x86a   :  { %v2605_v17 = vmul.f32 %v3584_v58, %v2604_v36 }
 0x86b   :  { %v2624_v16 = vmul.f32 %v3586_v46, %v2623_v62 }
 0x86c   :  { %v3588_v56 = vpop.eup %3587  ;;  %v2606_v33 = vadd.f32 %v3584_v58, %v2605_v17 }
 0x86d   :  { %v2625_v31 = vadd.f32 %v3586_v46, %v2624_v16  ;;  %v2642_v47 = vmul.f32 %v3588_v56, %v2640_v53  ;;  %v3590_v61 = vpop.eup %3589  ;;  %vm2647_vm12 = vweird.f32 %v3588_v56  ;;  %v2652_v16 = vand.u32 2147483648, %v2640_v53  ;;  %v6680_v53 = vld [vmem:[#allocation59_spill] sm:$0xff] }
 0x86e   :  { %v2610_v41 = vsel %vm2609_vm8, %v3584_v58, %v2606_v33  ;;  %vm2648_vm14 = vmor %vm2646_vm13, %vm2647_vm12  ;;  %v6681_v33 = vld [vmem:[#allocation60_spill] sm:$0xff] }
 0x86f   :  { %v2615_v39 = vsel %vm2612_vm10, %v2614_v0, %v2610_v41  ;;  %v2629_v36 = vsel %vm2628_vm9, %v3586_v46, %v2625_v31  ;;  %v2643_v20 = vsub.f32 1.0, %v2642_v47  ;;  %v2653_v34 = vor.u32 1.1754944e-38, %v2652_v16  ;;  %v6682_v0 = vld [vmem:[#allocation61_spill] sm:$0xff]  ;;  %v6683_v31 = vld [vmem:[#allocation35_spill] sm:$0xff]  ;;  %v6684_v47 = vld [vmem:[#allocation64_spill] sm:$0xff] }
 0x870   :  { %v2634_v62 = vsel %vm2631_vm11, %v2633_v49, %v2629_v36  ;;  %v2657_v40 = vmul.f32 %v3590_v61, %v2615_v39  ;;  %v6679_v39 = vld [vmem:[#allocation31_spill] sm:$0xff]  ;;  %v6685_v49 = vld [vmem:[#allocation30_spill] sm:$0xff]  ;;  %v6686_v41 = vld [vmem:[#allocation29_spill] sm:$0xff] }
 0x871   :  { %v2656_v59 = vmul.f32 %v2634_v62, %v5733_v45  ;;  %v2644_v17 = vmul.f32 %v3588_v56, %v2643_v20  ;;  %v6674_v45 = vld [vmem:[#allocation55_spill] sm:$0xff]  ;;  %v6677_v20 = vld [vmem:[#allocation58_spill] sm:$0xff]  ;;  %v6688_v36 = vld [vmem:[#allocation32_spill] sm:$0xff] }
 0x872   :  { %v6687_v61 = vld [vmem:[#allocation39_spill] sm:$0xff]  ;;  %v6689_v62 = vld [vmem:[#allocation34_spill] sm:$0xff]  ;;  %v6692_v16 = vld [vmem:[#allocation37_spill] sm:$0xff] }
 0x873   :  { %v5811_v50 = vadd.f32 %v2657_v40, %v2656_v59  ;;  %v2645_v27 = vadd.f32 %v3588_v56, %v2644_v17  ;;  %v6675_v59 = vld [vmem:[#allocation28_spill] sm:$0xff]  ;;  %v6690_v17 = vld [vmem:[#allocation33_spill] sm:$0xff] }
 0x874   :  { %v6676_v40 = vld [vmem:[#allocation56_spill] sm:$0xff] }
 0x875   :  { %3591 = vtanh.f32 %v5811_v50  ;;  %v2649_v58 = vsel %vm2648_vm14, %v3588_v56, %v2645_v27  ;;  %v6678_v56 = vld [vmem:[#allocation57_spill] sm:$0xff]  ;;  %v6691_v27 = vld [vmem:[#allocation42_spill] sm:$0xff] }
 0x876   :  { %v2654_v46 = vsel %vm2651_vm15, %v2653_v34, %v2649_v58  ;;  %v6694_v58 = vld [vmem:[#allocation38_spill] sm:$0xff]  ;;  %v6695_v34 = vld [vmem:[#allocation45_spill] sm:$0xff] }
 0x87b   :  { %v3592_v2 = vpop.eup %3591 }
 0x87c   :  { %v2660_v48 = vmul.f32 %v3592_v2, %v2654_v46  ;;  %v6696_v2 = vld [vmem:[#allocation43_spill] sm:$0xff]  ;;  %v6697_v46 = vld [vmem:[#allocation40_spill] sm:$0xff] }
 0x87e   :  { %2682 = vmatmul.f32.vlgmr.msra.gmra.mxu0 %v2660_v48  ;;  %2702 = vmatmul.f32.vlgmr.msra.gmra.mxu1 %v2660_v48 }
 0x87f   :  { %2722 = vmatmul.f32.vlgmr.msra.gmra.mxu2 %v2660_v48  ;;  %2742 = vmatmul.f32.vlgmr.msra.gmra.mxu3 %v2660_v48  ;;  %v6698_v48 = vld [vmem:[#allocation46_spill] sm:$0xff] }
 0x880   :  { %2970 = vmatpush.msra.mxu0 %v5534_v26  ;;  %2990 = vmatpush.msra.mxu1 %v5537_v25 }
 0x881   :  { %3010 = vmatpush.msra.mxu2 %v5540_v11  ;;  %3030 = vmatpush.msra.mxu3 %v5543_v12 }
 0x882   :  { %2971 = vmatpush.msra.mxu0 %v5546_v52  ;;  %2991 = vmatpush.msra.mxu1 %v5549_v6 }
 0x883   :  { %3011 = vmatpush.msra.mxu2 %v5552_v35  ;;  %3031 = vmatpush.msra.mxu3 %v5555_v32 }
 0x884   :  { %2972 = vmatpush.msra.mxu0 %v5558_v44  ;;  %2992 = vmatpush.msra.mxu1 %v5561_v57 }
 0x885   :  { %3012 = vmatpush.msra.mxu2 %v5564_v51  ;;  %3032 = vmatpush.msra.mxu3 %v5567_v5 }
 0x886   :  { %2973 = vmatpush.msra.mxu0 %v5570_v21  ;;  %2993 = vmatpush.msra.mxu1 %v5573_v54 }
 0x887   :  { %3013 = vmatpush.msra.mxu2 %v5576_v23  ;;  %3033 = vmatpush.msra.mxu3 %v5579_v7 }
 0x888   :  { %2974 = vmatpush.msra.mxu0 %v5582_v38  ;;  %2994 = vmatpush.msra.mxu1 %v5585_v13 }
 0x889   :  { %3014 = vmatpush.msra.mxu2 %v5588_v15  ;;  %3034 = vmatpush.msra.mxu3 %v5591_v28 }
 0x88a   :  { %2975 = vmatpush.msra.mxu0 %v5594_v60  ;;  %2995 = vmatpush.msra.mxu1 %v5597_v30 }
 0x88b   :  { %3015 = vmatpush.msra.mxu2 %v5600_v43  ;;  %3035 = vmatpush.msra.mxu3 %v5603_v10 }
 0x88c   :  { %2976 = vmatpush.msra.mxu0 %v5606_v19  ;;  %2996 = vmatpush.msra.mxu1 %v5609_v14 }
 0x88d   :  { %3016 = vmatpush.msra.mxu2 %v5612_v9  ;;  %3036 = vmatpush.msra.mxu3 %v5615_v1 }
 0x88e   :  { %2977 = vmatpush.msra.mxu0 %v5618_v37  ;;  %2997 = vmatpush.msra.mxu1 %v5621_v63 }
 0x88f   :  { %3017 = vmatpush.msra.mxu2 %v5624_v4  ;;  %3037 = vmatpush.msra.mxu3 %v5627_v3 }
 0x890   :  { %2978 = vmatpush.msra.mxu0 %v5630_v24  ;;  %2998 = vmatpush.msra.mxu1 %v5633_v42 }
 0x891   :  { %3018 = vmatpush.msra.mxu2 %v5636_v22  ;;  %3038 = vmatpush.msra.mxu3 %v5639_v18 }
 0x892   :  { %2979 = vmatpush.msra.mxu0 %v5642_v8  ;;  %2999 = vmatpush.msra.mxu1 %v5645_v29 }
 0x893   :  { %3019 = vmatpush.msra.mxu2 %v6674_v45  ;;  %3039 = vmatpush.msra.mxu3 %v6675_v59 }
 0x894   :  { %2980 = vmatpush.msra.mxu0 %v6676_v40  ;;  %3000 = vmatpush.msra.mxu1 %v6677_v20 }
 0x895   :  { %3020 = vmatpush.msra.mxu2 %v6678_v56  ;;  %3040 = vmatpush.msra.mxu3 %v6679_v39 }
 0x896   :  { %2981 = vmatpush.msra.mxu0 %v6680_v53  ;;  %3001 = vmatpush.msra.mxu1 %v6681_v33 }
 0x897   :  { %3021 = vmatpush.msra.mxu2 %v6682_v0  ;;  %3041 = vmatpush.msra.mxu3 %v6683_v31  ;;  %v6705_v0 = vld [vmem:[#allocation68_spill] sm:$0xff] }
 0x898   :  { %2982 = vmatpush.msra.mxu0 %v6684_v47  ;;  %3002 = vmatpush.msra.mxu1 %v6685_v49 }
 0x899   :  { %3022 = vmatpush.msra.mxu2 %v6686_v41  ;;  %3042 = vmatpush.msra.mxu3 %v6687_v61  ;;  %v6703_v41 = vld [vmem:[#allocation65_spill] sm:$0xff] }
 0x89a   :  { %2983 = vmatpush.msra.mxu0 %v6688_v36  ;;  %3003 = vmatpush.msra.mxu1 %v6689_v62  ;;  %v6699_v36 = vld [vmem:[#allocation41_spill] sm:$0xff]  ;;  %v6700_v62 = vld [vmem:[#allocation75_spill] sm:$0xff] }
 0x89b   :  { %3023 = vmatpush.msra.mxu2 %v6690_v17  ;;  %3043 = vmatpush.msra.mxu3 %v6691_v27  ;;  %v6701_v17 = vld [vmem:[#allocation76_spill] sm:$0xff]  ;;  %v6702_v27 = vld [vmem:[#allocation77_spill] sm:$0xff] }
 0x89c   :  { %2984 = vmatpush.msra.mxu0 %v6692_v16  ;;  %3004 = vmatpush.msra.mxu1 %v6693_v55  ;;  %v1823_v61 = vadd.f32 %v6701_v17, %v6700_v62  ;;  %v1864_v16 = vadd.f32 %v6703_v41, %v6702_v27 }
 0x89d   :  { %3024 = vmatpush.msra.mxu2 %v6694_v58  ;;  %3044 = vmatpush.msra.mxu3 %v6695_v34 }
 0x89e   :  { %2985 = vmatpush.msra.mxu0 %v6696_v2  ;;  %3005 = vmatpush.msra.mxu1 %v6697_v46  ;;  %v6704_v2 = vld [vmem:[#allocation26_spill] sm:$0xff] }
 0x89f   :  { %3025 = vmatpush.msra.mxu2 %v6698_v48  ;;  %3045 = vmatpush.msra.mxu3 %v6699_v36  ;;  %v1946_v46 = vadd.f32 %v6705_v0, %v6704_v2 }
 0x8fb   :  { %v2683_v49 = vpop.f32.mrf.mxu0  ;;  %v2703_v55 = vpop.f32.mrf.mxu1 }
 0x8fc   :  { %v2746_v47 = vadd.f32 %v2683_v49, %v1823_v61  ;;  %v2747_v58 = vadd.f32 %v2703_v55, %v1864_v16  ;;  %v6706_v61 = vld [vmem:[#allocation25_spill] sm:$0xff] }
 0x8fe   :  { %v3374_v31 = vmul.f32 -1.442695, %v2746_v47  ;;  %v3375_v34 = vmul.f32 -1.442695, %v2747_v58  ;;  %v6707_v47 = vld [vmem:[#allocation69_spill] sm:$0xff] }
 0x8ff   :  { %v1905_v16 = vadd.f32 %v6707_v47, %v6706_v61 }
 0x900   :  { %3593 = vpow2.f32 %v3374_v31 }
 0x901   :  { %3595 = vpow2.f32 %v3375_v34 }
 0x902   :  { %v2743_v48 = vpop.f32.mrf.mxu3  ;;  %v2723_v41 = vpop.f32.mrf.mxu2 }
 0x903   :  { %v2749_v33 = vadd.f32 %v2743_v48, %v1946_v46  ;;  %v2748_v58 = vadd.f32 %v2723_v41, %v1905_v16 }
 0x905   :  { %v3376_v36 = vmul.f32 -1.442695, %v2749_v33 }
 0x906   :  { %v3594_v53 = vpop.eup %3593 }
 0x907   :  { %v3596_v39 = vpop.eup %3595  ;;  %v2753_v17 = vadd.f32 1.0, %v3594_v53  ;;  %3597 = vpow2.f32 %v3376_v36 }
 0x908   :  { %v2772_v62 = vadd.f32 1.0, %v3596_v39 }
 0x909   :  { %3599 = vrcp.f32 %v2753_v17  ;;  %v2765_v2 = vand.u32 2147483648, %v2753_v17  ;;  %v2763_v36 = vand.u32 2147483647, %v2753_v17  ;;  %vm2759_vm2 = vweird.f32 %v2753_v17 }
 0x90a   :  { %3601 = vrcp.f32 %v2772_v62  ;;  %v2784_v53 = vand.u32 2147483648, %v2772_v62  ;;  %v2782_v56 = vand.u32 2147483647, %v2772_v62  ;;  %vm2778_vm3 = vweird.f32 %v2772_v62 }
 0x90b   :  { %v2766_v41 = vor.u32 1.1754944e-38, %v2765_v2  ;;  %vm2764_vm6 = vcmp.eq.f32.partialorder %v2763_v36, 8.507059e+37 }
 0x90c   :  { %vm2783_vm7 = vcmp.eq.f32.partialorder %v2782_v56, 8.507059e+37 }
 0x90d   :  { %v3598_v49 = vpop.eup %3597 }
 0x90e   :  { %v2792_v31 = vadd.f32 1.0, %v3598_v49 }
 0x90f   :  { %v3600_v55 = vpop.eup %3599 }
 0x910   :  { %v3602_v0 = vpop.eup %3601  ;;  %v2755_v34 = vmul.f32 %v3600_v55, %v2753_v17  ;;  %3603 = vrcp.f32 %v2792_v31  ;;  %vm2760_vm0 = vweird.f32 %v3600_v55  ;;  %vm2798_vm9 = vweird.f32 %v2792_v31 }
 0x911   :  { %v2774_v46 = vmul.f32 %v3602_v0, %v2772_v62  ;;  %3605 = vtanh.f32 %v2748_v58  ;;  %vm2779_vm1 = vweird.f32 %v3602_v0  ;;  %vm2761_vm4 = vmor %vm2759_vm2, %vm2760_vm0  ;;  %v2802_v2 = vand.u32 2147483647, %v2792_v31 }
 0x912   :  { %v2756_v33 = vsub.f32 1.0, %v2755_v34  ;;  %vm2780_vm5 = vmor %vm2778_vm3, %vm2779_vm1  ;;  %v2785_v34 = vor.u32 1.1754944e-38, %v2784_v53 }
 0x913   :  { %v2775_v48 = vsub.f32 1.0, %v2774_v46  ;;  %vm2803_vm11 = vcmp.eq.f32.partialorder %v2802_v2, 8.507059e+37 }
 0x914   :  { %v2757_v39 = vmul.f32 %v3600_v55, %v2756_v33 }
 0x915   :  { %v2776_v27 = vmul.f32 %v3602_v0, %v2775_v48 }
 0x916   :  { %v3604_v20 = vpop.eup %3603  ;;  %v2758_v47 = vadd.f32 %v3600_v55, %v2757_v39 }
 0x917   :  { %v2777_v49 = vadd.f32 %v3602_v0, %v2776_v27  ;;  %v2794_v16 = vmul.f32 %v3604_v20, %v2792_v31  ;;  %v3606_v58 = vpop.eup %3605  ;;  %vm2799_vm8 = vweird.f32 %v3604_v20  ;;  %v2804_v27 = vand.u32 2147483648, %v2792_v31 }
 0x918   :  { %v2762_v46 = vsel %vm2761_vm4, %v3600_v55, %v2758_v47  ;;  %vm2800_vm10 = vmor %vm2798_vm9, %vm2799_vm8 }
 0x919   :  { %v2767_v61 = vsel %vm2764_vm6, %v2766_v41, %v2762_v46  ;;  %v2781_v33 = vsel %vm2780_vm5, %v3602_v0, %v2777_v49  ;;  %v2795_v40 = vsub.f32 1.0, %v2794_v16  ;;  %v2805_v53 = vor.u32 1.1754944e-38, %v2804_v27  ;;  %v6740_v46 = vld [vmem:[#allocation25_spill] sm:$0xff] }
 0x91a   :  { %v2786_v48 = vsel %vm2783_vm7, %v2785_v34, %v2781_v33  ;;  %v2809_v59 = vmul.f32 %v3606_v58, %v2767_v61  ;;  %v6741_v58 = vld [vmem:[#allocation27_spill] sm:$0xff] }
 0x91b   :  { %v2808_v45 = vmul.f32 %v2786_v48, %v5811_v50  ;;  %v2796_v39 = vmul.f32 %v3604_v20, %v2795_v40  ;;  %v6738_v50 = vld [vmem:[#allocation26_spill] sm:$0xff]  ;;  %v1908_v33 = vadd.f32 %v6741_v58, %v6740_v46 }
 0x91d   :  { %v5887_v17 = vadd.f32 %v2809_v59, %v2808_v45  ;;  %v2797_v62 = vadd.f32 %v3604_v20, %v2796_v39  ;;  %v6739_v45 = vld [vmem:[#allocation74_spill] sm:$0xff] }
 0x91e   :  { %v1949_v59 = vadd.f32 %v6739_v45, %v6738_v50 }
 0x91f   :  { %3607 = vtanh.f32 %v5887_v17  ;;  %v2801_v55 = vsel %vm2800_vm10, %v3604_v20, %v2797_v62 }
 0x920   :  { %v2806_v0 = vsel %vm2803_vm11, %v2805_v53, %v2801_v55 }
 0x925   :  { %v3608_v56 = vpop.eup %3607 }
 0x926   :  { %v2812_v36 = vmul.f32 %v3608_v56, %v2806_v0 }
 0x928   :  { %2834 = vmatmul.f32.vlgmr.msrb.gmra.mxu0 %v2812_v36  ;;  %2854 = vmatmul.f32.vlgmr.msrb.gmra.mxu1 %v2812_v36 }
 0x929   :  { %2874 = vmatmul.f32.vlgmr.msrb.gmra.mxu2 %v2812_v36  ;;  %2894 = vmatmul.f32.vlgmr.msrb.gmra.mxu3 %v2812_v36 }
 0x92a   :  { %3122 = vmatpush.msrb.mxu0 %v5534_v26  ;;  %3142 = vmatpush.msrb.mxu1 %v5537_v25  ;;  %v6708_v26 = vld [vmem:[#allocation55_spill] sm:$0xff]  ;;  %v6709_v25 = vld [vmem:[#allocation28_spill] sm:$0xff] }
 0x92b   :  { %3162 = vmatpush.msrb.mxu2 %v5540_v11  ;;  %3182 = vmatpush.msrb.mxu3 %v5543_v12  ;;  %v6710_v11 = vld [vmem:[#allocation56_spill] sm:$0xff]  ;;  %v6711_v12 = vld [vmem:[#allocation58_spill] sm:$0xff] }
 0x92c   :  { %3123 = vmatpush.msrb.mxu0 %v5546_v52  ;;  %3143 = vmatpush.msrb.mxu1 %v5549_v6  ;;  %v6712_v52 = vld [vmem:[#allocation57_spill] sm:$0xff]  ;;  %v6713_v6 = vld [vmem:[#allocation31_spill] sm:$0xff] }
 0x92d   :  { %3163 = vmatpush.msrb.mxu2 %v5552_v35  ;;  %3183 = vmatpush.msrb.mxu3 %v5555_v32  ;;  %v6714_v35 = vld [vmem:[#allocation59_spill] sm:$0xff]  ;;  %v6715_v32 = vld [vmem:[#allocation60_spill] sm:$0xff] }
 0x92e   :  { %3124 = vmatpush.msrb.mxu0 %v5558_v44  ;;  %3144 = vmatpush.msrb.mxu1 %v5561_v57  ;;  %v6716_v44 = vld [vmem:[#allocation61_spill] sm:$0xff]  ;;  %v6717_v57 = vld [vmem:[#allocation35_spill] sm:$0xff] }
 0x92f   :  { %3164 = vmatpush.msrb.mxu2 %v5564_v51  ;;  %3184 = vmatpush.msrb.mxu3 %v5567_v5  ;;  %v6718_v51 = vld [vmem:[#allocation64_spill] sm:$0xff]  ;;  %v6719_v5 = vld [vmem:[#allocation30_spill] sm:$0xff] }
 0x930   :  { %3125 = vmatpush.msrb.mxu0 %v5570_v21  ;;  %3145 = vmatpush.msrb.mxu1 %v5573_v54  ;;  %v6720_v21 = vld [vmem:[#allocation29_spill] sm:$0xff]  ;;  %v6721_v54 = vld [vmem:[#allocation39_spill] sm:$0xff] }
 0x931   :  { %3165 = vmatpush.msrb.mxu2 %v5576_v23  ;;  %3185 = vmatpush.msrb.mxu3 %v5579_v7  ;;  %v6722_v23 = vld [vmem:[#allocation32_spill] sm:$0xff]  ;;  %v6723_v7 = vld [vmem:[#allocation34_spill] sm:$0xff] }
 0x932   :  { %3126 = vmatpush.msrb.mxu0 %v5582_v38  ;;  %3146 = vmatpush.msrb.mxu1 %v5585_v13  ;;  %v6724_v38 = vld [vmem:[#allocation33_spill] sm:$0xff]  ;;  %v6725_v13 = vld [vmem:[#allocation42_spill] sm:$0xff] }
 0x933   :  { %3166 = vmatpush.msrb.mxu2 %v5588_v15  ;;  %3186 = vmatpush.msrb.mxu3 %v5591_v28  ;;  %v6726_v15 = vld [vmem:[#allocation37_spill] sm:$0xff]  ;;  %v6727_v28 = vld [vmem:[#allocation36_spill] sm:$0xff] }
 0x934   :  { %3127 = vmatpush.msrb.mxu0 %v5594_v60  ;;  %3147 = vmatpush.msrb.mxu1 %v5597_v30  ;;  %v6728_v60 = vld [vmem:[#allocation38_spill] sm:$0xff]  ;;  %v6729_v30 = vld [vmem:[#allocation45_spill] sm:$0xff] }
 0x935   :  { %3167 = vmatpush.msrb.mxu2 %v5600_v43  ;;  %3187 = vmatpush.msrb.mxu3 %v5603_v10  ;;  %v6730_v43 = vld [vmem:[#allocation43_spill] sm:$0xff]  ;;  %v6731_v10 = vld [vmem:[#allocation40_spill] sm:$0xff] }
 0x936   :  { %3128 = vmatpush.msrb.mxu0 %v5606_v19  ;;  %3148 = vmatpush.msrb.mxu1 %v5609_v14  ;;  %v6732_v19 = vld [vmem:[#allocation46_spill] sm:$0xff]  ;;  %v6733_v14 = vld [vmem:[#allocation41_spill] sm:$0xff] }
 0x937   :  { %3168 = vmatpush.msrb.mxu2 %v5612_v9  ;;  %3188 = vmatpush.msrb.mxu3 %v5615_v1  ;;  %v6734_v9 = vld [vmem:[#allocation75_spill] sm:$0xff]  ;;  %v6735_v1 = vld [vmem:[#allocation66_spill] sm:$0xff] }
 0x938   :  { %3129 = vmatpush.msrb.mxu0 %v5618_v37  ;;  %3149 = vmatpush.msrb.mxu1 %v5621_v63  ;;  %v1826_v37 = vadd.f32 %v6735_v1, %v6734_v9  ;;  %v6736_v63 = vld [vmem:[#allocation77_spill] sm:$0xff] }
 0x939   :  { %3169 = vmatpush.msrb.mxu2 %v5624_v4  ;;  %3189 = vmatpush.msrb.mxu3 %v5627_v3  ;;  %v6737_v4 = vld [vmem:[#allocation67_spill] sm:$0xff] }
 0x93a   :  { %3130 = vmatpush.msrb.mxu0 %v5630_v24  ;;  %3150 = vmatpush.msrb.mxu1 %v5633_v42  ;;  %v1867_v3 = vadd.f32 %v6737_v4, %v6736_v63 }
 0x93b   :  { %3170 = vmatpush.msrb.mxu2 %v5636_v22  ;;  %3190 = vmatpush.msrb.mxu3 %v5639_v18 }
 0x93c   :  { %3131 = vmatpush.msrb.mxu0 %v5642_v8  ;;  %3151 = vmatpush.msrb.mxu1 %v5645_v29 }
 0x93d   :  { %3171 = vmatpush.msrb.mxu2 %v6708_v26  ;;  %3191 = vmatpush.msrb.mxu3 %v6709_v25 }
 0x93e   :  { %3132 = vmatpush.msrb.mxu0 %v6710_v11  ;;  %3152 = vmatpush.msrb.mxu1 %v6711_v12 }
 0x93f   :  { %3172 = vmatpush.msrb.mxu2 %v6712_v52  ;;  %3192 = vmatpush.msrb.mxu3 %v6713_v6 }
 0x940   :  { %3133 = vmatpush.msrb.mxu0 %v6714_v35  ;;  %3153 = vmatpush.msrb.mxu1 %v6715_v32 }
 0x941   :  { %3173 = vmatpush.msrb.mxu2 %v6716_v44  ;;  %3193 = vmatpush.msrb.mxu3 %v6717_v57 }
 0x942   :  { %3134 = vmatpush.msrb.mxu0 %v6718_v51  ;;  %3154 = vmatpush.msrb.mxu1 %v6719_v5 }
 0x943   :  { %3174 = vmatpush.msrb.mxu2 %v6720_v21  ;;  %3194 = vmatpush.msrb.mxu3 %v6721_v54 }
 0x944   :  { %3135 = vmatpush.msrb.mxu0 %v6722_v23  ;;  %3155 = vmatpush.msrb.mxu1 %v6723_v7 }
 0x945   :  { %3175 = vmatpush.msrb.mxu2 %v6724_v38  ;;  %3195 = vmatpush.msrb.mxu3 %v6725_v13 }
 0x946   :  { %3136 = vmatpush.msrb.mxu0 %v6726_v15  ;;  %3156 = vmatpush.msrb.mxu1 %v6727_v28 }
 0x947   :  { %3176 = vmatpush.msrb.mxu2 %v6728_v60  ;;  %3196 = vmatpush.msrb.mxu3 %v6729_v30 }
 0x948   :  { %3137 = vmatpush.msrb.mxu0 %v6730_v43  ;;  %3157 = vmatpush.msrb.mxu1 %v6731_v10 }
 0x949   :  { %3177 = vmatpush.msrb.mxu2 %v6732_v19  ;;  %3197 = vmatpush.msrb.mxu3 %v6733_v14 }
 0x9a5   :  { %v2835_v24 = vpop.f32.mrf.mxu0  ;;  %v2855_v42 = vpop.f32.mrf.mxu1 }
 0x9a6   :  { %v2898_v22 = vadd.f32 %v2835_v24, %v1826_v37  ;;  %v2899_v18 = vadd.f32 %v2855_v42, %v1867_v3  ;;  %v6743_v3 = vld [vmem:[#allocation22_spill] sm:$0xff] }
 0x9a7   :  { %v1870_v24 = vadd.f32 %v6743_v3, %v6736_v63  ;;  %v3284_v3 = vld [vmem:[#allocation13 + $0x70] sm:$0xff] }
 0x9a8   :  { %v3377_v8 = vmul.f32 -1.442695, %v2898_v22  ;;  %v3378_v29 = vmul.f32 -1.442695, %v2899_v18 }
 0x9aa   :  { %3609 = vpow2.f32 %v3377_v8 }
 0x9ab   :  { %3611 = vpow2.f32 %v3378_v29 }
 0x9ac   :  { %v2895_v40 = vpop.f32.mrf.mxu3  ;;  %v2875_v16 = vpop.f32.mrf.mxu2 }
 0x9ad   :  { %v2901_v20 = vadd.f32 %v2895_v40, %v1949_v59  ;;  %v2900_v62 = vadd.f32 %v2875_v16, %v1908_v33  ;;  %v6744_v59 = vld [vmem:[#allocation53_spill] sm:$0xff] }
 0x9ae   :  { %v1952_v40 = vadd.f32 %v6744_v59, %v6738_v50  ;;  %v6745_v33 = vld [vmem:[#allocation21_spill] sm:$0xff]  ;;  %v6746_v59 = vld [vmem:[#allocation70_spill] sm:$0xff] }
 0x9af   :  { %v3379_v61 = vmul.f32 -1.442695, %v2901_v20 }
 0x9b0   :  { %v3610_v31 = vpop.eup %3609 }
 0x9b1   :  { %v3612_v47 = vpop.eup %3611  ;;  %v2905_v41 = vadd.f32 1.0, %v3610_v31  ;;  %3613 = vpow2.f32 %v3379_v61 }
 0x9b2   :  { %v2924_v49 = vadd.f32 1.0, %v3612_v47 }
 0x9b3   :  { %3615 = vrcp.f32 %v2905_v41  ;;  %v2917_v0 = vand.u32 2147483648, %v2905_v41  ;;  %v2915_v25 = vand.u32 2147483647, %v2905_v41  ;;  %vm2911_vm14 = vweird.f32 %v2905_v41 }
 0x9b4   :  { %3617 = vrcp.f32 %v2924_v49  ;;  %v2936_v36 = vand.u32 2147483648, %v2924_v49  ;;  %v2934_v12 = vand.u32 2147483647, %v2924_v49  ;;  %vm2930_vm15 = vweird.f32 %v2924_v49 }
 0x9b5   :  { %v2918_v35 = vor.u32 1.1754944e-38, %v2917_v0  ;;  %vm2916_vm2 = vcmp.eq.f32.partialorder %v2915_v25, 8.507059e+37 }
 0x9b6   :  { %v2937_v57 = vor.u32 1.1754944e-38, %v2936_v36  ;;  %vm2935_vm3 = vcmp.eq.f32.partialorder %v2934_v12, 8.507059e+37 }
 0x9b7   :  { %v3614_v34 = vpop.eup %3613 }
 0x9b8   :  { %v2944_v48 = vadd.f32 1.0, %v3614_v34 }
 0x9b9   :  { %v3616_v39 = vpop.eup %3615 }
 0x9ba   :  { %v3618_v27 = vpop.eup %3617  ;;  %v2907_v2 = vmul.f32 %v3616_v39, %v2905_v41  ;;  %3619 = vrcp.f32 %v2944_v48  ;;  %vm2912_vm12 = vweird.f32 %v3616_v39  ;;  %v2956_v30 = vand.u32 2147483648, %v2944_v48 }
 0x9bb   :  { %v2926_v55 = vmul.f32 %v3618_v27, %v2924_v49  ;;  %3621 = vtanh.f32 %v2900_v62  ;;  %vm2931_vm13 = vweird.f32 %v3618_v27  ;;  %vm2913_vm0 = vmor %vm2911_vm14, %vm2912_vm12  ;;  %vm2950_vm5 = vweird.f32 %v2944_v48 }
 0x9bc   :  { %v2908_v53 = vsub.f32 1.0, %v2907_v2  ;;  %vm2932_vm1 = vmor %vm2930_vm15, %vm2931_vm13  ;;  %v2954_v43 = vand.u32 2147483647, %v2944_v48  ;;  %v2957_v19 = vor.u32 1.1754944e-38, %v2956_v30 }
 0x9bd   :  { %v2927_v56 = vsub.f32 1.0, %v2926_v55 }
 0x9be   :  { %v2909_v26 = vmul.f32 %v3616_v39, %v2908_v53  ;;  %vm2955_vm7 = vcmp.eq.f32.partialorder %v2954_v43, 8.507059e+37 }
 0x9bf   :  { %v2928_v11 = vmul.f32 %v3618_v27, %v2927_v56 }
 0x9c0   :  { %v3620_v52 = vpop.eup %3619  ;;  %v2910_v6 = vadd.f32 %v3616_v39, %v2909_v26 }
 0x9c1   :  { %v2929_v32 = vadd.f32 %v3618_v27, %v2928_v11  ;;  %v2946_v44 = vmul.f32 %v3620_v52, %v2944_v48  ;;  %v3622_v5 = vpop.eup %3621  ;;  %vm2951_vm4 = vweird.f32 %v3620_v52  ;;  %v1911_v48 = vadd.f32 %v6745_v33, %v6740_v46 }
 0x9c2   :  { %v2914_v51 = vsel %vm2913_vm0, %v3616_v39, %v2910_v6  ;;  %vm2952_vm6 = vmor %vm2950_vm5, %vm2951_vm4 }
 0x9c3   :  { %v2919_v21 = vsel %vm2916_vm2, %v2918_v35, %v2914_v51  ;;  %v2933_v54 = vsel %vm2932_vm1, %v3618_v27, %v2929_v32  ;;  %v2947_v23 = vsub.f32 1.0, %v2946_v44 }
 0x9c4   :  { %v2938_v7 = vsel %vm2935_vm3, %v2937_v57, %v2933_v54  ;;  %v2961_v38 = vmul.f32 %v3622_v5, %v2919_v21 }
 0x9c5   :  { %v2960_v13 = vmul.f32 %v2938_v7, %v5887_v17  ;;  %v2948_v15 = vmul.f32 %v3620_v52, %v2947_v23  ;;  %v6742_v17 = vld [vmem:[#allocation79_spill] sm:$0xff] }
 0x9c6   :  { %v1829_v4 = vadd.f32 %v6742_v17, %v6734_v9 }
 0x9c7   :  { %v5963_v28 = vadd.f32 %v2961_v38, %v2960_v13  ;;  %v2949_v60 = vadd.f32 %v3620_v52, %v2948_v15 }
 0x9c9   :  { %3623 = vtanh.f32 %v5963_v28  ;;  %v2953_v10 = vsel %vm2952_vm6, %v3620_v52, %v2949_v60 }
 0x9ca   :  { %v2958_v1 = vsel %vm2955_vm7, %v2957_v19, %v2953_v10 }
 0x9cf   :  { %v3624_v14 = vpop.eup %3623 }
 0x9d0   :  { %v2964_v37 = vmul.f32 %v3624_v14, %v2958_v1 }
 0x9d2   :  { %2986 = vmatmul.f32.vlgmr.msra.gmra.mxu0 %v2964_v37  ;;  %3006 = vmatmul.f32.vlgmr.msra.gmra.mxu1 %v2964_v37 }
 0x9d3   :  { %3026 = vmatmul.f32.vlgmr.msra.gmra.mxu2 %v2964_v37  ;;  %3046 = vmatmul.f32.vlgmr.msra.gmra.mxu3 %v2964_v37 }
 0xa4f   :  { %v2987_v42 = vpop.f32.mrf.mxu0  ;;  %v3007_v22 = vpop.f32.mrf.mxu1 }
 0xa50   :  { %v3050_v18 = vadd.f32 %v2987_v42, %v1829_v4  ;;  %v3051_v8 = vadd.f32 %v3007_v22, %v1870_v24  ;;  %v3283_v24 = vld [vmem:[#allocation13 + $0x68] sm:$0xff]  ;;  %v3282_v42 = vld [vmem:[#allocation13 + $0x60] sm:$0xff]  ;;  %v3281_v22 = vld [vmem:[#allocation13 + $0x58] sm:$0xff] }
 0xa52   :  { %v3380_v29 = vmul.f32 -1.442695, %v3050_v18  ;;  %v3381_v45 = vmul.f32 -1.442695, %v3051_v8  ;;  %v3280_v18 = vld [vmem:[#allocation13 + $0x50] sm:$0xff]  ;;  %v3279_v8 = vld [vmem:[#allocation13 + $0x48] sm:$0xff] }
 0xa54   :  { %3625 = vpow2.f32 %v3380_v29  ;;  %v3278_v29 = vld [vmem:[#allocation13 + $0x40] sm:$0xff] }
 0xa55   :  { %3627 = vpow2.f32 %v3381_v45  ;;  %v3277_v45 = vld [vmem:[#allocation13 + $0x38] sm:$0xff] }
 0xa56   :  { %v3047_v20 = vpop.f32.mrf.mxu3  ;;  %v3027_v34 = vpop.f32.mrf.mxu2 }
 0xa57   :  { %v3053_v61 = vadd.f32 %v3047_v20, %v1952_v40  ;;  %v3052_v27 = vadd.f32 %v3027_v34, %v1911_v48  ;;  %v1832_v40 = vadd.f32 %v6746_v59, %v6734_v9  ;;  %v6747_v20 = vld [vmem:[#allocation71_spill] sm:$0xff]  ;;  %v3275_v34 = vld [vmem:[#allocation13 + $0x28] sm:$0xff]  ;;  %v3274_v48 = vld [vmem:[#allocation13 + $0x20] sm:$0xff] }
 0xa58   :  { %v6748_v9 = vld [vmem:[#allocation23_spill] sm:$0xff] }
 0xa59   :  { %v3382_v31 = vmul.f32 -1.442695, %v3053_v61  ;;  %v1873_v61 = vadd.f32 %v6747_v20, %v6736_v63  ;;  %v3272_v63 = vld [vmem:[#allocation13 + $0x10] sm:$0xff] }
 0xa5a   :  { %v3626_v47 = vpop.eup %3625 }
 0xa5b   :  { %v3628_v41 = vpop.eup %3627  ;;  %v3057_v49 = vadd.f32 1.0, %v3626_v47  ;;  %3629 = vpow2.f32 %v3382_v31 }
 0xa5c   :  { %v3076_v16 = vadd.f32 1.0, %v3628_v41  ;;  %v3276_v41 = vld [vmem:[#allocation13 + $0x30] sm:$0xff] }
 0xa5d   :  { %3631 = vrcp.f32 %v3057_v49  ;;  %v3069_v36 = vand.u32 2147483648, %v3057_v49  ;;  %v3067_v11 = vand.u32 2147483647, %v3057_v49  ;;  %vm3063_vm10 = vweird.f32 %v3057_v49 }
 0xa5e   :  { %3633 = vrcp.f32 %v3076_v16  ;;  %v3088_v26 = vand.u32 2147483648, %v3076_v16  ;;  %v3086_v52 = vand.u32 2147483647, %v3076_v16  ;;  %vm3082_vm11 = vweird.f32 %v3076_v16 }
 0xa5f   :  { %v3070_v32 = vor.u32 1.1754944e-38, %v3069_v36  ;;  %vm3068_vm14 = vcmp.eq.f32.partialorder %v3067_v11, 8.507059e+37 }
 0xa60   :  { %v3089_v51 = vor.u32 1.1754944e-38, %v3088_v26  ;;  %vm3087_vm15 = vcmp.eq.f32.partialorder %v3086_v52, 8.507059e+37 }
 0xa61   :  { %v3630_v58 = vpop.eup %3629 }
 0xa62   :  { %v3096_v39 = vadd.f32 1.0, %v3630_v58 }
 0xa63   :  { %v3632_v62 = vpop.eup %3631 }
 0xa64   :  { %v3634_v2 = vpop.eup %3633  ;;  %v3059_v55 = vmul.f32 %v3632_v62, %v3057_v49  ;;  %3635 = vrcp.f32 %v3096_v39  ;;  %vm3064_vm8 = vweird.f32 %v3632_v62  ;;  %v3108_v10 = vand.u32 2147483648, %v3096_v39 }
 0xa65   :  { %v3078_v53 = vmul.f32 %v3634_v2, %v3076_v16  ;;  %3637 = vtanh.f32 %v3052_v27  ;;  %vm3083_vm9 = vweird.f32 %v3634_v2  ;;  %vm3065_vm12 = vmor %vm3063_vm10, %vm3064_vm8  ;;  %vm3102_vm1 = vweird.f32 %v3096_v39 }
 0xa66   :  { %v3060_v56 = vsub.f32 1.0, %v3059_v55  ;;  %vm3084_vm13 = vmor %vm3082_vm11, %vm3083_vm9  ;;  %v3106_v19 = vand.u32 2147483647, %v3096_v39  ;;  %v3109_v1 = vor.u32 1.1754944e-38, %v3108_v10  ;;  %v3271_v55 = vld [vmem:[#allocation13 + $0x8] sm:$0xff] }
 0xa67   :  { %v3079_v0 = vsub.f32 1.0, %v3078_v53 }
 0xa68   :  { %v3061_v25 = vmul.f32 %v3632_v62, %v3060_v56  ;;  %vm3107_vm3 = vcmp.eq.f32.partialorder %v3106_v19, 8.507059e+37  ;;  %v3270_v56 = vld [vmem:[#allocation13] sm:$0xff] }
 0xa69   :  { %v3080_v12 = vmul.f32 %v3634_v2, %v3079_v0 }
 0xa6a   :  { %v3636_v6 = vpop.eup %3635  ;;  %v3062_v35 = vadd.f32 %v3632_v62, %v3061_v25 }
 0xa6b   :  { %v3081_v44 = vadd.f32 %v3634_v2, %v3080_v12  ;;  %v3098_v57 = vmul.f32 %v3636_v6, %v3096_v39  ;;  %v3638_v21 = vpop.eup %3637  ;;  %vm3103_vm0 = vweird.f32 %v3636_v6  ;;  %v3273_v39 = vld [vmem:[#allocation13 + $0x18] sm:$0xff]  ;;  %v6749_v12 = vld [vmem:[#allocation24_spill] sm:$0xff] }
 0xa6c   :  { %v3066_v5 = vsel %vm3065_vm12, %v3632_v62, %v3062_v35  ;;  %vm3104_vm2 = vmor %vm3102_vm1, %vm3103_vm0  ;;  %v1955_v62 = vadd.f32 %v6748_v9, %v6738_v50  ;;  %v1914_v52 = vadd.f32 %v6749_v12, %v6740_v46 }
 0xa6d   :  { %v3071_v54 = vsel %vm3068_vm14, %v3070_v32, %v3066_v5  ;;  %v3085_v23 = vsel %vm3084_vm13, %v3634_v2, %v3081_v44  ;;  %v3099_v7 = vsub.f32 1.0, %v3098_v57 }
 0xa6e   :  { %v3090_v38 = vsel %vm3087_vm15, %v3089_v51, %v3085_v23  ;;  %v3113_v13 = vmul.f32 %v3638_v21, %v3071_v54 }
 0xa6f   :  { %v3112_v15 = vmul.f32 %v3090_v38, %v5963_v28  ;;  %v3100_v60 = vmul.f32 %v3636_v6, %v3099_v7  ;;  %v3285_v28 = vld [vmem:[#allocation13 + $0x78] sm:$0xff] }
 0xa70   :  { %3290 = vmatpush.msra.mxu0 %v3285_v28 }
 0xa71   :  { %v5975_v30 = vadd.f32 %v3113_v13, %v3112_v15  ;;  %v3101_v43 = vadd.f32 %v3636_v6, %v3100_v60 }
 0xa72   :  { %3291 = vmatpush.msra.mxu0 %v3284_v3 }
 0xa73   :  { %3639 = vtanh.f32 %v5975_v30  ;;  %v3105_v14 = vsel %vm3104_vm2, %v3636_v6, %v3101_v43 }
 0xa74   :  { %v3110_v17 = vsel %vm3107_vm3, %v3109_v1, %v3105_v14  ;;  %3292 = vmatpush.msra.mxu0 %v3283_v24 }
 0xa76   :  { %3293 = vmatpush.msra.mxu0 %v3282_v42 }
 0xa78   :  { %3294 = vmatpush.msra.mxu0 %v3281_v22 }
 0xa79   :  { %v3640_v37 = vpop.eup %3639 }
 0xa7a   :  { %v3116_v4 = vmul.f32 %v3640_v37, %v3110_v17  ;;  %3295 = vmatpush.msra.mxu0 %v3280_v18 }
 0xa7c   :  { %3138 = vmatmul.f32.vlgmr.msrb.gmra.mxu0 %v3116_v4  ;;  %3158 = vmatmul.f32.vlgmr.msrb.gmra.mxu1 %v3116_v4 }
 0xa7d   :  { %3178 = vmatmul.f32.vlgmr.msrb.gmra.mxu2 %v3116_v4  ;;  %3198 = vmatmul.f32.vlgmr.msrb.gmra.mxu3 %v3116_v4 }
 0xa7e   :  { %3296 = vmatpush.msra.mxu0 %v3279_v8 }
 0xa80   :  { %3297 = vmatpush.msra.mxu0 %v3278_v29 }
 0xa82   :  { %3298 = vmatpush.msra.mxu0 %v3277_v45 }
 0xa84   :  { %3299 = vmatpush.msra.mxu0 %v3276_v41 }
 0xa86   :  { %3300 = vmatpush.msra.mxu0 %v3275_v34 }
 0xa88   :  { %3301 = vmatpush.msra.mxu0 %v3274_v48 }
 0xa8a   :  { %3302 = vmatpush.msra.mxu0 %v3273_v39 }
 0xa8c   :  { %3303 = vmatpush.msra.mxu0 %v3272_v63 }
 0xa8e   :  { %3304 = vmatpush.msra.mxu0 %v3271_v55 }
 0xa90   :  { %3305 = vmatpush.msra.mxu0 %v3270_v56 }
 0xaf9   :  { %v3139_v31 = vpop.f32.mrf.mxu0  ;;  %v3159_v47 = vpop.f32.mrf.mxu1 }
 0xafa   :  { %v3202_v49 = vadd.f32 %v3139_v31, %v1832_v40  ;;  %v3203_v16 = vadd.f32 %v3159_v47, %v1873_v61 }
 0xafc   :  { %v3383_v58 = vmul.f32 -1.442695, %v3202_v49  ;;  %v3384_v33 = vmul.f32 -1.442695, %v3203_v16 }
 0xafe   :  { %3641 = vpow2.f32 %v3383_v58 }
 0xaff   :  { %3643 = vpow2.f32 %v3384_v33 }
 0xb00   :  { %v3199_v27 = vpop.f32.mrf.mxu3  ;;  %v3179_v11 = vpop.f32.mrf.mxu2 }
 0xb01   :  { %v3205_v2 = vadd.f32 %v3199_v27, %v1955_v62  ;;  %v3204_v32 = vadd.f32 %v3179_v11, %v1914_v52 }
 0xb03   :  { %v3385_v53 = vmul.f32 -1.442695, %v3205_v2 }
 0xb04   :  { %v3642_v0 = vpop.eup %3641 }
 0xb05   :  { %v3644_v36 = vpop.eup %3643  ;;  %v3209_v26 = vadd.f32 1.0, %v3642_v0  ;;  %3645 = vpow2.f32 %v3385_v53 }
 0xb06   :  { %v3228_v25 = vadd.f32 1.0, %v3644_v36 }
 0xb07   :  { %3647 = vrcp.f32 %v3209_v26  ;;  %v3221_v54 = vand.u32 2147483648, %v3209_v26  ;;  %v3219_v38 = vand.u32 2147483647, %v3209_v26  ;;  %vm3215_vm6 = vweird.f32 %v3209_v26 }
 0xb08   :  { %3649 = vrcp.f32 %v3228_v25  ;;  %v3240_v23 = vand.u32 2147483648, %v3228_v25  ;;  %v3238_v15 = vand.u32 2147483647, %v3228_v25  ;;  %vm3234_vm7 = vweird.f32 %v3228_v25 }
 0xb09   :  { %v3222_v43 = vor.u32 1.1754944e-38, %v3221_v54  ;;  %vm3220_vm10 = vcmp.eq.f32.partialorder %v3219_v38, 8.507059e+37 }
 0xb0a   :  { %v3241_v14 = vor.u32 1.1754944e-38, %v3240_v23  ;;  %vm3239_vm11 = vcmp.eq.f32.partialorder %v3238_v15, 8.507059e+37 }
 0xb0b   :  { %v3646_v50 = vpop.eup %3645 }
 0xb0c   :  { %v3248_v6 = vadd.f32 1.0, %v3646_v50 }
 0xb0d   :  { %v3648_v35 = vpop.eup %3647 }
 0xb0e   :  { %v3650_v44 = vpop.eup %3649  ;;  %v3211_v57 = vmul.f32 %v3648_v35, %v3209_v26  ;;  %3651 = vrcp.f32 %v3248_v6  ;;  %vm3216_vm4 = vweird.f32 %v3648_v35  ;;  %v3260_v29 = vand.u32 2147483648, %v3248_v6 }
 0xb0f   :  { %v3230_v51 = vmul.f32 %v3650_v44, %v3228_v25  ;;  %3653 = vtanh.f32 %v3204_v32  ;;  %vm3235_vm5 = vweird.f32 %v3650_v44  ;;  %vm3217_vm8 = vmor %vm3215_vm6, %vm3216_vm4  ;;  %vm3254_vm13 = vweird.f32 %v3248_v6 }
 0xb10   :  { %v3212_v5 = vsub.f32 1.0, %v3211_v57  ;;  %vm3236_vm9 = vmor %vm3234_vm7, %vm3235_vm5  ;;  %v3258_v45 = vand.u32 2147483647, %v3248_v6  ;;  %v3261_v40 = vor.u32 1.1754944e-38, %v3260_v29 }
 0xb11   :  { %v3231_v21 = vsub.f32 1.0, %v3230_v51 }
 0xb12   :  { %v3213_v7 = vmul.f32 %v3648_v35, %v3212_v5  ;;  %vm3259_vm15 = vcmp.eq.f32.partialorder %v3258_v45, 8.507059e+37 }
 0xb13   :  { %v3232_v13 = vmul.f32 %v3650_v44, %v3231_v21 }
 0xb14   :  { %v3652_v60 = vpop.eup %3651  ;;  %v3214_v46 = vadd.f32 %v3648_v35, %v3213_v7 }
 0xb15   :  { %v3233_v10 = vadd.f32 %v3650_v44, %v3232_v13  ;;  %v3250_v19 = vmul.f32 %v3652_v60, %v3248_v6  ;;  %v3654_v37 = vpop.eup %3653  ;;  %vm3255_vm12 = vweird.f32 %v3652_v60 }
 0xb16   :  { %v3218_v1 = vsel %vm3217_vm8, %v3648_v35, %v3214_v46  ;;  %vm3256_vm14 = vmor %vm3254_vm13, %vm3255_vm12 }
 0xb17   :  { %v3223_v17 = vsel %vm3220_vm10, %v3222_v43, %v3218_v1  ;;  %v3237_v4 = vsel %vm3236_vm9, %v3650_v44, %v3233_v10  ;;  %v3251_v28 = vsub.f32 1.0, %v3250_v19 }
 0xb18   :  { %v3242_v3 = vsel %vm3239_vm11, %v3241_v14, %v3237_v4  ;;  %v3265_v24 = vmul.f32 %v3654_v37, %v3223_v17 }
 0xb19   :  { %v3264_v42 = vmul.f32 %v3242_v3, %v5975_v30  ;;  %v3252_v22 = vmul.f32 %v3652_v60, %v3251_v28  ;;  %v3400_v30 = vld [vmem:[%s5999_s6] ss:$0 sm:$0xff] }
 0xb1b   :  { %v3266_v18 = vadd.f32 %v3265_v24, %v3264_v42  ;;  %v3253_v8 = vadd.f32 %v3652_v60, %v3252_v22 }
 0xb1d   :  { %3655 = vtanh.f32 %v3266_v18  ;;  %v3257_v59 = vsel %vm3256_vm14, %v3652_v60, %v3253_v8 }
 0xb1e   :  { %v3262_v61 = vsel %vm3259_vm15, %v3261_v40, %v3257_v59 }
 0xb23   :  { %v3656_v20 = vpop.eup %3655 }
 0xb24   :  { %v3268_v31 = vmul.f32 %v3656_v20, %v3262_v61 }
 0xb26   :  { %3306 = vmatmul.f32.vlgmr.msra.gmra.mxu0 %v3268_v31 }
 0xba3   :  { %v3307_v47 = vpop.f32.mrf.mxu0 }
 0xba4   :  { %v3308_v41 = vadd.f32 %v3400_v30, %v3307_v47 }
 0xba6   :  { %3310 = vst [vmem:[#allocation15] sm:$0xff] %v3308_v41 }
 0xba7   :  { %3321 = dma.vmem_to_hbm [thread:$0]  %s3317_s10, 128, %s3319_s14, [#allocation6]  }
 0xba8   :  { %3961 = dma.done.wait [#allocation6], 128  }
 0xba9   :  { %3962 = vsyncadd [#allocation6], 4294967168 }
 0xbaa   :  { %3326 = vsyncpa [#allocation5], 1 }
 0xbab   :  { %3327 = vsyncpa [#allocation8], 1 }
 0xbac   :  { %3328 = vsyncpa [#allocation11], 1 }
 0xbad   :  { %3329 = vsyncpa [#allocation14], 1 }
 0xbae   :  { %3330 = vsyncpa [#allocation6], 1 }

</bundles_post_ra>
